<compile_context>
chip_gen: v7x
topology: tpu7x:2x2x1
jax: 0.10.0
libtpu: 0.0.40
codegen_flags: <defaults>
</compile_context>

<pallas_src>
import jax
import jax.numpy as jnp
from jax.experimental import pallas as pl
from jax.experimental.pallas import tpu as pltpu

FEAT = 1537            # rcrc_s feature dim
FEAT_PAD = 1664        # 13 * 128 — lane-aligned contraction dim
HID = 256              # hidden width of v / fc heads
ACT = 3                # action dim (alpha / beta heads)
OUT_PAD = 128          # lane-dense packed output width
ROW_ALIGN = 16         # bf16 sublane packing (16, 128) tiles
# packed output layout: col 0 -> v, cols 1..3 -> alpha, cols 4..6 -> beta


def _round_up(n, m):
    return ((n + m - 1) // m) * m


def acc_kernel(x_ref, w1_ref, b1_ref, w2_ref, b2_ref, out_ref):
    # x_ref: (TB, FEAT_PAD) bf16   w1: (FEAT_PAD, 2*HID) bf16
    # b1: (1, 2*HID) f32           w2: (2*HID, OUT_PAD) bf16   b2: (1, OUT_PAD) f32

    # fused trunk: [value-hidden | policy-hidden] in one bf16 MXU pass (f32 acc)
    h = jnp.dot(x_ref[...], w1_ref[...], preferred_element_type=jnp.float32)
    h = jnp.maximum(h + b1_ref[...], 0.0)                      # f32 bias + ReLU

    # fused heads: block-diagonal W2 gives [v | alpha_pre | beta_pre | 0...]
    y = jnp.dot(h.astype(jnp.bfloat16), w2_ref[...],
                preferred_element_type=jnp.float32) + b2_ref[...]

    # softplus(.)+1 on the alpha/beta lanes only (cols 1..6); v passes through
    lane = jax.lax.broadcasted_iota(jnp.int32, y.shape, dimension=1)
    head_mask = (lane >= 1) & (lane < 1 + 2 * ACT)
    sp = jnp.maximum(y, 0.0) + jnp.log1p(jnp.exp(-jnp.abs(y))) + 1.0   # f32
    out_ref[...] = jnp.where(head_mask, sp, y)


def pack_params(params):
    """Pack the 10 per-layer params into fused/padded kernel weights.
    Matmul weights go to bf16; biases stay f32."""
    (wv1, bv1, wv2, bv2, wfc, bfc, wa, ba, wb, bb) = params

    # stage 1: concat value + policy trunks along N, zero-pad K to FEAT_PAD
    w1 = jnp.concatenate([wv1, wfc], axis=1)                       # (1537, 512)
    w1 = jnp.pad(w1, ((0, FEAT_PAD - FEAT), (0, 0)))               # (1664, 512)
    w1 = w1.astype(jnp.bfloat16)
    b1 = jnp.concatenate([bv1, bfc], axis=1)                       # (1, 512) f32

    # stage 2: block-diagonal packing — value hidden feeds col 0 only,
    # policy hidden feeds cols 1..6 only.
    w2 = jnp.zeros((2 * HID, OUT_PAD), jnp.float32)
    w2 = w2.at[:HID, 0:1].set(wv2)
    w2 = w2.at[HID:, 1:1 + ACT].set(wa)
    w2 = w2.at[HID:, 1 + ACT:1 + 2 * ACT].set(wb)
    w2 = w2.astype(jnp.bfloat16)
    b2 = jnp.zeros((1, OUT_PAD), jnp.float32)
    b2 = b2.at[:, 0:1].set(bv2)
    b2 = b2.at[:, 1:1 + ACT].set(ba)
    b2 = b2.at[:, 1 + ACT:1 + 2 * ACT].set(bb)
    return w1, b1, w2, b2


def _choose_tile(B, block_b):
    """Pick a 16-aligned batch tile; prefer >= 2 grid steps so the parallel
    batch axis can be split across both TensorCores (megacore / v7x)."""
    block_b = max(_round_up(block_b, ROW_ALIGN), ROW_ALIGN)
    b_pad = _round_up(B, ROW_ALIGN)
    if b_pad <= 2 * ROW_ALIGN:
        return b_pad
    half = _round_up((b_pad + 1) // 2, ROW_ALIGN)
    return min(block_b, half)


def _weight_spec(shape, single_buffer):
    # Constant index_map -> block never changes; single-buffer it when supported.
    if single_buffer:
        return pl.BlockSpec(shape, lambda i: (0, 0), pipeline_mode=pl.Buffered(1))
    return pl.BlockSpec(shape, lambda i: (0, 0))


def _acc_call(x_p, w1, b1, w2, b2, TB, single_buffer):
    Bp = x_p.shape[0]
    grid = (Bp // TB,)

    cost = pl.CostEstimate(
        flops=2 * Bp * FEAT_PAD * (2 * HID) + 2 * Bp * (2 * HID) * OUT_PAD,
        transcendentals=2 * Bp * OUT_PAD,        # exp + log1p per packed lane
        bytes_accessed=(Bp * FEAT_PAD * 2 + FEAT_PAD * 2 * HID * 2
                        + 2 * HID * 4 + 2 * HID * OUT_PAD * 2 + OUT_PAD * 4
                        + Bp * OUT_PAD * 4),
    )

    return pl.pallas_call(
        acc_kernel,
        out_shape=jax.ShapeDtypeStruct((Bp, OUT_PAD), jnp.float32),
        grid=grid,
        in_specs=[
            pl.BlockSpec((TB, FEAT_PAD), lambda i: (i, 0)),          # x tile (bf16)
            _weight_spec((FEAT_PAD, 2 * HID), single_buffer),        # W1 (resident)
            _weight_spec((1, 2 * HID), single_buffer),               # b1
            _weight_spec((2 * HID, OUT_PAD), single_buffer),         # W2 (resident)
            _weight_spec((1, OUT_PAD), single_buffer),               # b2
        ],
        out_specs=pl.BlockSpec((TB, OUT_PAD), lambda i: (i, 0)),
        compiler_params=pltpu.CompilerParams(
            dimension_semantics=("parallel",),
            vmem_limit_bytes=48 * 1024 * 1024,
        ),
        cost_estimate=cost,
    )(x_p, w1, b1, w2, b2)


def acc_forward(x, packed_params, *, block_b=512):
    """x: (B, 1537) float32 features (rcrc_s). Returns ((alpha, beta), v, rcrc_s)."""
    B = x.shape[0]
    w1, b1, w2, b2 = packed_params

    TB = _choose_tile(B, block_b)
    Bp = _round_up(B, TB)

    # Fuse the FEAT -> FEAT_PAD pad with the bf16 cast: one elementwise pass
    # emitting half-width bf16, instead of a padded f32 copy + separate cast.
    x_p = jnp.pad(x.astype(jnp.bfloat16),
                  ((0, Bp - B), (0, FEAT_PAD - FEAT)))

    try:
        out = _acc_call(x_p, w1, b1, w2, b2, TB, single_buffer=True)
        out = jax.block_until_ready(out)
    except Exception:
        # pl.Buffered(1) on invariant weight blocks not supported on this
        # jax build — fall back to default double-buffering.
        out = _acc_call(x_p, w1, b1, w2, b2, TB, single_buffer=False)

    v = out[:B, 0:1]
    alpha = out[:B, 1:1 + ACT]
    beta = out[:B, 1 + ACT:1 + 2 * ACT]
    rcrc_s = x  # x.view(-1, 1537) — already flattened
    return (alpha, beta), v, rcrc_s


def init_params(key):
    """PyTorch-style uniform(-1/sqrt(fan_in), 1/sqrt(fan_in)) init.
    Weights stored transposed: (in_features, out_features)."""
    ks = jax.random.split(key, 10)

    def lin(kw, kb, fan_in, fan_out):
        bound = 1.0 / jnp.sqrt(jnp.float32(fan_in))
        w = jax.random.uniform(kw, (fan_in, fan_out), jnp.float32, -bound, bound)
        b = jax.random.uniform(kb, (1, fan_out), jnp.float32, -bound, bound)
        return w, b

    wv1, bv1 = lin(ks[0], ks[1], FEAT, HID)   # v[0]
    wv2, bv2 = lin(ks[2], ks[3], HID, 1)      # v[2]
    wfc, bfc = lin(ks[4], ks[5], FEAT, HID)   # fc[0]
    wa, ba = lin(ks[6], ks[7], HID, ACT)      # alpha_head[0]
    wb, bb = lin(ks[8], ks[9], HID, ACT)      # beta_head[0]
    return (wv1, bv1, wv2, bv2, wfc, bfc, wa, ba, wb, bb)


def acc_reference(x, params):
    """Pure-JAX f32 reference matching the PyTorch module."""
    (wv1, bv1, wv2, bv2, wfc, bfc, wa, ba, wb, bb) = params
    h_v = jnp.maximum(x @ wv1 + bv1, 0.0)
    v = h_v @ wv2 + bv2
    p = jnp.maximum(x @ wfc + bfc, 0.0)
    alpha = jax.nn.softplus(p @ wa + ba) + 1.0
    beta = jax.nn.softplus(p @ wb + bb) + 1.0
    return alpha, beta, v


if __name__ == "__main__":
    key = jax.random.PRNGKey(0)
    k_params, k_x = jax.random.split(key)

    B = 8  # small batch
    params = init_params(k_params)
    packed = pack_params(params)
    x = jax.random.normal(k_x, (B, FEAT), jnp.float32)  # pre-flattened rcrc_s features

    (alpha, beta), v, rcrc_s = acc_forward(x, packed)
    jax.block_until_ready((alpha, beta, v, rcrc_s))

    # sanity check against pure-JAX f32 reference (bf16 matmuls -> looser tol)
    a_ref, b_ref, v_ref = acc_reference(x, params)
    assert alpha.shape == (B, ACT) and beta.shape == (B, ACT) and v.shape == (B, 1)
    assert rcrc_s.shape == (B, FEAT)
    assert jnp.allclose(alpha, a_ref, atol=2e-2, rtol=2e-2)
    assert jnp.allclose(beta, b_ref, atol=2e-2, rtol=2e-2)
    assert jnp.allclose(v, v_ref, atol=2e-2, rtol=2e-2)
    # alpha, beta must be > 1 (Beta-distribution concentration params)
    assert bool(jnp.all(alpha > 1.0)) and bool(jnp.all(beta > 1.0))

    print("KERNEL_OK")
</pallas_src>

<mosaic_0001>
module attributes {stable_mosaic.version = 11 : i64} {
  func.func @acc_kernel(%arg0: i32, %arg1: memref<16x1664xbf16, #tpu.memory_space<vmem>>, %arg2: memref<1664x512xbf16, #tpu.memory_space<vmem>>, %arg3: memref<1x512xf32, #tpu.memory_space<vmem>>, %arg4: memref<512x128xbf16, #tpu.memory_space<vmem>>, %arg5: memref<1x128xf32, #tpu.memory_space<vmem>>, %arg6: memref<16x128xf32, #tpu.memory_space<vmem>>) attributes {dimension_semantics = [#tpu.dimension_semantics<parallel>], iteration_bounds = array<i64: 1>, scalar_prefetch = 0 : i64, scratch_operands = 0 : i64, tpu.core_type = #tpu.core_type<tc>, window_params = [{transform_indices = @transform_0, window_bounds = array<i64: 16, 1664>}, {pipeline_mode = #tpu.pipeline_mode<synchronous>, transform_indices = @transform_1, window_bounds = array<i64: 1664, 512>}, {pipeline_mode = #tpu.pipeline_mode<synchronous>, transform_indices = @transform_2, window_bounds = array<i64: 1, 512>}, {pipeline_mode = #tpu.pipeline_mode<synchronous>, transform_indices = @transform_3, window_bounds = array<i64: 512, 128>}, {pipeline_mode = #tpu.pipeline_mode<synchronous>, transform_indices = @transform_4, window_bounds = array<i64: 1, 128>}, {transform_indices = @transform_5, window_bounds = array<i64: 16, 128>}]} {
    %c0 = arith.constant 0 : index
    %c0_0 = arith.constant 0 : index
    %0 = vector.load %arg1[%c0, %c0_0] : memref<16x1664xbf16, #tpu.memory_space<vmem>>, vector<16x1664xbf16>
    %c0_1 = arith.constant 0 : index
    %c0_2 = arith.constant 0 : index
    %1 = vector.load %arg2[%c0_1, %c0_2] : memref<1664x512xbf16, #tpu.memory_space<vmem>>, vector<1664x512xbf16>
    %cst = arith.constant dense<0.000000e+00> : vector<16x512xf32>
    %2 = tpu.matmul %0, %1, %cst {dimension_numbers = #tpu.dot_dimension_numbers<[1], [0], [0], [1], [0, 0, 1, 1], [], []>} : vector<16x1664xbf16>, vector<1664x512xbf16>, vector<16x512xf32> -> vector<16x512xf32>
    %c0_3 = arith.constant 0 : index
    %c0_4 = arith.constant 0 : index
    %3 = vector.load %arg3[%c0_3, %c0_4] : memref<1x512xf32, #tpu.memory_space<vmem>>, vector<1x512xf32>
    %4 = vector.broadcast %3 : vector<1x512xf32> to vector<16x512xf32>
    %5 = arith.addf %2, %4 : vector<16x512xf32>
    %cst_5 = arith.constant 0.000000e+00 : f32
    %6 = vector.broadcast %cst_5 : f32 to vector<16x512xf32>
    %7 = arith.maximumf %5, %6 : vector<16x512xf32>
    %8 = arith.truncf %7 : vector<16x512xf32> to vector<16x512xbf16>
    %c0_6 = arith.constant 0 : index
    %c0_7 = arith.constant 0 : index
    %9 = vector.load %arg4[%c0_6, %c0_7] : memref<512x128xbf16, #tpu.memory_space<vmem>>, vector<512x128xbf16>
    %cst_8 = arith.constant dense<0.000000e+00> : vector<16x128xf32>
    %10 = tpu.matmul %8, %9, %cst_8 {dimension_numbers = #tpu.dot_dimension_numbers<[1], [0], [0], [1], [0, 0, 1, 1], [], []>} : vector<16x512xbf16>, vector<512x128xbf16>, vector<16x128xf32> -> vector<16x128xf32>
    %c0_9 = arith.constant 0 : index
    %c0_10 = arith.constant 0 : index
    %11 = vector.load %arg5[%c0_9, %c0_10] : memref<1x128xf32, #tpu.memory_space<vmem>>, vector<1x128xf32>
    %12 = vector.broadcast %11 : vector<1x128xf32> to vector<16x128xf32>
    %13 = arith.addf %10, %12 : vector<16x128xf32>
    %14 = tpu.iota {dimensions = array<i32: 1>} : vector<16x128xi32>
    %c1_i32 = arith.constant 1 : i32
    %15 = vector.broadcast %c1_i32 : i32 to vector<16x128xi32>
    %16 = arith.cmpi sge, %14, %15 : vector<16x128xi32>
    %c7_i32 = arith.constant 7 : i32
    %17 = vector.broadcast %c7_i32 : i32 to vector<16x128xi32>
    %18 = arith.cmpi slt, %14, %17 : vector<16x128xi32>
    %19 = arith.andi %16, %18 : vector<16x128xi1>
    %cst_11 = arith.constant 0.000000e+00 : f32
    %20 = vector.broadcast %cst_11 : f32 to vector<16x128xf32>
    %21 = arith.maximumf %13, %20 : vector<16x128xf32>
    %22 = math.absf %13 : vector<16x128xf32>
    %cst_12 = arith.constant 0.000000e+00 : f32
    %23 = vector.broadcast %cst_12 : f32 to vector<16x128xf32>
    %24 = arith.subf %23, %22 : vector<16x128xf32>
    %25 = math.exp %24 : vector<16x128xf32>
    %26 = math.log1p %25 : vector<16x128xf32>
    %27 = arith.addf %21, %26 : vector<16x128xf32>
    %cst_13 = arith.constant 1.000000e+00 : f32
    %28 = vector.broadcast %cst_13 : f32 to vector<16x128xf32>
    %29 = arith.addf %27, %28 : vector<16x128xf32>
    %30 = arith.select %19, %29, %13 : vector<16x128xi1>, vector<16x128xf32>
    %c0_14 = arith.constant 0 : index
    %c0_15 = arith.constant 0 : index
    %31 = vector.load %arg6[%c0_14, %c0_15] : memref<16x128xf32, #tpu.memory_space<vmem>>, vector<16x128xf32>
    tpu.vector_store %arg6[%c0_14, %c0_15], %30 {strides = array<i32>} : memref<16x128xf32, #tpu.memory_space<vmem>>, vector<16x128xf32>,
    return
  }
  func.func @transform_0(%arg0: i32) -> (i32, i32) {
    %c0_i32 = arith.constant 0 : i32
    %c0_i32_0 = arith.constant 0 : i32
    return %arg0, %c0_i32 : i32, i32
  }
  func.func @transform_1(%arg0: i32) -> (i32, i32) {
    %c0_i32 = arith.constant 0 : i32
    %c0_i32_0 = arith.constant 0 : i32
    %c0_i32_1 = arith.constant 0 : i32
    return %c0_i32, %c0_i32_0 : i32, i32
  }
  func.func @transform_2(%arg0: i32) -> (i32, i32) {
    %c0_i32 = arith.constant 0 : i32
    %c0_i32_0 = arith.constant 0 : i32
    %c0_i32_1 = arith.constant 0 : i32
    return %c0_i32, %c0_i32_0 : i32, i32
  }
  func.func @transform_3(%arg0: i32) -> (i32, i32) {
    %c0_i32 = arith.constant 0 : i32
    %c0_i32_0 = arith.constant 0 : i32
    %c0_i32_1 = arith.constant 0 : i32
    return %c0_i32, %c0_i32_0 : i32, i32
  }
  func.func @transform_4(%arg0: i32) -> (i32, i32) {
    %c0_i32 = arith.constant 0 : i32
    %c0_i32_0 = arith.constant 0 : i32
    %c0_i32_1 = arith.constant 0 : i32
    return %c0_i32, %c0_i32_0 : i32, i32
  }
  func.func @transform_5(%arg0: i32) -> (i32, i32) {
    %c0_i32 = arith.constant 0 : i32
    %c0_i32_0 = arith.constant 0 : i32
    return %arg0, %c0_i32 : i32, i32
  }
}

module attributes {stable_mosaic.version = 11 : i64} {
  func.func @acc_kernel(%arg0: i32, %arg1: memref<16x1664xbf16, #tpu.memory_space<vmem>>, %arg2: memref<1664x512xbf16, #tpu.memory_space<vmem>>, %arg3: memref<1x512xf32, #tpu.memory_space<vmem>>, %arg4: memref<512x128xbf16, #tpu.memory_space<vmem>>, %arg5: memref<1x128xf32, #tpu.memory_space<vmem>>, %arg6: memref<16x128xf32, #tpu.memory_space<vmem>>) attributes {dimension_semantics = [#tpu.dimension_semantics<parallel>], iteration_bounds = array<i64: 1>, scalar_prefetch = 0 : i64, scratch_operands = 0 : i64, tpu.core_type = #tpu.core_type<tc>, window_params = [{transform_indices = @transform_0, window_bounds = array<i64: 16, 1664>}, {pipeline_mode = #tpu.pipeline_mode<synchronous>, transform_indices = @transform_1, window_bounds = array<i64: 1664, 512>}, {pipeline_mode = #tpu.pipeline_mode<synchronous>, transform_indices = @transform_2, window_bounds = array<i64: 1, 512>}, {pipeline_mode = #tpu.pipeline_mode<synchronous>, transform_indices = @transform_3, window_bounds = array<i64: 512, 128>}, {pipeline_mode = #tpu.pipeline_mode<synchronous>, transform_indices = @transform_4, window_bounds = array<i64: 1, 128>}, {transform_indices = @transform_5, window_bounds = array<i64: 16, 128>}]} {
    %c0 = arith.constant 0 : index
    %c0_0 = arith.constant 0 : index
    %0 = vector.load %arg1[%c0, %c0_0] : memref<16x1664xbf16, #tpu.memory_space<vmem>>, vector<16x1664xbf16>
    %c0_1 = arith.constant 0 : index
    %c0_2 = arith.constant 0 : index
    %1 = vector.load %arg2[%c0_1, %c0_2] : memref<1664x512xbf16, #tpu.memory_space<vmem>>, vector<1664x512xbf16>
    %cst = arith.constant dense<0.000000e+00> : vector<16x512xf32>
    %2 = tpu.matmul %0, %1, %cst {dimension_numbers = #tpu.dot_dimension_numbers<[1], [0], [0], [1], [0, 0, 1, 1], [], []>} : vector<16x1664xbf16>, vector<1664x512xbf16>, vector<16x512xf32> -> vector<16x512xf32>
    %c0_3 = arith.constant 0 : index
    %c0_4 = arith.constant 0 : index
    %3 = vector.load %arg3[%c0_3, %c0_4] : memref<1x512xf32, #tpu.memory_space<vmem>>, vector<1x512xf32>
    %4 = vector.broadcast %3 : vector<1x512xf32> to vector<16x512xf32>
    %5 = arith.addf %2, %4 : vector<16x512xf32>
    %cst_5 = arith.constant 0.000000e+00 : f32
    %6 = vector.broadcast %cst_5 : f32 to vector<16x512xf32>
    %7 = arith.maximumf %5, %6 : vector<16x512xf32>
    %8 = arith.truncf %7 : vector<16x512xf32> to vector<16x512xbf16>
    %c0_6 = arith.constant 0 : index
    %c0_7 = arith.constant 0 : index
    %9 = vector.load %arg4[%c0_6, %c0_7] : memref<512x128xbf16, #tpu.memory_space<vmem>>, vector<512x128xbf16>
    %cst_8 = arith.constant dense<0.000000e+00> : vector<16x128xf32>
    %10 = tpu.matmul %8, %9, %cst_8 {dimension_numbers = #tpu.dot_dimension_numbers<[1], [0], [0], [1], [0, 0, 1, 1], [], []>} : vector<16x512xbf16>, vector<512x128xbf16>, vector<16x128xf32> -> vector<16x128xf32>
    %c0_9 = arith.constant 0 : index
    %c0_10 = arith.constant 0 : index
    %11 = vector.load %arg5[%c0_9, %c0_10] : memref<1x128xf32, #tpu.memory_space<vmem>>, vector<1x128xf32>
    %12 = vector.broadcast %11 : vector<1x128xf32> to vector<16x128xf32>
    %13 = arith.addf %10, %12 : vector<16x128xf32>
    %14 = tpu.iota {dimensions = array<i32: 1>} : vector<16x128xi32>
    %c1_i32 = arith.constant 1 : i32
    %15 = vector.broadcast %c1_i32 : i32 to vector<16x128xi32>
    %16 = arith.cmpi sge, %14, %15 : vector<16x128xi32>
    %c7_i32 = arith.constant 7 : i32
    %17 = vector.broadcast %c7_i32 : i32 to vector<16x128xi32>
    %18 = arith.cmpi slt, %14, %17 : vector<16x128xi32>
    %19 = arith.andi %16, %18 : vector<16x128xi1>
    %cst_11 = arith.constant 0.000000e+00 : f32
    %20 = vector.broadcast %cst_11 : f32 to vector<16x128xf32>
    %21 = arith.maximumf %13, %20 : vector<16x128xf32>
    %22 = math.absf %13 : vector<16x128xf32>
    %cst_12 = arith.constant 0.000000e+00 : f32
    %23 = vector.broadcast %cst_12 : f32 to vector<16x128xf32>
    %24 = arith.subf %23, %22 : vector<16x128xf32>
    %25 = math.exp %24 : vector<16x128xf32>
    %26 = math.log1p %25 : vector<16x128xf32>
    %27 = arith.addf %21, %26 : vector<16x128xf32>
    %cst_13 = arith.constant 1.000000e+00 : f32
    %28 = vector.broadcast %cst_13 : f32 to vector<16x128xf32>
    %29 = arith.addf %27, %28 : vector<16x128xf32>
    %30 = arith.select %19, %29, %13 : vector<16x128xi1>, vector<16x128xf32>
    %c0_14 = arith.constant 0 : index
    %c0_15 = arith.constant 0 : index
    %31 = vector.load %arg6[%c0_14, %c0_15] : memref<16x128xf32, #tpu.memory_space<vmem>>, vector<16x128xf32>
    tpu.vector_store %arg6[%c0_14, %c0_15], %30 {strides = array<i32>} : memref<16x128xf32, #tpu.memory_space<vmem>>, vector<16x128xf32>,
    return
  }
  func.func @transform_0(%arg0: i32) -> (i32, i32) {
    %c0_i32 = arith.constant 0 : i32
    %c0_i32_0 = arith.constant 0 : i32
    return %arg0, %c0_i32 : i32, i32
  }
  func.func @transform_1(%arg0: i32) -> (i32, i32) {
    %c0_i32 = arith.constant 0 : i32
    %c0_i32_0 = arith.constant 0 : i32
    %c0_i32_1 = arith.constant 0 : i32
    return %c0_i32, %c0_i32_0 : i32, i32
  }
  func.func @transform_2(%arg0: i32) -> (i32, i32) {
    %c0_i32 = arith.constant 0 : i32
    %c0_i32_0 = arith.constant 0 : i32
    %c0_i32_1 = arith.constant 0 : i32
    return %c0_i32, %c0_i32_0 : i32, i32
  }
  func.func @transform_3(%arg0: i32) -> (i32, i32) {
    %c0_i32 = arith.constant 0 : i32
    %c0_i32_0 = arith.constant 0 : i32
    %c0_i32_1 = arith.constant 0 : i32
    return %c0_i32, %c0_i32_0 : i32, i32
  }
  func.func @transform_4(%arg0: i32) -> (i32, i32) {
    %c0_i32 = arith.constant 0 : i32
    %c0_i32_0 = arith.constant 0 : i32
    %c0_i32_1 = arith.constant 0 : i32
    return %c0_i32, %c0_i32_0 : i32, i32
  }
  func.func @transform_5(%arg0: i32) -> (i32, i32) {
    %c0_i32 = arith.constant 0 : i32
    %c0_i32_0 = arith.constant 0 : i32
    return %arg0, %c0_i32 : i32, i32
  }
}

</mosaic_0001>

<bundles_post_ra>
// kernel: tpu_custom_call.1
= control target key start
LH: loop header
LB: loop body
LE: loop exit
PB: predicated region body
PF: predicated region fallthrough
CT: control target
= control target key end

     0   :  { %10 = vsyncpa [#allocation3], 0  ;;  %s5222_s0 = inlined_call_operand.hbm [shape: bf16[16,1664], index: 0, kind: input, shape index: {}]   ;;  %s5223_s1 = inlined_call_operand.hbm [shape: bf16[1664,512], index: 1, kind: input, shape index: {}]   ;;  %s5224_s2 = inlined_call_operand.hbm [shape: f32[1,512], index: 2, kind: input, shape index: {}]   ;;  %s5225_s3 = inlined_call_operand.hbm [shape: bf16[512,128], index: 3, kind: input, shape index: {}]   ;;  %s5226_s4 = inlined_call_operand.hbm [shape: f32[1,128], index: 4, kind: input, shape index: {}]   ;;  %s5227_s5 = inlined_call_operand.hbm [shape: f32[16,128], index: 5, kind: output, shape index: {}]  }
   0x1   :  { %11 = vsyncpa [#allocation6], 0 }
   0x2   :  { %12 = vsyncpa [#allocation9], 0 }
   0x3   :  { %13 = vsyncpa [#allocation4], 0  ;;  %s5103_s18 = smov [#allocation5]   ;;  %s4963_s22 = scalar_lea.hbm %s5223_s1, 53248 }
   0x4   :  { %s31_s19 = sshll.u32 %s5103_s18, 4  ;;  %p4964_p0 = scmp.ne.s32.totalorder %s5223_s1, %s4963_s22  ;;  %s32_s19 = int_to_ptr.vmem [resolvable:$true] %s31_s19 }
   0x5   :  { %p4967_p1 = scmp.lt.u32.totalorder %s4963_s22, %s5223_s1 }
   0x7   :  { %p4969_p2 = pnand %p4967_p1, %p4964_p0 }
   0x9   :  { %4972 = shalt.err (!%p4969_p2)
}
   0xa   :  { %s4973_s27 = scalar_lea.vmem %s32_s19, 53248  ;;  %p4978_p4 = scmp.lt.s32.totalorder %s32_s19, %s32_s19 }
   0xb   :  { %p4974_p3 = scmp.ne.s32.totalorder %s32_s19, %s4973_s27  ;;  %p4979_p5 = scmp.lt.s32.totalorder %s4973_s27, %s4973_s27 }
   0xd   :  { %p4980_p6 = por %p4979_p5, %p4978_p4 }
   0xf   :  { %p4981_p7 = pnand %p4980_p6, %p4974_p3 }
  0x11   :  { %4984 = shalt.err (!%p4981_p7)
}
  0x12   :  { %s5104_s28 = smov 256   ;;  %s5105_s29 = smov 16  }
  0x13   :  { %37 = dma.hbm_to_vmem [thread:$0]  %s5223_s1, 53248, %s32_s19, [#allocation6], %s5104_s28, %s5104_s28, %s5105_s29  }
  0x14   :  { %s5106_s7 = smov [#allocation8]   ;;  %s4985_s11 = scalar_lea.hbm %s5225_s3, 4096 }
  0x15   :  { %s53_s8 = sshll.u32 %s5106_s7, 4  ;;  %p4986_p8 = scmp.ne.s32.totalorder %s5225_s3, %s4985_s11  ;;  %s54_s8 = int_to_ptr.vmem [resolvable:$true] %s53_s8 }
  0x16   :  { %p4989_p9 = scmp.lt.u32.totalorder %s4985_s11, %s5225_s3 }
  0x18   :  { %p4991_p10 = pnand %p4989_p9, %p4986_p8 }
  0x1a   :  { %4994 = shalt.err (!%p4991_p10)
}
  0x1b   :  { %s4995_s16 = scalar_lea.vmem %s54_s8, 4096  ;;  %p5000_p12 = scmp.lt.s32.totalorder %s54_s8, %s54_s8 }
  0x1c   :  { %p4996_p11 = scmp.ne.s32.totalorder %s54_s8, %s4995_s16  ;;  %p5001_p13 = scmp.lt.s32.totalorder %s4995_s16, %s4995_s16 }
  0x1e   :  { %p5002_p0 = por %p5001_p13, %p5000_p12 }
  0x20   :  { %p5003_p1 = pnand %p5002_p0, %p4996_p11 }
  0x22   :  { %5006 = shalt.err (!%p5003_p1)
}
  0x23   :  { %s5107_s1 = smov 64   ;;  %s5108_s17 = smov 4  }
  0x24   :  { %59 = dma.hbm_to_vmem [thread:$0]  %s5225_s3, 4096, %s54_s8, [#allocation9], %s5107_s1, %s5107_s1, %s5108_s17  }
  0x25   :  { %s5109_s20 = smov [#allocation2]   ;;  %s5007_s24 = scalar_lea.hbm %s5222_s0, 1664 }
  0x26   :  { %s19_s21 = sshll.u32 %s5109_s20, 4  ;;  %p5008_p2 = scmp.ne.s32.totalorder %s5222_s0, %s5007_s24  ;;  %s20_s21 = int_to_ptr.vmem [resolvable:$true] %s19_s21 }
  0x27   :  { %p5011_p3 = scmp.lt.u32.totalorder %s5007_s24, %s5222_s0 }
  0x29   :  { %p5013_p4 = pnand %p5011_p3, %p5008_p2 }
  0x2b   :  { %5016 = shalt.err (!%p5013_p4)
}
  0x2c   :  { %s5017_s29 = scalar_lea.vmem %s20_s21, 1664  ;;  %p5022_p6 = scmp.lt.s32.totalorder %s20_s21, %s20_s21 }
  0x2d   :  { %p5018_p5 = scmp.ne.s32.totalorder %s20_s21, %s5017_s29  ;;  %p5023_p7 = scmp.lt.s32.totalorder %s5017_s29, %s5017_s29 }
  0x2f   :  { %p5024_p8 = por %p5023_p7, %p5022_p6 }
  0x31   :  { %p5025_p9 = pnand %p5024_p8, %p5018_p5 }
  0x33   :  { %5028 = shalt.err (!%p5025_p9)
}
  0x34   :  { %s5110_s3 = smov 832   ;;  %s5111_s30 = smov 52  }
  0x35   :  { %25 = dma.hbm_to_vmem [thread:$0]  %s5222_s0, 1664, %s20_s21, [#allocation3], %s5110_s3, %s5110_s3, %s5111_s30  }
  0x36   :  { %s5112_s8 = smov [#allocation7]   ;;  %s5113_s10 = smov [#allocation10]  }
  0x37   :  { %s44_s9 = sshll.u32 %s5112_s8, 4  ;;  %s66_s11 = sshll.u32 %s5113_s10, 4  ;;  %s45_s9 = int_to_ptr.vmem [resolvable:$true] %s44_s9  ;;  %s67_s11 = int_to_ptr.vmem [resolvable:$true] %s66_s11 }
  0x38   :  { %s5029_s14 = scalar_lea.hbm %s5224_s2, 64 }
  0x39   :  { %p5030_p10 = scmp.ne.s32.totalorder %s5224_s2, %s5029_s14  ;;  %p5033_p11 = scmp.lt.u32.totalorder %s5029_s14, %s5224_s2 }
  0x3b   :  { %p5035_p12 = pnand %p5033_p11, %p5030_p10 }
  0x3d   :  { %5038 = shalt.err (!%p5035_p12)
}
  0x3e   :  { %s5039_s0 = scalar_lea.vmem %s45_s9, 64  ;;  %p5044_p0 = scmp.lt.s32.totalorder %s45_s9, %s45_s9 }
  0x3f   :  { %p5040_p13 = scmp.ne.s32.totalorder %s45_s9, %s5039_s0  ;;  %p5045_p1 = scmp.lt.s32.totalorder %s5039_s0, %s5039_s0 }
  0x41   :  { %p5046_p2 = por %p5045_p1, %p5044_p0 }
  0x43   :  { %p5047_p3 = pnand %p5046_p2, %p5040_p13 }
  0x45   :  { %5050 = shalt.err (!%p5047_p3)
}
  0x46   :  { %47 = dma.hbm_to_vmem [thread:$0]  %s5224_s2, 64, %s45_s9, [#allocation6]  }
  0x47   :  { %s5051_s22 = scalar_lea.hbm %s5226_s4, 16 }
  0x48   :  { %p5052_p4 = scmp.ne.s32.totalorder %s5226_s4, %s5051_s22  ;;  %p5055_p5 = scmp.lt.u32.totalorder %s5051_s22, %s5226_s4 }
  0x4a   :  { %p5057_p6 = pnand %p5055_p5, %p5052_p4 }
  0x4c   :  { %5060 = shalt.err (!%p5057_p6)
}
  0x4d   :  { %s5061_s27 = scalar_lea.vmem %s67_s11, 16  ;;  %s5065_s28 = scalar_lea.vmem %s67_s11, 32 }
  0x4e   :  { %p5062_p7 = scmp.ne.s32.totalorder %s67_s11, %s5061_s27  ;;  %p5066_p8 = scmp.lt.s32.totalorder %s67_s11, %s67_s11 }
  0x4f   :  { %p5067_p9 = scmp.lt.s32.totalorder %s5065_s28, %s5061_s27 }
  0x51   :  { %p5068_p10 = por %p5067_p9, %p5066_p8 }
  0x53   :  { %p5069_p11 = pnand %p5068_p10, %p5062_p7 }
  0x55   :  { %5072 = shalt.err (!%p5069_p11)
}
  0x56   :  { %69 = dma.hbm_to_vmem [thread:$0]  %s5226_s4, 16, %s67_s11, [#allocation9]  }
  0x57   :  { %5095 = dma.done.wait [#allocation3], 1664  }
  0x58   :  { %5096 = vsyncadd [#allocation3], 4294965632 }
  0x59   :  { %5097 = dma.done.wait [#allocation6], 53312  }
  0x5a   :  { %5098 = vsyncadd [#allocation6], 4294913984 }
  0x5b   :  { %5099 = dma.done.wait [#allocation9], 4112  }
  0x5c   :  { %5100 = vsyncadd [#allocation9], 4294963184  ;;  %v4280_v0 = vld [vmem:[#allocation5 + $0x4] ss:$16 sps:$4 sm:$0xff]   ;;  %v4282_v1 = vld [vmem:[#allocation5 + $0xc] ss:$16 sps:$4 sm:$0xff]  }
  0x5d   :  { %2684 = vmatprep.subr.bf16.mxu0 %v4280_v0  ;;  %v4284_v2 = vld [vmem:[#allocation5] ss:$16 sps:$4 sm:$0xff]   ;;  %v4285_v3 = vld [vmem:[#allocation5 + $0x8] ss:$16 sps:$4 sm:$0xff]   ;;  %2985 = vmatprep.subr.bf16.mxu1 %v4282_v1  ;;  %v4286_v4 = vld [vmem:[#allocation5 + $0x24] ss:$16 sps:$4 sm:$0xff]  }
  0x5e   :  { %2685 = vmatpush1.bf16.msra.mxu0 %v4284_v2  ;;  %2986 = vmatpush1.bf16.msra.mxu1 %v4285_v3  ;;  %v4288_v5 = vld [vmem:[#allocation5 + $0x2c] ss:$16 sps:$4 sm:$0xff]   ;;  %v4290_v6 = vld [vmem:[#allocation5 + $0x20] ss:$16 sps:$4 sm:$0xff]   ;;  %v4291_v7 = vld [vmem:[#allocation5 + $0x28] ss:$16 sps:$4 sm:$0xff]  }
  0x5f   :  { %2686 = vmatprep.subr.bf16.mxu0 %v4286_v4  ;;  %2987 = vmatprep.subr.bf16.mxu1 %v4288_v5  ;;  %v4292_v8 = vld [vmem:[#allocation5 + $0x44] ss:$16 sps:$4 sm:$0xff]   ;;  %v4294_v9 = vld [vmem:[#allocation5 + $0x4c] ss:$16 sps:$4 sm:$0xff]   ;;  %v4296_v10 = vld [vmem:[#allocation5 + $0x40] ss:$16 sps:$4 sm:$0xff]  }
  0x60   :  { %v4297_v11 = vld [vmem:[#allocation5 + $0x48] ss:$16 sps:$4 sm:$0xff]   ;;  %v4298_v12 = vld [vmem:[#allocation5 + $0x64] ss:$16 sps:$4 sm:$0xff]   ;;  %v4300_v13 = vld [vmem:[#allocation5 + $0x6c] ss:$16 sps:$4 sm:$0xff]  }
  0x61   :  { %v4302_v14 = vld [vmem:[#allocation5 + $0x60] ss:$16 sps:$4 sm:$0xff]   ;;  %v4303_v15 = vld [vmem:[#allocation5 + $0x68] ss:$16 sps:$4 sm:$0xff]   ;;  %v4304_v16 = vld [vmem:[#allocation5 + $0x84] ss:$16 sps:$4 sm:$0xff]  }
  0x62   :  { %2687 = vmatpush1.bf16.msra.mxu0 %v4290_v6  ;;  %2988 = vmatpush1.bf16.msra.mxu1 %v4291_v7  ;;  %v4306_v17 = vld [vmem:[#allocation5 + $0x8c] ss:$16 sps:$4 sm:$0xff]   ;;  %v4308_v18 = vld [vmem:[#allocation5 + $0x80] ss:$16 sps:$4 sm:$0xff]   ;;  %v4309_v19 = vld [vmem:[#allocation5 + $0x88] ss:$16 sps:$4 sm:$0xff]  }
  0x63   :  { %2688 = vmatprep.subr.bf16.mxu0 %v4292_v8  ;;  %2989 = vmatprep.subr.bf16.mxu1 %v4294_v9  ;;  %v4310_v20 = vld [vmem:[#allocation5 + $0xa4] ss:$16 sps:$4 sm:$0xff]   ;;  %v4312_v21 = vld [vmem:[#allocation5 + $0xac] ss:$16 sps:$4 sm:$0xff]   ;;  %v4314_v22 = vld [vmem:[#allocation5 + $0xa0] ss:$16 sps:$4 sm:$0xff]  }
  0x64   :  { %v4315_v23 = vld [vmem:[#allocation5 + $0xa8] ss:$16 sps:$4 sm:$0xff]   ;;  %v4316_v24 = vld [vmem:[#allocation5 + $0xc4] ss:$16 sps:$4 sm:$0xff]   ;;  %v4318_v25 = vld [vmem:[#allocation5 + $0xcc] ss:$16 sps:$4 sm:$0xff]  }
  0x65   :  { %v4320_v26 = vld [vmem:[#allocation5 + $0xc0] ss:$16 sps:$4 sm:$0xff]   ;;  %v4321_v27 = vld [vmem:[#allocation5 + $0xc8] ss:$16 sps:$4 sm:$0xff]   ;;  %v4322_v28 = vld [vmem:[#allocation5 + $0xe4] ss:$16 sps:$4 sm:$0xff]  }
  0x66   :  { %2689 = vmatpush1.bf16.msra.mxu0 %v4296_v10  ;;  %2990 = vmatpush1.bf16.msra.mxu1 %v4297_v11  ;;  %v4324_v29 = vld [vmem:[#allocation5 + $0xec] ss:$16 sps:$4 sm:$0xff]   ;;  %v4326_v30 = vld [vmem:[#allocation5 + $0xe0] ss:$16 sps:$4 sm:$0xff]   ;;  %v4327_v31 = vld [vmem:[#allocation5 + $0xe8] ss:$16 sps:$4 sm:$0xff]  }
  0x67   :  { %2690 = vmatprep.subr.bf16.mxu0 %v4298_v12  ;;  %2991 = vmatprep.subr.bf16.mxu1 %v4300_v13  ;;  %v4328_v32 = vld [vmem:[#allocation5 + $0x104] ss:$16 sps:$4 sm:$0xff]   ;;  %v4330_v33 = vld [vmem:[#allocation5 + $0x10c] ss:$16 sps:$4 sm:$0xff]   ;;  %v4332_v34 = vld [vmem:[#allocation5 + $0x100] ss:$16 sps:$4 sm:$0xff]  }
  0x68   :  { %v4333_v35 = vld [vmem:[#allocation5 + $0x108] ss:$16 sps:$4 sm:$0xff]   ;;  %v4334_v36 = vld [vmem:[#allocation5 + $0x124] ss:$16 sps:$4 sm:$0xff]   ;;  %v4336_v37 = vld [vmem:[#allocation5 + $0x12c] ss:$16 sps:$4 sm:$0xff]  }
  0x69   :  { %v4338_v38 = vld [vmem:[#allocation5 + $0x120] ss:$16 sps:$4 sm:$0xff]   ;;  %v4339_v39 = vld [vmem:[#allocation5 + $0x128] ss:$16 sps:$4 sm:$0xff]   ;;  %v4340_v40 = vld [vmem:[#allocation5 + $0x144] ss:$16 sps:$4 sm:$0xff]  }
  0x6a   :  { %2691 = vmatpush1.bf16.msra.mxu0 %v4302_v14  ;;  %2992 = vmatpush1.bf16.msra.mxu1 %v4303_v15  ;;  %v4342_v41 = vld [vmem:[#allocation5 + $0x14c] ss:$16 sps:$4 sm:$0xff]   ;;  %v4344_v42 = vld [vmem:[#allocation5 + $0x140] ss:$16 sps:$4 sm:$0xff]   ;;  %v4345_v43 = vld [vmem:[#allocation5 + $0x148] ss:$16 sps:$4 sm:$0xff]  }
  0x6b   :  { %2692 = vmatprep.subr.bf16.mxu0 %v4304_v16  ;;  %2993 = vmatprep.subr.bf16.mxu1 %v4306_v17  ;;  %v4346_v44 = vld [vmem:[#allocation5 + $0x164] ss:$16 sps:$4 sm:$0xff]   ;;  %v4348_v45 = vld [vmem:[#allocation5 + $0x16c] ss:$16 sps:$4 sm:$0xff]   ;;  %v4350_v46 = vld [vmem:[#allocation5 + $0x160] ss:$16 sps:$4 sm:$0xff]  }
  0x6c   :  { %v4351_v47 = vld [vmem:[#allocation5 + $0x168] ss:$16 sps:$4 sm:$0xff]   ;;  %v4378_v48 = vld [vmem:[#allocation2 + $0x4] ss:$52 sps:$4 sm:$0xff]   ;;  %v4352_v49 = vld [vmem:[#allocation5 + $0x184] ss:$16 sps:$4 sm:$0xff]  }
  0x6d   :  { %v4354_v50 = vld [vmem:[#allocation5 + $0x18c] ss:$16 sps:$4 sm:$0xff]   ;;  %2716 = vmatprep.mubr.bf16.mxu0 %v4378_v48  ;;  %3017 = vmatprep.mubr.bf16.mxu1 %v4378_v48  ;;  %v4356_v51 = vld [vmem:[#allocation5 + $0x180] ss:$16 sps:$4 sm:$0xff]   ;;  %v4357_v52 = vld [vmem:[#allocation5 + $0x188] ss:$16 sps:$4 sm:$0xff]  }
  0x6e   :  { %2693 = vmatpush1.bf16.msra.mxu0 %v4308_v18  ;;  %2994 = vmatpush1.bf16.msra.mxu1 %v4309_v19  ;;  %v4358_v53 = vld [vmem:[#allocation5 + $0x1a4] ss:$16 sps:$4 sm:$0xff]   ;;  %v4360_v54 = vld [vmem:[#allocation5 + $0x1ac] ss:$16 sps:$4 sm:$0xff]   ;;  %v4362_v55 = vld [vmem:[#allocation5 + $0x1a0] ss:$16 sps:$4 sm:$0xff]  }
  0x6f   :  { %2694 = vmatprep.subr.bf16.mxu0 %v4310_v20  ;;  %2995 = vmatprep.subr.bf16.mxu1 %v4312_v21  ;;  %v4363_v56 = vld [vmem:[#allocation5 + $0x1a8] ss:$16 sps:$4 sm:$0xff]   ;;  %v4364_v57 = vld [vmem:[#allocation5 + $0x1c4] ss:$16 sps:$4 sm:$0xff]   ;;  %v4366_v58 = vld [vmem:[#allocation5 + $0x1cc] ss:$16 sps:$4 sm:$0xff]  }
  0x70   :  { %v4368_v59 = vld [vmem:[#allocation5 + $0x1c0] ss:$16 sps:$4 sm:$0xff]   ;;  %v4369_v60 = vld [vmem:[#allocation5 + $0x1c8] ss:$16 sps:$4 sm:$0xff]   ;;  %v4370_v61 = vld [vmem:[#allocation5 + $0x1e4] ss:$16 sps:$4 sm:$0xff]  }
  0x71   :  { %v4372_v62 = vld [vmem:[#allocation5 + $0x1ec] ss:$16 sps:$4 sm:$0xff]   ;;  %v4374_v63 = vld [vmem:[#allocation5 + $0x1e0] ss:$16 sps:$4 sm:$0xff]   ;;  %v4375_v0 = vld [vmem:[#allocation5 + $0x1e8] ss:$16 sps:$4 sm:$0xff]  }
  0x72   :  { %2695 = vmatpush1.bf16.msra.mxu0 %v4314_v22  ;;  %2996 = vmatpush1.bf16.msra.mxu1 %v4315_v23  ;;  %v4381_v1 = vld [vmem:[#allocation5 + $0x204] ss:$16 sps:$4 sm:$0xff]   ;;  %v4384_v2 = vld [vmem:[#allocation5 + $0x20c] ss:$16 sps:$4 sm:$0xff]   ;;  %v4379_v4 = vld [vmem:[#allocation5 + $0x200] ss:$16 sps:$4 sm:$0xff]  }
  0x73   :  { %2696 = vmatprep.subr.bf16.mxu0 %v4316_v24  ;;  %2997 = vmatprep.subr.bf16.mxu1 %v4318_v25  ;;  %v4376_v3 = vld [vmem:[#allocation2] ss:$52 sps:$4 sm:$0xff]   ;;  %v4387_v6 = vld [vmem:[#allocation5 + $0x224] ss:$16 sps:$4 sm:$0xff]   ;;  %v4385_v8 = vld [vmem:[#allocation5 + $0x220] ss:$16 sps:$4 sm:$0xff]  }
  0x74   :  { %v4382_v5 = vld [vmem:[#allocation5 + $0x208] ss:$16 sps:$4 sm:$0xff]   ;;  %v4390_v7 = vld [vmem:[#allocation5 + $0x22c] ss:$16 sps:$4 sm:$0xff]   ;;  %v4393_v10 = vld [vmem:[#allocation5 + $0x244] ss:$16 sps:$4 sm:$0xff]  }
  0x75   :  { %v4388_v9 = vld [vmem:[#allocation5 + $0x228] ss:$16 sps:$4 sm:$0xff]   ;;  %v4396_v11 = vld [vmem:[#allocation5 + $0x24c] ss:$16 sps:$4 sm:$0xff]   ;;  %v4391_v12 = vld [vmem:[#allocation5 + $0x240] ss:$16 sps:$4 sm:$0xff]  }
  0x76   :  { %2697 = vmatpush1.bf16.msra.mxu0 %v4320_v26  ;;  %2998 = vmatpush1.bf16.msra.mxu1 %v4321_v27  ;;  %v4394_v13 = vld [vmem:[#allocation5 + $0x248] ss:$16 sps:$4 sm:$0xff]   ;;  %v4399_v14 = vld [vmem:[#allocation5 + $0x264] ss:$16 sps:$4 sm:$0xff]   ;;  %v4402_v15 = vld [vmem:[#allocation5 + $0x26c] ss:$16 sps:$4 sm:$0xff]  }
  0x77   :  { %2698 = vmatprep.subr.bf16.mxu0 %v4322_v28  ;;  %2999 = vmatprep.subr.bf16.mxu1 %v4324_v29  ;;  %v4397_v16 = vld [vmem:[#allocation5 + $0x260] ss:$16 sps:$4 sm:$0xff]   ;;  %v4400_v17 = vld [vmem:[#allocation5 + $0x268] ss:$16 sps:$4 sm:$0xff]   ;;  %v4405_v18 = vld [vmem:[#allocation5 + $0x284] ss:$16 sps:$4 sm:$0xff]  }
  0x78   :  { %v4408_v19 = vld [vmem:[#allocation5 + $0x28c] ss:$16 sps:$4 sm:$0xff]   ;;  %v4403_v20 = vld [vmem:[#allocation5 + $0x280] ss:$16 sps:$4 sm:$0xff]   ;;  %v4406_v21 = vld [vmem:[#allocation5 + $0x288] ss:$16 sps:$4 sm:$0xff]  }
  0x79   :  { %v4411_v22 = vld [vmem:[#allocation5 + $0x2a4] ss:$16 sps:$4 sm:$0xff]   ;;  %v4414_v23 = vld [vmem:[#allocation5 + $0x2ac] ss:$16 sps:$4 sm:$0xff]   ;;  %v4409_v24 = vld [vmem:[#allocation5 + $0x2a0] ss:$16 sps:$4 sm:$0xff]  }
  0x7a   :  { %2699 = vmatpush1.bf16.msra.mxu0 %v4326_v30  ;;  %3000 = vmatpush1.bf16.msra.mxu1 %v4327_v31  ;;  %v4412_v25 = vld [vmem:[#allocation5 + $0x2a8] ss:$16 sps:$4 sm:$0xff]   ;;  %v4417_v26 = vld [vmem:[#allocation5 + $0x2c4] ss:$16 sps:$4 sm:$0xff]   ;;  %v4420_v27 = vld [vmem:[#allocation5 + $0x2cc] ss:$16 sps:$4 sm:$0xff]  }
  0x7b   :  { %2700 = vmatprep.subr.bf16.mxu0 %v4328_v32  ;;  %3001 = vmatprep.subr.bf16.mxu1 %v4330_v33  ;;  %v4415_v28 = vld [vmem:[#allocation5 + $0x2c0] ss:$16 sps:$4 sm:$0xff]   ;;  %v4418_v29 = vld [vmem:[#allocation5 + $0x2c8] ss:$16 sps:$4 sm:$0xff]   ;;  %v4423_v31 = vld [vmem:[#allocation5 + $0x2e4] ss:$16 sps:$4 sm:$0xff]  }
  0x7c   :  { %v4477_v30 = vld [vmem:[#allocation2 + $0xc] ss:$52 sps:$4 sm:$0xff]   ;;  %v4426_v32 = vld [vmem:[#allocation5 + $0x2ec] ss:$16 sps:$4 sm:$0xff]   ;;  %v4421_v33 = vld [vmem:[#allocation5 + $0x2e0] ss:$16 sps:$4 sm:$0xff]  }
  0x7d   :  { %v4450_v48 = vld [vmem:[#allocation5 + $0x36c] ss:$16 sps:$4 sm:$0xff]   ;;  %s5115_s4 = smov [#allocation11]  }
  0x7e   :  { %2701 = vmatpush1.bf16.msra.mxu0 %v4332_v34  ;;  %3002 = vmatpush1.bf16.msra.mxu1 %v4333_v35  ;;  %v4424_v34 = vld [vmem:[#allocation5 + $0x2e8] ss:$16 sps:$4 sm:$0xff]   ;;  %v4429_v35 = vld [vmem:[#allocation5 + $0x304] ss:$16 sps:$4 sm:$0xff]   ;;  %s3689_s3 = sshll.u32 %s5115_s4, 4  ;;  %s3690_s3 = int_to_ptr.vmem [resolvable:$true] %s3689_s3 }
  0x7f   :  { %2702 = vmatprep.subr.bf16.mxu0 %v4334_v36  ;;  %3003 = vmatprep.subr.bf16.mxu1 %v4336_v37  ;;  %v4432_v36 = vld [vmem:[#allocation5 + $0x30c] ss:$16 sps:$4 sm:$0xff]   ;;  %v4427_v37 = vld [vmem:[#allocation5 + $0x300] ss:$16 sps:$4 sm:$0xff]   ;;  %s5073_s30 = scalar_lea.vmem %s3690_s3, 256  ;;  %p5078_p13 = scmp.lt.s32.totalorder %s3690_s3, %s3690_s3 }
  0x80   :  { %p5074_p12 = scmp.ne.s32.totalorder %s3690_s3, %s5073_s30  ;;  %p5079_p0 = scmp.lt.s32.totalorder %s5073_s30, %s5073_s30 }
  0x82   :  { %2703 = vmatpush1.bf16.msra.mxu0 %v4338_v38  ;;  %3004 = vmatpush1.bf16.msra.mxu1 %v4339_v39  ;;  %v4430_v38 = vld [vmem:[#allocation5 + $0x308] ss:$16 sps:$4 sm:$0xff]   ;;  %v4435_v39 = vld [vmem:[#allocation5 + $0x324] ss:$16 sps:$4 sm:$0xff]   ;;  %p5080_p1 = por %p5079_p0, %p5078_p13 }
  0x83   :  { %2704 = vmatprep.subr.bf16.mxu0 %v4340_v40  ;;  %3005 = vmatprep.subr.bf16.mxu1 %v4342_v41  ;;  %v4438_v40 = vld [vmem:[#allocation5 + $0x32c] ss:$16 sps:$4 sm:$0xff]   ;;  %v4433_v41 = vld [vmem:[#allocation5 + $0x320] ss:$16 sps:$4 sm:$0xff]  }
  0x84   :  { %p5081_p2 = pnand %p5080_p1, %p5074_p12 }
  0x86   :  { %2705 = vmatpush1.bf16.msra.mxu0 %v4344_v42  ;;  %3006 = vmatpush1.bf16.msra.mxu1 %v4345_v43  ;;  %v4436_v42 = vld [vmem:[#allocation5 + $0x328] ss:$16 sps:$4 sm:$0xff]   ;;  %v4441_v43 = vld [vmem:[#allocation5 + $0x344] ss:$16 sps:$4 sm:$0xff]  }
  0x87   :  { %2706 = vmatprep.subr.bf16.mxu0 %v4346_v44  ;;  %3007 = vmatprep.subr.bf16.mxu1 %v4348_v45  ;;  %v4444_v44 = vld [vmem:[#allocation5 + $0x34c] ss:$16 sps:$4 sm:$0xff]   ;;  %v4439_v45 = vld [vmem:[#allocation5 + $0x340] ss:$16 sps:$4 sm:$0xff]  }
  0x8a   :  { %2707 = vmatpush1.bf16.msra.mxu0 %v4350_v46  ;;  %3008 = vmatpush1.bf16.msra.mxu1 %v4351_v47  ;;  %v4442_v46 = vld [vmem:[#allocation5 + $0x348] ss:$16 sps:$4 sm:$0xff]   ;;  %v4447_v47 = vld [vmem:[#allocation5 + $0x364] ss:$16 sps:$4 sm:$0xff]  }
  0x8b   :  { %2708 = vmatprep.subr.bf16.mxu0 %v4352_v49  ;;  %3009 = vmatprep.subr.bf16.mxu1 %v4354_v50  ;;  %v4445_v49 = vld [vmem:[#allocation5 + $0x360] ss:$16 sps:$4 sm:$0xff]   ;;  %v4448_v50 = vld [vmem:[#allocation5 + $0x368] ss:$16 sps:$4 sm:$0xff]  }
  0x8e   :  { %2709 = vmatpush1.bf16.msra.mxu0 %v4356_v51  ;;  %3010 = vmatpush1.bf16.msra.mxu1 %v4357_v52  ;;  %v4453_v51 = vld [vmem:[#allocation5 + $0x384] ss:$16 sps:$4 sm:$0xff]   ;;  %v4456_v52 = vld [vmem:[#allocation5 + $0x38c] ss:$16 sps:$4 sm:$0xff]  }
  0x8f   :  { %2710 = vmatprep.subr.bf16.mxu0 %v4358_v53  ;;  %3011 = vmatprep.subr.bf16.mxu1 %v4360_v54  ;;  %v4451_v53 = vld [vmem:[#allocation5 + $0x380] ss:$16 sps:$4 sm:$0xff]   ;;  %v4454_v54 = vld [vmem:[#allocation5 + $0x388] ss:$16 sps:$4 sm:$0xff]  }
  0x92   :  { %2711 = vmatpush1.bf16.msra.mxu0 %v4362_v55  ;;  %3012 = vmatpush1.bf16.msra.mxu1 %v4363_v56  ;;  %v4459_v55 = vld [vmem:[#allocation5 + $0x3a4] ss:$16 sps:$4 sm:$0xff]   ;;  %v4462_v56 = vld [vmem:[#allocation5 + $0x3ac] ss:$16 sps:$4 sm:$0xff]  }
  0x93   :  { %2712 = vmatprep.subr.bf16.mxu0 %v4364_v57  ;;  %3013 = vmatprep.subr.bf16.mxu1 %v4366_v58  ;;  %v4457_v57 = vld [vmem:[#allocation5 + $0x3a0] ss:$16 sps:$4 sm:$0xff]   ;;  %v4460_v58 = vld [vmem:[#allocation5 + $0x3a8] ss:$16 sps:$4 sm:$0xff]  }
  0x96   :  { %2713 = vmatpush1.bf16.msra.mxu0 %v4368_v59  ;;  %3014 = vmatpush1.bf16.msra.mxu1 %v4369_v60  ;;  %v4465_v59 = vld [vmem:[#allocation5 + $0x3c4] ss:$16 sps:$4 sm:$0xff]   ;;  %v4468_v60 = vld [vmem:[#allocation5 + $0x3cc] ss:$16 sps:$4 sm:$0xff]  }
  0x97   :  { %2714 = vmatprep.subr.bf16.mxu0 %v4370_v61  ;;  %3015 = vmatprep.subr.bf16.mxu1 %v4372_v62  ;;  %v4463_v61 = vld [vmem:[#allocation5 + $0x3c0] ss:$16 sps:$4 sm:$0xff]   ;;  %v4466_v62 = vld [vmem:[#allocation5 + $0x3c8] ss:$16 sps:$4 sm:$0xff]  }
  0x9a   :  { %2715 = vmatpush1.bf16.msra.mxu0 %v4374_v63  ;;  %3016 = vmatpush1.bf16.msra.mxu1 %v4375_v0  ;;  %v4471_v63 = vld [vmem:[#allocation5 + $0x3e4] ss:$16 sps:$4 sm:$0xff]   ;;  %v4474_v0 = vld [vmem:[#allocation5 + $0x3ec] ss:$16 sps:$4 sm:$0xff]  }
  0x9b   :  { %2727 = vmatprep.subr.bf16.mxu0 %v4381_v1  ;;  %3028 = vmatprep.subr.bf16.mxu1 %v4384_v2  ;;  %v4469_v1 = vld [vmem:[#allocation5 + $0x3e0] ss:$16 sps:$4 sm:$0xff]   ;;  %v4472_v2 = vld [vmem:[#allocation5 + $0x3e8] ss:$16 sps:$4 sm:$0xff]  }
  0x9d   :  { %2717 = vmatmul.mubr.bf16.vlgmr.msra.gmra.mrb[0].mxu0 %v4376_v3  ;;  %3018 = vmatmul.mubr.bf16.vlgmr.msra.gmra.mrb[0].mxu1 %v4376_v3  ;;  %v4480_v3 = vld [vmem:[#allocation5 + $0x404] ss:$16 sps:$4 sm:$0xff]  }
  0x9e   :  { %2728 = vmatpush1.bf16.msra.mxu0 %v4379_v4  ;;  %3029 = vmatpush1.bf16.msra.mxu1 %v4382_v5  ;;  %v4483_v4 = vld [vmem:[#allocation5 + $0x40c] ss:$16 sps:$4 sm:$0xff]   ;;  %v4475_v5 = vld [vmem:[#allocation2 + $0x8] ss:$52 sps:$4 sm:$0xff]  }
  0x9f   :  { %2729 = vmatprep.subr.bf16.mxu0 %v4387_v6  ;;  %3030 = vmatprep.subr.bf16.mxu1 %v4390_v7  ;;  %v4478_v6 = vld [vmem:[#allocation5 + $0x400] ss:$16 sps:$4 sm:$0xff]   ;;  %v4481_v7 = vld [vmem:[#allocation5 + $0x408] ss:$16 sps:$4 sm:$0xff]  }
  0xa0   :  { %2759 = vmatprep.mubr.bf16.mxu0 %v4477_v30  ;;  %3060 = vmatprep.mubr.bf16.mxu1 %v4477_v30  ;;  %v4519_v30 = vld [vmem:[#allocation5 + $0x4cc] ss:$16 sps:$4 sm:$0xff]  }
  0xa2   :  { %2730 = vmatpush1.bf16.msra.mxu0 %v4385_v8  ;;  %3031 = vmatpush1.bf16.msra.mxu1 %v4388_v9  ;;  %v4486_v8 = vld [vmem:[#allocation5 + $0x424] ss:$16 sps:$4 sm:$0xff]   ;;  %v4489_v9 = vld [vmem:[#allocation5 + $0x42c] ss:$16 sps:$4 sm:$0xff]  }
  0xa3   :  { %2731 = vmatprep.subr.bf16.mxu0 %v4393_v10  ;;  %3032 = vmatprep.subr.bf16.mxu1 %v4396_v11  ;;  %v4484_v10 = vld [vmem:[#allocation5 + $0x420] ss:$16 sps:$4 sm:$0xff]   ;;  %v4487_v11 = vld [vmem:[#allocation5 + $0x428] ss:$16 sps:$4 sm:$0xff]  }
  0xa6   :  { %2732 = vmatpush1.bf16.msra.mxu0 %v4391_v12  ;;  %3033 = vmatpush1.bf16.msra.mxu1 %v4394_v13  ;;  %v4576_v12 = vld [vmem:[#allocation2 + $0x14] ss:$52 sps:$4 sm:$0xff]   ;;  %v4492_v13 = vld [vmem:[#allocation5 + $0x444] ss:$16 sps:$4 sm:$0xff]  }
  0xa7   :  { %2733 = vmatprep.subr.bf16.mxu0 %v4399_v14  ;;  %3034 = vmatprep.subr.bf16.mxu1 %v4402_v15  ;;  %v4495_v14 = vld [vmem:[#allocation5 + $0x44c] ss:$16 sps:$4 sm:$0xff]   ;;  %v4490_v15 = vld [vmem:[#allocation5 + $0x440] ss:$16 sps:$4 sm:$0xff]  }
  0xaa   :  { %2734 = vmatpush1.bf16.msra.mxu0 %v4397_v16  ;;  %3035 = vmatpush1.bf16.msra.mxu1 %v4400_v17  ;;  %v4493_v16 = vld [vmem:[#allocation5 + $0x448] ss:$16 sps:$4 sm:$0xff]   ;;  %v4498_v17 = vld [vmem:[#allocation5 + $0x464] ss:$16 sps:$4 sm:$0xff]  }
  0xab   :  { %2735 = vmatprep.subr.bf16.mxu0 %v4405_v18  ;;  %3036 = vmatprep.subr.bf16.mxu1 %v4408_v19  ;;  %v4501_v18 = vld [vmem:[#allocation5 + $0x46c] ss:$16 sps:$4 sm:$0xff]   ;;  %v4496_v19 = vld [vmem:[#allocation5 + $0x460] ss:$16 sps:$4 sm:$0xff]  }
  0xae   :  { %2736 = vmatpush1.bf16.msra.mxu0 %v4403_v20  ;;  %3037 = vmatpush1.bf16.msra.mxu1 %v4406_v21  ;;  %v4499_v20 = vld [vmem:[#allocation5 + $0x468] ss:$16 sps:$4 sm:$0xff]   ;;  %v4504_v21 = vld [vmem:[#allocation5 + $0x484] ss:$16 sps:$4 sm:$0xff]  }
  0xaf   :  { %2737 = vmatprep.subr.bf16.mxu0 %v4411_v22  ;;  %3038 = vmatprep.subr.bf16.mxu1 %v4414_v23  ;;  %v4507_v22 = vld [vmem:[#allocation5 + $0x48c] ss:$16 sps:$4 sm:$0xff]   ;;  %v4502_v23 = vld [vmem:[#allocation5 + $0x480] ss:$16 sps:$4 sm:$0xff]  }
  0xb2   :  { %2738 = vmatpush1.bf16.msra.mxu0 %v4409_v24  ;;  %3039 = vmatpush1.bf16.msra.mxu1 %v4412_v25  ;;  %v4505_v24 = vld [vmem:[#allocation5 + $0x488] ss:$16 sps:$4 sm:$0xff]   ;;  %v4510_v25 = vld [vmem:[#allocation5 + $0x4a4] ss:$16 sps:$4 sm:$0xff]  }
  0xb3   :  { %2739 = vmatprep.subr.bf16.mxu0 %v4417_v26  ;;  %3040 = vmatprep.subr.bf16.mxu1 %v4420_v27  ;;  %v4513_v26 = vld [vmem:[#allocation5 + $0x4ac] ss:$16 sps:$4 sm:$0xff]   ;;  %v4508_v27 = vld [vmem:[#allocation5 + $0x4a0] ss:$16 sps:$4 sm:$0xff]  }
  0xb6   :  { %2740 = vmatpush1.bf16.msra.mxu0 %v4415_v28  ;;  %3041 = vmatpush1.bf16.msra.mxu1 %v4418_v29  ;;  %v4511_v28 = vld [vmem:[#allocation5 + $0x4a8] ss:$16 sps:$4 sm:$0xff]   ;;  %v4516_v29 = vld [vmem:[#allocation5 + $0x4c4] ss:$16 sps:$4 sm:$0xff]  }
  0xb7   :  { %2741 = vmatprep.subr.bf16.mxu0 %v4423_v31  ;;  %3042 = vmatprep.subr.bf16.mxu1 %v4426_v32  ;;  %v4514_v31 = vld [vmem:[#allocation5 + $0x4c0] ss:$16 sps:$4 sm:$0xff]   ;;  %v4517_v32 = vld [vmem:[#allocation5 + $0x4c8] ss:$16 sps:$4 sm:$0xff]  }
  0xba   :  { %2742 = vmatpush1.bf16.msra.mxu0 %v4421_v33  ;;  %3043 = vmatpush1.bf16.msra.mxu1 %v4424_v34  ;;  %v4522_v33 = vld [vmem:[#allocation5 + $0x4e4] ss:$16 sps:$4 sm:$0xff]   ;;  %v4525_v34 = vld [vmem:[#allocation5 + $0x4ec] ss:$16 sps:$4 sm:$0xff]  }
  0xbb   :  { %2743 = vmatprep.subr.bf16.mxu0 %v4429_v35  ;;  %3044 = vmatprep.subr.bf16.mxu1 %v4432_v36  ;;  %v4520_v35 = vld [vmem:[#allocation5 + $0x4e0] ss:$16 sps:$4 sm:$0xff]   ;;  %v4523_v36 = vld [vmem:[#allocation5 + $0x4e8] ss:$16 sps:$4 sm:$0xff]  }
  0xbe   :  { %2744 = vmatpush1.bf16.msra.mxu0 %v4427_v37  ;;  %3045 = vmatpush1.bf16.msra.mxu1 %v4430_v38  ;;  %v4528_v37 = vld [vmem:[#allocation5 + $0x504] ss:$16 sps:$4 sm:$0xff]   ;;  %v4531_v38 = vld [vmem:[#allocation5 + $0x50c] ss:$16 sps:$4 sm:$0xff]  }
  0xbf   :  { %2745 = vmatprep.subr.bf16.mxu0 %v4435_v39  ;;  %3046 = vmatprep.subr.bf16.mxu1 %v4438_v40  ;;  %v4526_v39 = vld [vmem:[#allocation5 + $0x500] ss:$16 sps:$4 sm:$0xff]   ;;  %v4529_v40 = vld [vmem:[#allocation5 + $0x508] ss:$16 sps:$4 sm:$0xff]  }
  0xc2   :  { %2746 = vmatpush1.bf16.msra.mxu0 %v4433_v41  ;;  %3047 = vmatpush1.bf16.msra.mxu1 %v4436_v42  ;;  %v4534_v41 = vld [vmem:[#allocation5 + $0x524] ss:$16 sps:$4 sm:$0xff]   ;;  %v4537_v42 = vld [vmem:[#allocation5 + $0x52c] ss:$16 sps:$4 sm:$0xff]  }
  0xc3   :  { %2747 = vmatprep.subr.bf16.mxu0 %v4441_v43  ;;  %3048 = vmatprep.subr.bf16.mxu1 %v4444_v44  ;;  %v4532_v43 = vld [vmem:[#allocation5 + $0x520] ss:$16 sps:$4 sm:$0xff]   ;;  %v4535_v44 = vld [vmem:[#allocation5 + $0x528] ss:$16 sps:$4 sm:$0xff]  }
  0xc6   :  { %2748 = vmatpush1.bf16.msra.mxu0 %v4439_v45  ;;  %3049 = vmatpush1.bf16.msra.mxu1 %v4442_v46  ;;  %v4540_v45 = vld [vmem:[#allocation5 + $0x544] ss:$16 sps:$4 sm:$0xff]   ;;  %v4543_v46 = vld [vmem:[#allocation5 + $0x54c] ss:$16 sps:$4 sm:$0xff]  }
  0xc7   :  { %2749 = vmatprep.subr.bf16.mxu0 %v4447_v47  ;;  %3050 = vmatprep.subr.bf16.mxu1 %v4450_v48  ;;  %v4538_v47 = vld [vmem:[#allocation5 + $0x540] ss:$16 sps:$4 sm:$0xff]   ;;  %v4541_v48 = vld [vmem:[#allocation5 + $0x548] ss:$16 sps:$4 sm:$0xff]  }
  0xca   :  { %2750 = vmatpush1.bf16.msra.mxu0 %v4445_v49  ;;  %3051 = vmatpush1.bf16.msra.mxu1 %v4448_v50  ;;  %v4546_v49 = vld [vmem:[#allocation5 + $0x564] ss:$16 sps:$4 sm:$0xff]   ;;  %v4549_v50 = vld [vmem:[#allocation5 + $0x56c] ss:$16 sps:$4 sm:$0xff]  }
  0xcb   :  { %2751 = vmatprep.subr.bf16.mxu0 %v4453_v51  ;;  %3052 = vmatprep.subr.bf16.mxu1 %v4456_v52  ;;  %v4544_v51 = vld [vmem:[#allocation5 + $0x560] ss:$16 sps:$4 sm:$0xff]   ;;  %v4547_v52 = vld [vmem:[#allocation5 + $0x568] ss:$16 sps:$4 sm:$0xff]  }
  0xce   :  { %2752 = vmatpush1.bf16.msra.mxu0 %v4451_v53  ;;  %3053 = vmatpush1.bf16.msra.mxu1 %v4454_v54  ;;  %v4552_v53 = vld [vmem:[#allocation5 + $0x584] ss:$16 sps:$4 sm:$0xff]   ;;  %v4555_v54 = vld [vmem:[#allocation5 + $0x58c] ss:$16 sps:$4 sm:$0xff]  }
  0xcf   :  { %2753 = vmatprep.subr.bf16.mxu0 %v4459_v55  ;;  %3054 = vmatprep.subr.bf16.mxu1 %v4462_v56  ;;  %v4550_v55 = vld [vmem:[#allocation5 + $0x580] ss:$16 sps:$4 sm:$0xff]   ;;  %v4553_v56 = vld [vmem:[#allocation5 + $0x588] ss:$16 sps:$4 sm:$0xff]  }
  0xd2   :  { %2754 = vmatpush1.bf16.msra.mxu0 %v4457_v57  ;;  %3055 = vmatpush1.bf16.msra.mxu1 %v4460_v58  ;;  %v4558_v57 = vld [vmem:[#allocation5 + $0x5a4] ss:$16 sps:$4 sm:$0xff]   ;;  %v4561_v58 = vld [vmem:[#allocation5 + $0x5ac] ss:$16 sps:$4 sm:$0xff]  }
  0xd3   :  { %2755 = vmatprep.subr.bf16.mxu0 %v4465_v59  ;;  %3056 = vmatprep.subr.bf16.mxu1 %v4468_v60  ;;  %v4556_v59 = vld [vmem:[#allocation5 + $0x5a0] ss:$16 sps:$4 sm:$0xff]   ;;  %v4559_v60 = vld [vmem:[#allocation5 + $0x5a8] ss:$16 sps:$4 sm:$0xff]  }
  0xd6   :  { %2756 = vmatpush1.bf16.msra.mxu0 %v4463_v61  ;;  %3057 = vmatpush1.bf16.msra.mxu1 %v4466_v62  ;;  %v4564_v61 = vld [vmem:[#allocation5 + $0x5c4] ss:$16 sps:$4 sm:$0xff]   ;;  %v4567_v62 = vld [vmem:[#allocation5 + $0x5cc] ss:$16 sps:$4 sm:$0xff]  }
  0xd7   :  { %2757 = vmatprep.subr.bf16.mxu0 %v4471_v63  ;;  %3058 = vmatprep.subr.bf16.mxu1 %v4474_v0  ;;  %v4562_v63 = vld [vmem:[#allocation5 + $0x5c0] ss:$16 sps:$4 sm:$0xff]   ;;  %v4565_v0 = vld [vmem:[#allocation5 + $0x5c8] ss:$16 sps:$4 sm:$0xff]  }
  0xda   :  { %2758 = vmatpush1.bf16.msra.mxu0 %v4469_v1  ;;  %3059 = vmatpush1.bf16.msra.mxu1 %v4472_v2  ;;  %v4570_v1 = vld [vmem:[#allocation5 + $0x5e4] ss:$16 sps:$4 sm:$0xff]   ;;  %v4573_v2 = vld [vmem:[#allocation5 + $0x5ec] ss:$16 sps:$4 sm:$0xff]  }
  0xdb   :  { %2770 = vmatprep.subr.bf16.mxu0 %v4480_v3  ;;  %3071 = vmatprep.subr.bf16.mxu1 %v4483_v4  ;;  %v4568_v3 = vld [vmem:[#allocation5 + $0x5e0] ss:$16 sps:$4 sm:$0xff]   ;;  %v4571_v4 = vld [vmem:[#allocation5 + $0x5e8] ss:$16 sps:$4 sm:$0xff]  }
  0xdd   :  { %2760 = vmatmul.mubr.bf16.vlgmr.msra.gmra.mrb[0].mxu0 %v4475_v5  ;;  %3061 = vmatmul.mubr.bf16.vlgmr.msra.gmra.mrb[0].mxu1 %v4475_v5  ;;  %v4579_v5 = vld [vmem:[#allocation5 + $0x604] ss:$16 sps:$4 sm:$0xff]  }
  0xde   :  { %2771 = vmatpush1.bf16.msra.mxu0 %v4478_v6  ;;  %3072 = vmatpush1.bf16.msra.mxu1 %v4481_v7  ;;  %v4582_v6 = vld [vmem:[#allocation5 + $0x60c] ss:$16 sps:$4 sm:$0xff]  }
  0xdf   :  { %2772 = vmatprep.subr.bf16.mxu0 %v4486_v8  ;;  %3073 = vmatprep.subr.bf16.mxu1 %v4489_v9  ;;  %v4574_v7 = vld [vmem:[#allocation2 + $0x10] ss:$52 sps:$4 sm:$0xff]   ;;  %v4577_v8 = vld [vmem:[#allocation5 + $0x600] ss:$16 sps:$4 sm:$0xff]  }
  0xe0   :  { %2802 = vmatprep.mubr.bf16.mxu0 %v4576_v12  ;;  %3103 = vmatprep.mubr.bf16.mxu1 %v4576_v12  ;;  %v4580_v9 = vld [vmem:[#allocation5 + $0x608] ss:$16 sps:$4 sm:$0xff]  }
  0xe1   :  { %v4675_v12 = vld [vmem:[#allocation2 + $0x1c] ss:$52 sps:$4 sm:$0xff]  }
  0xe2   :  { %2773 = vmatpush1.bf16.msra.mxu0 %v4484_v10  ;;  %3074 = vmatpush1.bf16.msra.mxu1 %v4487_v11  ;;  %v4585_v10 = vld [vmem:[#allocation5 + $0x624] ss:$16 sps:$4 sm:$0xff]   ;;  %v4588_v11 = vld [vmem:[#allocation5 + $0x62c] ss:$16 sps:$4 sm:$0xff]  }
  0xe3   :  { %2774 = vmatprep.subr.bf16.mxu0 %v4492_v13  ;;  %3075 = vmatprep.subr.bf16.mxu1 %v4495_v14  ;;  %v4583_v13 = vld [vmem:[#allocation5 + $0x620] ss:$16 sps:$4 sm:$0xff]   ;;  %v4586_v14 = vld [vmem:[#allocation5 + $0x628] ss:$16 sps:$4 sm:$0xff]  }
  0xe6   :  { %2775 = vmatpush1.bf16.msra.mxu0 %v4490_v15  ;;  %3076 = vmatpush1.bf16.msra.mxu1 %v4493_v16  ;;  %v4591_v15 = vld [vmem:[#allocation5 + $0x644] ss:$16 sps:$4 sm:$0xff]   ;;  %v4594_v16 = vld [vmem:[#allocation5 + $0x64c] ss:$16 sps:$4 sm:$0xff]  }
  0xe7   :  { %2776 = vmatprep.subr.bf16.mxu0 %v4498_v17  ;;  %3077 = vmatprep.subr.bf16.mxu1 %v4501_v18  ;;  %v4589_v17 = vld [vmem:[#allocation5 + $0x640] ss:$16 sps:$4 sm:$0xff]   ;;  %v4592_v18 = vld [vmem:[#allocation5 + $0x648] ss:$16 sps:$4 sm:$0xff]  }
  0xea   :  { %2777 = vmatpush1.bf16.msra.mxu0 %v4496_v19  ;;  %3078 = vmatpush1.bf16.msra.mxu1 %v4499_v20  ;;  %v4597_v19 = vld [vmem:[#allocation5 + $0x664] ss:$16 sps:$4 sm:$0xff]   ;;  %v4600_v20 = vld [vmem:[#allocation5 + $0x66c] ss:$16 sps:$4 sm:$0xff]  }
  0xeb   :  { %2778 = vmatprep.subr.bf16.mxu0 %v4504_v21  ;;  %3079 = vmatprep.subr.bf16.mxu1 %v4507_v22  ;;  %v4595_v21 = vld [vmem:[#allocation5 + $0x660] ss:$16 sps:$4 sm:$0xff]   ;;  %v4598_v22 = vld [vmem:[#allocation5 + $0x668] ss:$16 sps:$4 sm:$0xff]  }
  0xee   :  { %2779 = vmatpush1.bf16.msra.mxu0 %v4502_v23  ;;  %3080 = vmatpush1.bf16.msra.mxu1 %v4505_v24  ;;  %v4603_v23 = vld [vmem:[#allocation5 + $0x684] ss:$16 sps:$4 sm:$0xff]   ;;  %v4606_v24 = vld [vmem:[#allocation5 + $0x68c] ss:$16 sps:$4 sm:$0xff]  }
  0xef   :  { %2780 = vmatprep.subr.bf16.mxu0 %v4510_v25  ;;  %3081 = vmatprep.subr.bf16.mxu1 %v4513_v26  ;;  %v4601_v25 = vld [vmem:[#allocation5 + $0x680] ss:$16 sps:$4 sm:$0xff]   ;;  %v4604_v26 = vld [vmem:[#allocation5 + $0x688] ss:$16 sps:$4 sm:$0xff]  }
  0xf2   :  { %2781 = vmatpush1.bf16.msra.mxu0 %v4508_v27  ;;  %3082 = vmatpush1.bf16.msra.mxu1 %v4511_v28  ;;  %v4609_v27 = vld [vmem:[#allocation5 + $0x6a4] ss:$16 sps:$4 sm:$0xff]   ;;  %v4612_v28 = vld [vmem:[#allocation5 + $0x6ac] ss:$16 sps:$4 sm:$0xff]  }
  0xf3   :  { %2782 = vmatprep.subr.bf16.mxu0 %v4516_v29  ;;  %3083 = vmatprep.subr.bf16.mxu1 %v4519_v30  ;;  %v4607_v29 = vld [vmem:[#allocation5 + $0x6a0] ss:$16 sps:$4 sm:$0xff]   ;;  %v4610_v30 = vld [vmem:[#allocation5 + $0x6a8] ss:$16 sps:$4 sm:$0xff]  }
  0xf6   :  { %2783 = vmatpush1.bf16.msra.mxu0 %v4514_v31  ;;  %3084 = vmatpush1.bf16.msra.mxu1 %v4517_v32  ;;  %v4615_v31 = vld [vmem:[#allocation5 + $0x6c4] ss:$16 sps:$4 sm:$0xff]   ;;  %v4618_v32 = vld [vmem:[#allocation5 + $0x6cc] ss:$16 sps:$4 sm:$0xff]  }
  0xf7   :  { %2784 = vmatprep.subr.bf16.mxu0 %v4522_v33  ;;  %3085 = vmatprep.subr.bf16.mxu1 %v4525_v34  ;;  %v4613_v33 = vld [vmem:[#allocation5 + $0x6c0] ss:$16 sps:$4 sm:$0xff]   ;;  %v4616_v34 = vld [vmem:[#allocation5 + $0x6c8] ss:$16 sps:$4 sm:$0xff]  }
  0xfa   :  { %2785 = vmatpush1.bf16.msra.mxu0 %v4520_v35  ;;  %3086 = vmatpush1.bf16.msra.mxu1 %v4523_v36  ;;  %v4621_v35 = vld [vmem:[#allocation5 + $0x6e4] ss:$16 sps:$4 sm:$0xff]   ;;  %v4624_v36 = vld [vmem:[#allocation5 + $0x6ec] ss:$16 sps:$4 sm:$0xff]  }
  0xfb   :  { %2786 = vmatprep.subr.bf16.mxu0 %v4528_v37  ;;  %3087 = vmatprep.subr.bf16.mxu1 %v4531_v38  ;;  %v4619_v37 = vld [vmem:[#allocation5 + $0x6e0] ss:$16 sps:$4 sm:$0xff]   ;;  %v4622_v38 = vld [vmem:[#allocation5 + $0x6e8] ss:$16 sps:$4 sm:$0xff]  }
  0xfe   :  { %2787 = vmatpush1.bf16.msra.mxu0 %v4526_v39  ;;  %3088 = vmatpush1.bf16.msra.mxu1 %v4529_v40  ;;  %v4627_v39 = vld [vmem:[#allocation5 + $0x704] ss:$16 sps:$4 sm:$0xff]   ;;  %v4630_v40 = vld [vmem:[#allocation5 + $0x70c] ss:$16 sps:$4 sm:$0xff]  }
  0xff   :  { %2788 = vmatprep.subr.bf16.mxu0 %v4534_v41  ;;  %3089 = vmatprep.subr.bf16.mxu1 %v4537_v42  ;;  %v4625_v41 = vld [vmem:[#allocation5 + $0x700] ss:$16 sps:$4 sm:$0xff]   ;;  %v4628_v42 = vld [vmem:[#allocation5 + $0x708] ss:$16 sps:$4 sm:$0xff]  }
 0x102   :  { %2789 = vmatpush1.bf16.msra.mxu0 %v4532_v43  ;;  %3090 = vmatpush1.bf16.msra.mxu1 %v4535_v44  ;;  %v4633_v43 = vld [vmem:[#allocation5 + $0x724] ss:$16 sps:$4 sm:$0xff]   ;;  %v4636_v44 = vld [vmem:[#allocation5 + $0x72c] ss:$16 sps:$4 sm:$0xff]  }
 0x103   :  { %2790 = vmatprep.subr.bf16.mxu0 %v4540_v45  ;;  %3091 = vmatprep.subr.bf16.mxu1 %v4543_v46  ;;  %v4631_v45 = vld [vmem:[#allocation5 + $0x720] ss:$16 sps:$4 sm:$0xff]   ;;  %v4634_v46 = vld [vmem:[#allocation5 + $0x728] ss:$16 sps:$4 sm:$0xff]  }
 0x106   :  { %2791 = vmatpush1.bf16.msra.mxu0 %v4538_v47  ;;  %3092 = vmatpush1.bf16.msra.mxu1 %v4541_v48  ;;  %v4639_v47 = vld [vmem:[#allocation5 + $0x744] ss:$16 sps:$4 sm:$0xff]   ;;  %v4642_v48 = vld [vmem:[#allocation5 + $0x74c] ss:$16 sps:$4 sm:$0xff]  }
 0x107   :  { %2792 = vmatprep.subr.bf16.mxu0 %v4546_v49  ;;  %3093 = vmatprep.subr.bf16.mxu1 %v4549_v50  ;;  %v4637_v49 = vld [vmem:[#allocation5 + $0x740] ss:$16 sps:$4 sm:$0xff]   ;;  %v4640_v50 = vld [vmem:[#allocation5 + $0x748] ss:$16 sps:$4 sm:$0xff]  }
 0x10a   :  { %2793 = vmatpush1.bf16.msra.mxu0 %v4544_v51  ;;  %3094 = vmatpush1.bf16.msra.mxu1 %v4547_v52  ;;  %v4645_v51 = vld [vmem:[#allocation5 + $0x764] ss:$16 sps:$4 sm:$0xff]   ;;  %v4648_v52 = vld [vmem:[#allocation5 + $0x76c] ss:$16 sps:$4 sm:$0xff]  }
 0x10b   :  { %2794 = vmatprep.subr.bf16.mxu0 %v4552_v53  ;;  %3095 = vmatprep.subr.bf16.mxu1 %v4555_v54  ;;  %v4643_v53 = vld [vmem:[#allocation5 + $0x760] ss:$16 sps:$4 sm:$0xff]   ;;  %v4646_v54 = vld [vmem:[#allocation5 + $0x768] ss:$16 sps:$4 sm:$0xff]  }
 0x10e   :  { %2795 = vmatpush1.bf16.msra.mxu0 %v4550_v55  ;;  %3096 = vmatpush1.bf16.msra.mxu1 %v4553_v56  ;;  %v4651_v55 = vld [vmem:[#allocation5 + $0x784] ss:$16 sps:$4 sm:$0xff]   ;;  %v4654_v56 = vld [vmem:[#allocation5 + $0x78c] ss:$16 sps:$4 sm:$0xff]  }
 0x10f   :  { %2796 = vmatprep.subr.bf16.mxu0 %v4558_v57  ;;  %3097 = vmatprep.subr.bf16.mxu1 %v4561_v58  ;;  %v4649_v57 = vld [vmem:[#allocation5 + $0x780] ss:$16 sps:$4 sm:$0xff]   ;;  %v4652_v58 = vld [vmem:[#allocation5 + $0x788] ss:$16 sps:$4 sm:$0xff]  }
 0x112   :  { %2797 = vmatpush1.bf16.msra.mxu0 %v4556_v59  ;;  %3098 = vmatpush1.bf16.msra.mxu1 %v4559_v60  ;;  %v4657_v59 = vld [vmem:[#allocation5 + $0x7a4] ss:$16 sps:$4 sm:$0xff]   ;;  %v4660_v60 = vld [vmem:[#allocation5 + $0x7ac] ss:$16 sps:$4 sm:$0xff]  }
 0x113   :  { %2798 = vmatprep.subr.bf16.mxu0 %v4564_v61  ;;  %3099 = vmatprep.subr.bf16.mxu1 %v4567_v62  ;;  %v4655_v61 = vld [vmem:[#allocation5 + $0x7a0] ss:$16 sps:$4 sm:$0xff]   ;;  %v4658_v62 = vld [vmem:[#allocation5 + $0x7a8] ss:$16 sps:$4 sm:$0xff]  }
 0x116   :  { %2799 = vmatpush1.bf16.msra.mxu0 %v4562_v63  ;;  %3100 = vmatpush1.bf16.msra.mxu1 %v4565_v0  ;;  %v4663_v63 = vld [vmem:[#allocation5 + $0x7c4] ss:$16 sps:$4 sm:$0xff]   ;;  %v4666_v0 = vld [vmem:[#allocation5 + $0x7cc] ss:$16 sps:$4 sm:$0xff]  }
 0x117   :  { %2800 = vmatprep.subr.bf16.mxu0 %v4570_v1  ;;  %3101 = vmatprep.subr.bf16.mxu1 %v4573_v2  ;;  %v4661_v1 = vld [vmem:[#allocation5 + $0x7c0] ss:$16 sps:$4 sm:$0xff]   ;;  %v4664_v2 = vld [vmem:[#allocation5 + $0x7c8] ss:$16 sps:$4 sm:$0xff]  }
 0x11a   :  { %2801 = vmatpush1.bf16.msra.mxu0 %v4568_v3  ;;  %3102 = vmatpush1.bf16.msra.mxu1 %v4571_v4  ;;  %v4669_v3 = vld [vmem:[#allocation5 + $0x7e4] ss:$16 sps:$4 sm:$0xff]   ;;  %v4672_v4 = vld [vmem:[#allocation5 + $0x7ec] ss:$16 sps:$4 sm:$0xff]  }
 0x11b   :  { %2813 = vmatprep.subr.bf16.mxu0 %v4579_v5  ;;  %3114 = vmatprep.subr.bf16.mxu1 %v4582_v6  ;;  %v4667_v5 = vld [vmem:[#allocation5 + $0x7e0] ss:$16 sps:$4 sm:$0xff]   ;;  %v4670_v6 = vld [vmem:[#allocation5 + $0x7e8] ss:$16 sps:$4 sm:$0xff]  }
 0x11d   :  { %2803 = vmatmul.mubr.bf16.vlgmr.msra.gmra.mrb[0].mxu0 %v4574_v7  ;;  %3104 = vmatmul.mubr.bf16.vlgmr.msra.gmra.mrb[0].mxu1 %v4574_v7  ;;  %v4678_v7 = vld [vmem:[#allocation5 + $0x804] ss:$16 sps:$4 sm:$0xff]  }
 0x11e   :  { %2814 = vmatpush1.bf16.msra.mxu0 %v4577_v8  ;;  %3115 = vmatpush1.bf16.msra.mxu1 %v4580_v9  ;;  %v4681_v8 = vld [vmem:[#allocation5 + $0x80c] ss:$16 sps:$4 sm:$0xff]   ;;  %v4673_v9 = vld [vmem:[#allocation2 + $0x18] ss:$52 sps:$4 sm:$0xff]  }
 0x11f   :  { %2815 = vmatprep.subr.bf16.mxu0 %v4585_v10  ;;  %3116 = vmatprep.subr.bf16.mxu1 %v4588_v11  ;;  %v4676_v10 = vld [vmem:[#allocation5 + $0x800] ss:$16 sps:$4 sm:$0xff]   ;;  %v4679_v11 = vld [vmem:[#allocation5 + $0x808] ss:$16 sps:$4 sm:$0xff]  }
 0x120   :  { %2845 = vmatprep.mubr.bf16.mxu0 %v4675_v12  ;;  %3146 = vmatprep.mubr.bf16.mxu1 %v4675_v12  ;;  %v4684_v12 = vld [vmem:[#allocation5 + $0x824] ss:$16 sps:$4 sm:$0xff]  }
 0x122   :  { %2816 = vmatpush1.bf16.msra.mxu0 %v4583_v13  ;;  %3117 = vmatpush1.bf16.msra.mxu1 %v4586_v14  ;;  %v4687_v13 = vld [vmem:[#allocation5 + $0x82c] ss:$16 sps:$4 sm:$0xff]  }
 0x123   :  { %2817 = vmatprep.subr.bf16.mxu0 %v4591_v15  ;;  %3118 = vmatprep.subr.bf16.mxu1 %v4594_v16  ;;  %v4774_v14 = vld [vmem:[#allocation2 + $0x24] ss:$52 sps:$4 sm:$0xff]   ;;  %v4685_v16 = vld [vmem:[#allocation5 + $0x828] ss:$16 sps:$4 sm:$0xff]  }
 0x124   :  { %v4682_v15 = vld [vmem:[#allocation5 + $0x820] ss:$16 sps:$4 sm:$0xff]  }
 0x126   :  { %2818 = vmatpush1.bf16.msra.mxu0 %v4589_v17  ;;  %3119 = vmatpush1.bf16.msra.mxu1 %v4592_v18  ;;  %v4690_v17 = vld [vmem:[#allocation5 + $0x844] ss:$16 sps:$4 sm:$0xff]   ;;  %v4693_v18 = vld [vmem:[#allocation5 + $0x84c] ss:$16 sps:$4 sm:$0xff]  }
 0x127   :  { %2819 = vmatprep.subr.bf16.mxu0 %v4597_v19  ;;  %3120 = vmatprep.subr.bf16.mxu1 %v4600_v20  ;;  %v4688_v19 = vld [vmem:[#allocation5 + $0x840] ss:$16 sps:$4 sm:$0xff]   ;;  %v4691_v20 = vld [vmem:[#allocation5 + $0x848] ss:$16 sps:$4 sm:$0xff]  }
 0x12a   :  { %2820 = vmatpush1.bf16.msra.mxu0 %v4595_v21  ;;  %3121 = vmatpush1.bf16.msra.mxu1 %v4598_v22  ;;  %v4696_v21 = vld [vmem:[#allocation5 + $0x864] ss:$16 sps:$4 sm:$0xff]   ;;  %v4699_v22 = vld [vmem:[#allocation5 + $0x86c] ss:$16 sps:$4 sm:$0xff]  }
 0x12b   :  { %2821 = vmatprep.subr.bf16.mxu0 %v4603_v23  ;;  %3122 = vmatprep.subr.bf16.mxu1 %v4606_v24  ;;  %v4694_v23 = vld [vmem:[#allocation5 + $0x860] ss:$16 sps:$4 sm:$0xff]   ;;  %v4697_v24 = vld [vmem:[#allocation5 + $0x868] ss:$16 sps:$4 sm:$0xff]  }
 0x12e   :  { %2822 = vmatpush1.bf16.msra.mxu0 %v4601_v25  ;;  %3123 = vmatpush1.bf16.msra.mxu1 %v4604_v26  ;;  %v4702_v25 = vld [vmem:[#allocation5 + $0x884] ss:$16 sps:$4 sm:$0xff]   ;;  %v4705_v26 = vld [vmem:[#allocation5 + $0x88c] ss:$16 sps:$4 sm:$0xff]  }
 0x12f   :  { %2823 = vmatprep.subr.bf16.mxu0 %v4609_v27  ;;  %3124 = vmatprep.subr.bf16.mxu1 %v4612_v28  ;;  %v4700_v27 = vld [vmem:[#allocation5 + $0x880] ss:$16 sps:$4 sm:$0xff]   ;;  %v4703_v28 = vld [vmem:[#allocation5 + $0x888] ss:$16 sps:$4 sm:$0xff]  }
 0x132   :  { %2824 = vmatpush1.bf16.msra.mxu0 %v4607_v29  ;;  %3125 = vmatpush1.bf16.msra.mxu1 %v4610_v30  ;;  %v4708_v29 = vld [vmem:[#allocation5 + $0x8a4] ss:$16 sps:$4 sm:$0xff]   ;;  %v4711_v30 = vld [vmem:[#allocation5 + $0x8ac] ss:$16 sps:$4 sm:$0xff]  }
 0x133   :  { %2825 = vmatprep.subr.bf16.mxu0 %v4615_v31  ;;  %3126 = vmatprep.subr.bf16.mxu1 %v4618_v32  ;;  %v4706_v31 = vld [vmem:[#allocation5 + $0x8a0] ss:$16 sps:$4 sm:$0xff]   ;;  %v4709_v32 = vld [vmem:[#allocation5 + $0x8a8] ss:$16 sps:$4 sm:$0xff]  }
 0x136   :  { %2826 = vmatpush1.bf16.msra.mxu0 %v4613_v33  ;;  %3127 = vmatpush1.bf16.msra.mxu1 %v4616_v34  ;;  %v4714_v33 = vld [vmem:[#allocation5 + $0x8c4] ss:$16 sps:$4 sm:$0xff]   ;;  %v4717_v34 = vld [vmem:[#allocation5 + $0x8cc] ss:$16 sps:$4 sm:$0xff]  }
 0x137   :  { %2827 = vmatprep.subr.bf16.mxu0 %v4621_v35  ;;  %3128 = vmatprep.subr.bf16.mxu1 %v4624_v36  ;;  %v4712_v35 = vld [vmem:[#allocation5 + $0x8c0] ss:$16 sps:$4 sm:$0xff]   ;;  %v4715_v36 = vld [vmem:[#allocation5 + $0x8c8] ss:$16 sps:$4 sm:$0xff]  }
 0x13a   :  { %2828 = vmatpush1.bf16.msra.mxu0 %v4619_v37  ;;  %3129 = vmatpush1.bf16.msra.mxu1 %v4622_v38  ;;  %v4720_v37 = vld [vmem:[#allocation5 + $0x8e4] ss:$16 sps:$4 sm:$0xff]   ;;  %v4723_v38 = vld [vmem:[#allocation5 + $0x8ec] ss:$16 sps:$4 sm:$0xff]  }
 0x13b   :  { %2829 = vmatprep.subr.bf16.mxu0 %v4627_v39  ;;  %3130 = vmatprep.subr.bf16.mxu1 %v4630_v40  ;;  %v4718_v39 = vld [vmem:[#allocation5 + $0x8e0] ss:$16 sps:$4 sm:$0xff]   ;;  %v4721_v40 = vld [vmem:[#allocation5 + $0x8e8] ss:$16 sps:$4 sm:$0xff]  }
 0x13e   :  { %2830 = vmatpush1.bf16.msra.mxu0 %v4625_v41  ;;  %3131 = vmatpush1.bf16.msra.mxu1 %v4628_v42  ;;  %v4726_v41 = vld [vmem:[#allocation5 + $0x904] ss:$16 sps:$4 sm:$0xff]   ;;  %v4729_v42 = vld [vmem:[#allocation5 + $0x90c] ss:$16 sps:$4 sm:$0xff]  }
 0x13f   :  { %2831 = vmatprep.subr.bf16.mxu0 %v4633_v43  ;;  %3132 = vmatprep.subr.bf16.mxu1 %v4636_v44  ;;  %v4724_v43 = vld [vmem:[#allocation5 + $0x900] ss:$16 sps:$4 sm:$0xff]   ;;  %v4727_v44 = vld [vmem:[#allocation5 + $0x908] ss:$16 sps:$4 sm:$0xff]  }
 0x142   :  { %2832 = vmatpush1.bf16.msra.mxu0 %v4631_v45  ;;  %3133 = vmatpush1.bf16.msra.mxu1 %v4634_v46  ;;  %v4732_v45 = vld [vmem:[#allocation5 + $0x924] ss:$16 sps:$4 sm:$0xff]   ;;  %v4735_v46 = vld [vmem:[#allocation5 + $0x92c] ss:$16 sps:$4 sm:$0xff]  }
 0x143   :  { %2833 = vmatprep.subr.bf16.mxu0 %v4639_v47  ;;  %3134 = vmatprep.subr.bf16.mxu1 %v4642_v48  ;;  %v4730_v47 = vld [vmem:[#allocation5 + $0x920] ss:$16 sps:$4 sm:$0xff]   ;;  %v4733_v48 = vld [vmem:[#allocation5 + $0x928] ss:$16 sps:$4 sm:$0xff]  }
 0x146   :  { %2834 = vmatpush1.bf16.msra.mxu0 %v4637_v49  ;;  %3135 = vmatpush1.bf16.msra.mxu1 %v4640_v50  ;;  %v4738_v49 = vld [vmem:[#allocation5 + $0x944] ss:$16 sps:$4 sm:$0xff]   ;;  %v4741_v50 = vld [vmem:[#allocation5 + $0x94c] ss:$16 sps:$4 sm:$0xff]  }
 0x147   :  { %2835 = vmatprep.subr.bf16.mxu0 %v4645_v51  ;;  %3136 = vmatprep.subr.bf16.mxu1 %v4648_v52  ;;  %v4736_v51 = vld [vmem:[#allocation5 + $0x940] ss:$16 sps:$4 sm:$0xff]   ;;  %v4739_v52 = vld [vmem:[#allocation5 + $0x948] ss:$16 sps:$4 sm:$0xff]  }
 0x14a   :  { %2836 = vmatpush1.bf16.msra.mxu0 %v4643_v53  ;;  %3137 = vmatpush1.bf16.msra.mxu1 %v4646_v54  ;;  %v4744_v53 = vld [vmem:[#allocation5 + $0x964] ss:$16 sps:$4 sm:$0xff]   ;;  %v4747_v54 = vld [vmem:[#allocation5 + $0x96c] ss:$16 sps:$4 sm:$0xff]  }
 0x14b   :  { %2837 = vmatprep.subr.bf16.mxu0 %v4651_v55  ;;  %3138 = vmatprep.subr.bf16.mxu1 %v4654_v56  ;;  %v4742_v55 = vld [vmem:[#allocation5 + $0x960] ss:$16 sps:$4 sm:$0xff]   ;;  %v4745_v56 = vld [vmem:[#allocation5 + $0x968] ss:$16 sps:$4 sm:$0xff]  }
 0x14e   :  { %2838 = vmatpush1.bf16.msra.mxu0 %v4649_v57  ;;  %3139 = vmatpush1.bf16.msra.mxu1 %v4652_v58  ;;  %v4750_v57 = vld [vmem:[#allocation5 + $0x984] ss:$16 sps:$4 sm:$0xff]   ;;  %v4753_v58 = vld [vmem:[#allocation5 + $0x98c] ss:$16 sps:$4 sm:$0xff]  }
 0x14f   :  { %2839 = vmatprep.subr.bf16.mxu0 %v4657_v59  ;;  %3140 = vmatprep.subr.bf16.mxu1 %v4660_v60  ;;  %v4748_v59 = vld [vmem:[#allocation5 + $0x980] ss:$16 sps:$4 sm:$0xff]   ;;  %v4751_v60 = vld [vmem:[#allocation5 + $0x988] ss:$16 sps:$4 sm:$0xff]  }
 0x152   :  { %2840 = vmatpush1.bf16.msra.mxu0 %v4655_v61  ;;  %3141 = vmatpush1.bf16.msra.mxu1 %v4658_v62  ;;  %v4756_v61 = vld [vmem:[#allocation5 + $0x9a4] ss:$16 sps:$4 sm:$0xff]   ;;  %v4759_v62 = vld [vmem:[#allocation5 + $0x9ac] ss:$16 sps:$4 sm:$0xff]  }
 0x153   :  { %2841 = vmatprep.subr.bf16.mxu0 %v4663_v63  ;;  %3142 = vmatprep.subr.bf16.mxu1 %v4666_v0  ;;  %v4754_v63 = vld [vmem:[#allocation5 + $0x9a0] ss:$16 sps:$4 sm:$0xff]   ;;  %v4757_v0 = vld [vmem:[#allocation5 + $0x9a8] ss:$16 sps:$4 sm:$0xff]  }
 0x156   :  { %2842 = vmatpush1.bf16.msra.mxu0 %v4661_v1  ;;  %3143 = vmatpush1.bf16.msra.mxu1 %v4664_v2  ;;  %v4762_v1 = vld [vmem:[#allocation5 + $0x9c4] ss:$16 sps:$4 sm:$0xff]   ;;  %v4765_v2 = vld [vmem:[#allocation5 + $0x9cc] ss:$16 sps:$4 sm:$0xff]  }
 0x157   :  { %2843 = vmatprep.subr.bf16.mxu0 %v4669_v3  ;;  %3144 = vmatprep.subr.bf16.mxu1 %v4672_v4  ;;  %v4760_v3 = vld [vmem:[#allocation5 + $0x9c0] ss:$16 sps:$4 sm:$0xff]   ;;  %v4763_v4 = vld [vmem:[#allocation5 + $0x9c8] ss:$16 sps:$4 sm:$0xff]  }
 0x15a   :  { %2844 = vmatpush1.bf16.msra.mxu0 %v4667_v5  ;;  %3145 = vmatpush1.bf16.msra.mxu1 %v4670_v6  ;;  %v4768_v5 = vld [vmem:[#allocation5 + $0x9e4] ss:$16 sps:$4 sm:$0xff]   ;;  %v4771_v6 = vld [vmem:[#allocation5 + $0x9ec] ss:$16 sps:$4 sm:$0xff]  }
 0x15b   :  { %2856 = vmatprep.subr.bf16.mxu0 %v4678_v7  ;;  %3157 = vmatprep.subr.bf16.mxu1 %v4681_v8  ;;  %v4766_v7 = vld [vmem:[#allocation5 + $0x9e0] ss:$16 sps:$4 sm:$0xff]   ;;  %v4769_v8 = vld [vmem:[#allocation5 + $0x9e8] ss:$16 sps:$4 sm:$0xff]  }
 0x15d   :  { %2846 = vmatmul.mubr.bf16.vlgmr.msra.gmra.mrb[0].mxu0 %v4673_v9  ;;  %3147 = vmatmul.mubr.bf16.vlgmr.msra.gmra.mrb[0].mxu1 %v4673_v9  ;;  %v4777_v9 = vld [vmem:[#allocation5 + $0xa04] ss:$16 sps:$4 sm:$0xff]  }
 0x15e   :  { %2857 = vmatpush1.bf16.msra.mxu0 %v4676_v10  ;;  %3158 = vmatpush1.bf16.msra.mxu1 %v4679_v11  ;;  %v4780_v10 = vld [vmem:[#allocation5 + $0xa0c] ss:$16 sps:$4 sm:$0xff]  }
 0x15f   :  { %2858 = vmatprep.subr.bf16.mxu0 %v4684_v12  ;;  %3159 = vmatprep.subr.bf16.mxu1 %v4687_v13  ;;  %v4772_v11 = vld [vmem:[#allocation2 + $0x20] ss:$52 sps:$4 sm:$0xff]   ;;  %v4775_v12 = vld [vmem:[#allocation5 + $0xa00] ss:$16 sps:$4 sm:$0xff]  }
 0x160   :  { %2888 = vmatprep.mubr.bf16.mxu0 %v4774_v14  ;;  %3189 = vmatprep.mubr.bf16.mxu1 %v4774_v14  ;;  %v4778_v13 = vld [vmem:[#allocation5 + $0xa08] ss:$16 sps:$4 sm:$0xff]   ;;  %v4783_v14 = vld [vmem:[#allocation5 + $0xa24] ss:$16 sps:$4 sm:$0xff]  }
 0x162   :  { %2859 = vmatpush1.bf16.msra.mxu0 %v4682_v15  ;;  %3160 = vmatpush1.bf16.msra.mxu1 %v4685_v16  ;;  %v4786_v15 = vld [vmem:[#allocation5 + $0xa2c] ss:$16 sps:$4 sm:$0xff]   ;;  %v4873_v16 = vld [vmem:[#allocation2 + $0x2c] ss:$52 sps:$4 sm:$0xff]  }
 0x163   :  { %2860 = vmatprep.subr.bf16.mxu0 %v4690_v17  ;;  %3161 = vmatprep.subr.bf16.mxu1 %v4693_v18  ;;  %v4781_v17 = vld [vmem:[#allocation5 + $0xa20] ss:$16 sps:$4 sm:$0xff]   ;;  %v4784_v18 = vld [vmem:[#allocation5 + $0xa28] ss:$16 sps:$4 sm:$0xff]  }
 0x166   :  { %2861 = vmatpush1.bf16.msra.mxu0 %v4688_v19  ;;  %3162 = vmatpush1.bf16.msra.mxu1 %v4691_v20  ;;  %v4789_v19 = vld [vmem:[#allocation5 + $0xa44] ss:$16 sps:$4 sm:$0xff]   ;;  %v4792_v20 = vld [vmem:[#allocation5 + $0xa4c] ss:$16 sps:$4 sm:$0xff]  }
 0x167   :  { %2862 = vmatprep.subr.bf16.mxu0 %v4696_v21  ;;  %3163 = vmatprep.subr.bf16.mxu1 %v4699_v22  ;;  %v4787_v21 = vld [vmem:[#allocation5 + $0xa40] ss:$16 sps:$4 sm:$0xff]   ;;  %v4790_v22 = vld [vmem:[#allocation5 + $0xa48] ss:$16 sps:$4 sm:$0xff]  }
 0x16a   :  { %2863 = vmatpush1.bf16.msra.mxu0 %v4694_v23  ;;  %3164 = vmatpush1.bf16.msra.mxu1 %v4697_v24  ;;  %v4795_v23 = vld [vmem:[#allocation5 + $0xa64] ss:$16 sps:$4 sm:$0xff]   ;;  %v4798_v24 = vld [vmem:[#allocation5 + $0xa6c] ss:$16 sps:$4 sm:$0xff]  }
 0x16b   :  { %2864 = vmatprep.subr.bf16.mxu0 %v4702_v25  ;;  %3165 = vmatprep.subr.bf16.mxu1 %v4705_v26  ;;  %v4793_v25 = vld [vmem:[#allocation5 + $0xa60] ss:$16 sps:$4 sm:$0xff]   ;;  %v4796_v26 = vld [vmem:[#allocation5 + $0xa68] ss:$16 sps:$4 sm:$0xff]  }
 0x16e   :  { %2865 = vmatpush1.bf16.msra.mxu0 %v4700_v27  ;;  %3166 = vmatpush1.bf16.msra.mxu1 %v4703_v28  ;;  %v4801_v27 = vld [vmem:[#allocation5 + $0xa84] ss:$16 sps:$4 sm:$0xff]   ;;  %v4804_v28 = vld [vmem:[#allocation5 + $0xa8c] ss:$16 sps:$4 sm:$0xff]  }
 0x16f   :  { %2866 = vmatprep.subr.bf16.mxu0 %v4708_v29  ;;  %3167 = vmatprep.subr.bf16.mxu1 %v4711_v30  ;;  %v4799_v29 = vld [vmem:[#allocation5 + $0xa80] ss:$16 sps:$4 sm:$0xff]   ;;  %v4802_v30 = vld [vmem:[#allocation5 + $0xa88] ss:$16 sps:$4 sm:$0xff]  }
 0x172   :  { %2867 = vmatpush1.bf16.msra.mxu0 %v4706_v31  ;;  %3168 = vmatpush1.bf16.msra.mxu1 %v4709_v32  ;;  %v4807_v31 = vld [vmem:[#allocation5 + $0xaa4] ss:$16 sps:$4 sm:$0xff]   ;;  %v4810_v32 = vld [vmem:[#allocation5 + $0xaac] ss:$16 sps:$4 sm:$0xff]  }
 0x173   :  { %2868 = vmatprep.subr.bf16.mxu0 %v4714_v33  ;;  %3169 = vmatprep.subr.bf16.mxu1 %v4717_v34  ;;  %v4805_v33 = vld [vmem:[#allocation5 + $0xaa0] ss:$16 sps:$4 sm:$0xff]   ;;  %v4808_v34 = vld [vmem:[#allocation5 + $0xaa8] ss:$16 sps:$4 sm:$0xff]  }
 0x176   :  { %2869 = vmatpush1.bf16.msra.mxu0 %v4712_v35  ;;  %3170 = vmatpush1.bf16.msra.mxu1 %v4715_v36  ;;  %v4813_v35 = vld [vmem:[#allocation5 + $0xac4] ss:$16 sps:$4 sm:$0xff]   ;;  %v4816_v36 = vld [vmem:[#allocation5 + $0xacc] ss:$16 sps:$4 sm:$0xff]  }
 0x177   :  { %2870 = vmatprep.subr.bf16.mxu0 %v4720_v37  ;;  %3171 = vmatprep.subr.bf16.mxu1 %v4723_v38  ;;  %v4811_v37 = vld [vmem:[#allocation5 + $0xac0] ss:$16 sps:$4 sm:$0xff]   ;;  %v4814_v38 = vld [vmem:[#allocation5 + $0xac8] ss:$16 sps:$4 sm:$0xff]  }
 0x17a   :  { %2871 = vmatpush1.bf16.msra.mxu0 %v4718_v39  ;;  %3172 = vmatpush1.bf16.msra.mxu1 %v4721_v40  ;;  %v4819_v39 = vld [vmem:[#allocation5 + $0xae4] ss:$16 sps:$4 sm:$0xff]   ;;  %v4822_v40 = vld [vmem:[#allocation5 + $0xaec] ss:$16 sps:$4 sm:$0xff]  }
 0x17b   :  { %2872 = vmatprep.subr.bf16.mxu0 %v4726_v41  ;;  %3173 = vmatprep.subr.bf16.mxu1 %v4729_v42  ;;  %v4817_v41 = vld [vmem:[#allocation5 + $0xae0] ss:$16 sps:$4 sm:$0xff]   ;;  %v4820_v42 = vld [vmem:[#allocation5 + $0xae8] ss:$16 sps:$4 sm:$0xff]  }
 0x17e   :  { %2873 = vmatpush1.bf16.msra.mxu0 %v4724_v43  ;;  %3174 = vmatpush1.bf16.msra.mxu1 %v4727_v44  ;;  %v4825_v43 = vld [vmem:[#allocation5 + $0xb04] ss:$16 sps:$4 sm:$0xff]   ;;  %v4828_v44 = vld [vmem:[#allocation5 + $0xb0c] ss:$16 sps:$4 sm:$0xff]  }
 0x17f   :  { %2874 = vmatprep.subr.bf16.mxu0 %v4732_v45  ;;  %3175 = vmatprep.subr.bf16.mxu1 %v4735_v46  ;;  %v4823_v45 = vld [vmem:[#allocation5 + $0xb00] ss:$16 sps:$4 sm:$0xff]   ;;  %v4826_v46 = vld [vmem:[#allocation5 + $0xb08] ss:$16 sps:$4 sm:$0xff]  }
 0x182   :  { %2875 = vmatpush1.bf16.msra.mxu0 %v4730_v47  ;;  %3176 = vmatpush1.bf16.msra.mxu1 %v4733_v48  ;;  %v4831_v47 = vld [vmem:[#allocation5 + $0xb24] ss:$16 sps:$4 sm:$0xff]   ;;  %v4834_v48 = vld [vmem:[#allocation5 + $0xb2c] ss:$16 sps:$4 sm:$0xff]  }
 0x183   :  { %2876 = vmatprep.subr.bf16.mxu0 %v4738_v49  ;;  %3177 = vmatprep.subr.bf16.mxu1 %v4741_v50  ;;  %v4829_v49 = vld [vmem:[#allocation5 + $0xb20] ss:$16 sps:$4 sm:$0xff]   ;;  %v4832_v50 = vld [vmem:[#allocation5 + $0xb28] ss:$16 sps:$4 sm:$0xff]  }
 0x186   :  { %2877 = vmatpush1.bf16.msra.mxu0 %v4736_v51  ;;  %3178 = vmatpush1.bf16.msra.mxu1 %v4739_v52  ;;  %v4837_v51 = vld [vmem:[#allocation5 + $0xb44] ss:$16 sps:$4 sm:$0xff]   ;;  %v4840_v52 = vld [vmem:[#allocation5 + $0xb4c] ss:$16 sps:$4 sm:$0xff]  }
 0x187   :  { %2878 = vmatprep.subr.bf16.mxu0 %v4744_v53  ;;  %3179 = vmatprep.subr.bf16.mxu1 %v4747_v54  ;;  %v4835_v53 = vld [vmem:[#allocation5 + $0xb40] ss:$16 sps:$4 sm:$0xff]   ;;  %v4838_v54 = vld [vmem:[#allocation5 + $0xb48] ss:$16 sps:$4 sm:$0xff]  }
 0x18a   :  { %2879 = vmatpush1.bf16.msra.mxu0 %v4742_v55  ;;  %3180 = vmatpush1.bf16.msra.mxu1 %v4745_v56  ;;  %v4843_v55 = vld [vmem:[#allocation5 + $0xb64] ss:$16 sps:$4 sm:$0xff]   ;;  %v4846_v56 = vld [vmem:[#allocation5 + $0xb6c] ss:$16 sps:$4 sm:$0xff]  }
 0x18b   :  { %2880 = vmatprep.subr.bf16.mxu0 %v4750_v57  ;;  %3181 = vmatprep.subr.bf16.mxu1 %v4753_v58  ;;  %v4841_v57 = vld [vmem:[#allocation5 + $0xb60] ss:$16 sps:$4 sm:$0xff]   ;;  %v4844_v58 = vld [vmem:[#allocation5 + $0xb68] ss:$16 sps:$4 sm:$0xff]  }
 0x18e   :  { %2881 = vmatpush1.bf16.msra.mxu0 %v4748_v59  ;;  %3182 = vmatpush1.bf16.msra.mxu1 %v4751_v60  ;;  %v4849_v59 = vld [vmem:[#allocation5 + $0xb84] ss:$16 sps:$4 sm:$0xff]   ;;  %v4852_v60 = vld [vmem:[#allocation5 + $0xb8c] ss:$16 sps:$4 sm:$0xff]  }
 0x18f   :  { %2882 = vmatprep.subr.bf16.mxu0 %v4756_v61  ;;  %3183 = vmatprep.subr.bf16.mxu1 %v4759_v62  ;;  %v4847_v61 = vld [vmem:[#allocation5 + $0xb80] ss:$16 sps:$4 sm:$0xff]   ;;  %v4850_v62 = vld [vmem:[#allocation5 + $0xb88] ss:$16 sps:$4 sm:$0xff]  }
 0x192   :  { %2883 = vmatpush1.bf16.msra.mxu0 %v4754_v63  ;;  %3184 = vmatpush1.bf16.msra.mxu1 %v4757_v0  ;;  %v4855_v63 = vld [vmem:[#allocation5 + $0xba4] ss:$16 sps:$4 sm:$0xff]   ;;  %v4858_v0 = vld [vmem:[#allocation5 + $0xbac] ss:$16 sps:$4 sm:$0xff]  }
 0x193   :  { %2884 = vmatprep.subr.bf16.mxu0 %v4762_v1  ;;  %3185 = vmatprep.subr.bf16.mxu1 %v4765_v2  ;;  %v4853_v1 = vld [vmem:[#allocation5 + $0xba0] ss:$16 sps:$4 sm:$0xff]   ;;  %v4856_v2 = vld [vmem:[#allocation5 + $0xba8] ss:$16 sps:$4 sm:$0xff]  }
 0x196   :  { %2885 = vmatpush1.bf16.msra.mxu0 %v4760_v3  ;;  %3186 = vmatpush1.bf16.msra.mxu1 %v4763_v4  ;;  %v4861_v3 = vld [vmem:[#allocation5 + $0xbc4] ss:$16 sps:$4 sm:$0xff]   ;;  %v4864_v4 = vld [vmem:[#allocation5 + $0xbcc] ss:$16 sps:$4 sm:$0xff]  }
 0x197   :  { %2886 = vmatprep.subr.bf16.mxu0 %v4768_v5  ;;  %3187 = vmatprep.subr.bf16.mxu1 %v4771_v6  ;;  %v4859_v5 = vld [vmem:[#allocation5 + $0xbc0] ss:$16 sps:$4 sm:$0xff]   ;;  %v4862_v6 = vld [vmem:[#allocation5 + $0xbc8] ss:$16 sps:$4 sm:$0xff]  }
 0x19a   :  { %2887 = vmatpush1.bf16.msra.mxu0 %v4766_v7  ;;  %3188 = vmatpush1.bf16.msra.mxu1 %v4769_v8  ;;  %v4867_v7 = vld [vmem:[#allocation5 + $0xbe4] ss:$16 sps:$4 sm:$0xff]   ;;  %v4870_v8 = vld [vmem:[#allocation5 + $0xbec] ss:$16 sps:$4 sm:$0xff]  }
 0x19b   :  { %2899 = vmatprep.subr.bf16.mxu0 %v4777_v9  ;;  %3200 = vmatprep.subr.bf16.mxu1 %v4780_v10  ;;  %v4865_v9 = vld [vmem:[#allocation5 + $0xbe0] ss:$16 sps:$4 sm:$0xff]   ;;  %v4868_v10 = vld [vmem:[#allocation5 + $0xbe8] ss:$16 sps:$4 sm:$0xff]  }
 0x19d   :  { %2889 = vmatmul.mubr.bf16.vlgmr.msra.gmra.mrb[0].mxu0 %v4772_v11  ;;  %3190 = vmatmul.mubr.bf16.vlgmr.msra.gmra.mrb[0].mxu1 %v4772_v11  ;;  %v4876_v11 = vld [vmem:[#allocation5 + $0xc04] ss:$16 sps:$4 sm:$0xff]  }
 0x19e   :  { %2900 = vmatpush1.bf16.msra.mxu0 %v4775_v12  ;;  %3201 = vmatpush1.bf16.msra.mxu1 %v4778_v13  ;;  %v4879_v12 = vld [vmem:[#allocation5 + $0xc0c] ss:$16 sps:$4 sm:$0xff]   ;;  %v4871_v13 = vld [vmem:[#allocation2 + $0x28] ss:$52 sps:$4 sm:$0xff]  }
 0x19f   :  { %2901 = vmatprep.subr.bf16.mxu0 %v4783_v14  ;;  %3202 = vmatprep.subr.bf16.mxu1 %v4786_v15  ;;  %v4874_v14 = vld [vmem:[#allocation5 + $0xc00] ss:$16 sps:$4 sm:$0xff]   ;;  %v4877_v15 = vld [vmem:[#allocation5 + $0xc08] ss:$16 sps:$4 sm:$0xff]  }
 0x1a0   :  { %2931 = vmatprep.mubr.bf16.mxu0 %v4873_v16  ;;  %3232 = vmatprep.mubr.bf16.mxu1 %v4873_v16  ;;  %v4882_v16 = vld [vmem:[#allocation5 + $0xc24] ss:$16 sps:$4 sm:$0xff]  }
 0x1a2   :  { %2902 = vmatpush1.bf16.msra.mxu0 %v4781_v17  ;;  %3203 = vmatpush1.bf16.msra.mxu1 %v4784_v18  ;;  %v4885_v17 = vld [vmem:[#allocation5 + $0xc2c] ss:$16 sps:$4 sm:$0xff]   ;;  %v4880_v18 = vld [vmem:[#allocation5 + $0xc20] ss:$16 sps:$4 sm:$0xff]  }
 0x1a3   :  { %2903 = vmatprep.subr.bf16.mxu0 %v4789_v19  ;;  %3204 = vmatprep.subr.bf16.mxu1 %v4792_v20  ;;  %v4883_v19 = vld [vmem:[#allocation5 + $0xc28] ss:$16 sps:$4 sm:$0xff]   ;;  %v4888_v20 = vld [vmem:[#allocation5 + $0xc44] ss:$16 sps:$4 sm:$0xff]  }
 0x1a6   :  { %2904 = vmatpush1.bf16.msra.mxu0 %v4787_v21  ;;  %3205 = vmatpush1.bf16.msra.mxu1 %v4790_v22  ;;  %v4891_v21 = vld [vmem:[#allocation5 + $0xc4c] ss:$16 sps:$4 sm:$0xff]   ;;  %v5114_v22 = vmov 0  }
 0x1a7   :  { %2905 = vmatprep.subr.bf16.mxu0 %v4795_v23  ;;  %3206 = vmatprep.subr.bf16.mxu1 %v4798_v24  ;;  %v4886_v23 = vld [vmem:[#allocation5 + $0xc40] ss:$16 sps:$4 sm:$0xff]   ;;  %v4889_v24 = vld [vmem:[#allocation5 + $0xc48] ss:$16 sps:$4 sm:$0xff]  }
 0x1aa   :  { %2906 = vmatpush1.bf16.msra.mxu0 %v4793_v25  ;;  %3207 = vmatpush1.bf16.msra.mxu1 %v4796_v26  ;;  %v4894_v25 = vld [vmem:[#allocation5 + $0xc64] ss:$16 sps:$4 sm:$0xff]   ;;  %v4897_v26 = vld [vmem:[#allocation5 + $0xc6c] ss:$16 sps:$4 sm:$0xff]  }
 0x1ab   :  { %2907 = vmatprep.subr.bf16.mxu0 %v4801_v27  ;;  %3208 = vmatprep.subr.bf16.mxu1 %v4804_v28  ;;  %v4892_v27 = vld [vmem:[#allocation5 + $0xc60] ss:$16 sps:$4 sm:$0xff]   ;;  %v4895_v28 = vld [vmem:[#allocation5 + $0xc68] ss:$16 sps:$4 sm:$0xff]  }
 0x1ae   :  { %2908 = vmatpush1.bf16.msra.mxu0 %v4799_v29  ;;  %3209 = vmatpush1.bf16.msra.mxu1 %v4802_v30  ;;  %v4900_v29 = vld [vmem:[#allocation5 + $0xc84] ss:$16 sps:$4 sm:$0xff]   ;;  %v4903_v30 = vld [vmem:[#allocation5 + $0xc8c] ss:$16 sps:$4 sm:$0xff]  }
 0x1af   :  { %2909 = vmatprep.subr.bf16.mxu0 %v4807_v31  ;;  %3210 = vmatprep.subr.bf16.mxu1 %v4810_v32  ;;  %v4898_v31 = vld [vmem:[#allocation5 + $0xc80] ss:$16 sps:$4 sm:$0xff]   ;;  %v4901_v32 = vld [vmem:[#allocation5 + $0xc88] ss:$16 sps:$4 sm:$0xff]  }
 0x1b2   :  { %2910 = vmatpush1.bf16.msra.mxu0 %v4805_v33  ;;  %3211 = vmatpush1.bf16.msra.mxu1 %v4808_v34  ;;  %v4906_v33 = vld [vmem:[#allocation5 + $0xca4] ss:$16 sps:$4 sm:$0xff]   ;;  %v4909_v34 = vld [vmem:[#allocation5 + $0xcac] ss:$16 sps:$4 sm:$0xff]  }
 0x1b3   :  { %2911 = vmatprep.subr.bf16.mxu0 %v4813_v35  ;;  %3212 = vmatprep.subr.bf16.mxu1 %v4816_v36  ;;  %v4904_v35 = vld [vmem:[#allocation5 + $0xca0] ss:$16 sps:$4 sm:$0xff]   ;;  %v4907_v36 = vld [vmem:[#allocation5 + $0xca8] ss:$16 sps:$4 sm:$0xff]  }
 0x1b6   :  { %2912 = vmatpush1.bf16.msra.mxu0 %v4811_v37  ;;  %3213 = vmatpush1.bf16.msra.mxu1 %v4814_v38  ;;  %v4912_v37 = vld [vmem:[#allocation5 + $0xcc4] ss:$16 sps:$4 sm:$0xff]   ;;  %v4915_v38 = vld [vmem:[#allocation5 + $0xccc] ss:$16 sps:$4 sm:$0xff]  }
 0x1b7   :  { %2913 = vmatprep.subr.bf16.mxu0 %v4819_v39  ;;  %3214 = vmatprep.subr.bf16.mxu1 %v4822_v40  ;;  %v4910_v39 = vld [vmem:[#allocation5 + $0xcc0] ss:$16 sps:$4 sm:$0xff]   ;;  %v4913_v40 = vld [vmem:[#allocation5 + $0xcc8] ss:$16 sps:$4 sm:$0xff]  }
 0x1ba   :  { %2914 = vmatpush1.bf16.msra.mxu0 %v4817_v41  ;;  %3215 = vmatpush1.bf16.msra.mxu1 %v4820_v42  ;;  %v4918_v41 = vld [vmem:[#allocation5 + $0xce4] ss:$16 sps:$4 sm:$0xff]   ;;  %v4921_v42 = vld [vmem:[#allocation5 + $0xcec] ss:$16 sps:$4 sm:$0xff]  }
 0x1bb   :  { %2915 = vmatprep.subr.bf16.mxu0 %v4825_v43  ;;  %3216 = vmatprep.subr.bf16.mxu1 %v4828_v44  ;;  %v4916_v43 = vld [vmem:[#allocation5 + $0xce0] ss:$16 sps:$4 sm:$0xff]   ;;  %v4919_v44 = vld [vmem:[#allocation5 + $0xce8] ss:$16 sps:$4 sm:$0xff]  }
 0x1be   :  { %2916 = vmatpush1.bf16.msra.mxu0 %v4823_v45  ;;  %3217 = vmatpush1.bf16.msra.mxu1 %v4826_v46  ;;  %v4923_v45 = vld [vmem:[#allocation8 + $0x40] sm:$0xff]  }
 0x1bf   :  { %2917 = vmatprep.subr.bf16.mxu0 %v4831_v47  ;;  %3218 = vmatprep.subr.bf16.mxu1 %v4834_v48  ;;  %v4924_v46 = vld [vmem:[#allocation8 + $0xc0] sm:$0xff]  }
 0x1c0   :  { %v4922_v47 = vld [vmem:[#allocation2 + $0x30] ss:$52 sps:$4 sm:$0xff]  }
 0x1c1   :  { %v4925_v48 = vld [vmem:[#allocation8] sm:$0xff]  }
 0x1c2   :  { %2918 = vmatpush1.bf16.msra.mxu0 %v4829_v49  ;;  %3219 = vmatpush1.bf16.msra.mxu1 %v4832_v50  ;;  %v4926_v49 = vld [vmem:[#allocation8 + $0x80] sm:$0xff]   ;;  %v4927_v50 = vld [vmem:[#allocation8 + $0x48] sm:$0xff]  }
 0x1c3   :  { %2919 = vmatprep.subr.bf16.mxu0 %v4837_v51  ;;  %3220 = vmatprep.subr.bf16.mxu1 %v4840_v52  ;;  %v4928_v51 = vld [vmem:[#allocation8 + $0xc8] sm:$0xff]  }
 0x1c4   :  { %v4929_v52 = vld [vmem:[#allocation8 + $0x8] sm:$0xff]  }
 0x1c6   :  { %2920 = vmatpush1.bf16.msra.mxu0 %v4835_v53  ;;  %3221 = vmatpush1.bf16.msra.mxu1 %v4838_v54  ;;  %v4930_v53 = vld [vmem:[#allocation8 + $0x88] sm:$0xff]   ;;  %v4931_v54 = vld [vmem:[#allocation8 + $0x50] sm:$0xff]  }
 0x1c7   :  { %2921 = vmatprep.subr.bf16.mxu0 %v4843_v55  ;;  %3222 = vmatprep.subr.bf16.mxu1 %v4846_v56  ;;  %v4932_v55 = vld [vmem:[#allocation8 + $0xd0] sm:$0xff]  }
 0x1c8   :  { %v4933_v56 = vld [vmem:[#allocation8 + $0x10] sm:$0xff]  }
 0x1ca   :  { %2922 = vmatpush1.bf16.msra.mxu0 %v4841_v57  ;;  %3223 = vmatpush1.bf16.msra.mxu1 %v4844_v58  ;;  %v4934_v57 = vld [vmem:[#allocation8 + $0x90] sm:$0xff]   ;;  %v4935_v58 = vld [vmem:[#allocation8 + $0x58] sm:$0xff]  }
 0x1cb   :  { %2923 = vmatprep.subr.bf16.mxu0 %v4849_v59  ;;  %3224 = vmatprep.subr.bf16.mxu1 %v4852_v60  ;;  %v4936_v59 = vld [vmem:[#allocation8 + $0xd8] sm:$0xff]  }
 0x1cc   :  { %v4937_v60 = vld [vmem:[#allocation8 + $0x18] sm:$0xff]  }
 0x1ce   :  { %2924 = vmatpush1.bf16.msra.mxu0 %v4847_v61  ;;  %3225 = vmatpush1.bf16.msra.mxu1 %v4850_v62  ;;  %v4938_v61 = vld [vmem:[#allocation8 + $0x98] sm:$0xff]   ;;  %v4939_v62 = vld [vmem:[#allocation8 + $0x60] sm:$0xff]  }
 0x1cf   :  { %2925 = vmatprep.subr.bf16.mxu0 %v4855_v63  ;;  %3226 = vmatprep.subr.bf16.mxu1 %v4858_v0  ;;  %v4940_v63 = vld [vmem:[#allocation8 + $0xe0] sm:$0xff]  }
 0x1d0   :  { %v4941_v0 = vld [vmem:[#allocation8 + $0x20] sm:$0xff]  }
 0x1d2   :  { %2926 = vmatpush1.bf16.msra.mxu0 %v4853_v1  ;;  %3227 = vmatpush1.bf16.msra.mxu1 %v4856_v2  ;;  %v4942_v1 = vld [vmem:[#allocation8 + $0xa0] sm:$0xff]   ;;  %v4943_v2 = vld [vmem:[#allocation8 + $0x68] sm:$0xff]  }
 0x1d3   :  { %2927 = vmatprep.subr.bf16.mxu0 %v4861_v3  ;;  %3228 = vmatprep.subr.bf16.mxu1 %v4864_v4  ;;  %v4944_v3 = vld [vmem:[#allocation8 + $0xe8] sm:$0xff]  }
 0x1d4   :  { %v4945_v4 = vld [vmem:[#allocation8 + $0x28] sm:$0xff]  }
 0x1d6   :  { %2928 = vmatpush1.bf16.msra.mxu0 %v4859_v5  ;;  %3229 = vmatpush1.bf16.msra.mxu1 %v4862_v6  ;;  %v4946_v5 = vld [vmem:[#allocation8 + $0xa8] sm:$0xff]   ;;  %v4947_v6 = vld [vmem:[#allocation8 + $0x70] sm:$0xff]  }
 0x1d7   :  { %2929 = vmatprep.subr.bf16.mxu0 %v4867_v7  ;;  %3230 = vmatprep.subr.bf16.mxu1 %v4870_v8  ;;  %v4948_v7 = vld [vmem:[#allocation8 + $0xf0] sm:$0xff]  }
 0x1d8   :  { %v4949_v8 = vld [vmem:[#allocation8 + $0x30] sm:$0xff]  }
 0x1da   :  { %2930 = vmatpush1.bf16.msra.mxu0 %v4865_v9  ;;  %3231 = vmatpush1.bf16.msra.mxu1 %v4868_v10  ;;  %v4950_v9 = vld [vmem:[#allocation8 + $0xb0] sm:$0xff]   ;;  %v4951_v10 = vld [vmem:[#allocation8 + $0x78] sm:$0xff]  }
 0x1db   :  { %2942 = vmatprep.subr.bf16.mxu0 %v4876_v11  ;;  %3243 = vmatprep.subr.bf16.mxu1 %v4879_v12  ;;  %v4952_v11 = vld [vmem:[#allocation8 + $0xf8] sm:$0xff]  }
 0x1dc   :  { %v4953_v12 = vld [vmem:[#allocation8 + $0x38] sm:$0xff]  }
 0x1dd   :  { %2932 = vmatmul.mubr.bf16.vlgmr.msra.gmra.mrb[0].mxu0 %v4871_v13  ;;  %3233 = vmatmul.mubr.bf16.vlgmr.msra.gmra.mrb[0].mxu1 %v4871_v13  ;;  %v4954_v13 = vld [vmem:[#allocation8 + $0xb8] sm:$0xff]  }
 0x1de   :  { %2943 = vmatpush1.bf16.msra.mxu0 %v4874_v14  ;;  %3244 = vmatpush1.bf16.msra.mxu1 %v4877_v15  ;;  %v518_v14 = vlaneseq }
 0x1df   :  { %2944 = vmatprep.subr.bf16.mxu0 %v4882_v16  ;;  %3245 = vmatprep.subr.bf16.mxu1 %v4885_v17 }
 0x1e0   :  { %2974 = vmatprep.mubr.bf16.mxu0 %v5114_v22  ;;  %3275 = vmatprep.mubr.bf16.mxu1 %v5114_v22  ;;  %v519_v15 = vshrl.u32 %v518_v14, 7 }
 0x1e2   :  { %2945 = vmatpush1.bf16.msra.mxu0 %v4880_v18  ;;  %3246 = vmatpush1.bf16.msra.mxu1 %v4883_v19  ;;  %v520_v16 = vsub.s32 0, %v519_v15  ;;  %v528_v17 = vsub.s32 2, %v519_v15  ;;  %v516_v18 = vld [vmem:[#allocation7] sm:$0xf]  ;;  %v524_v19 = vsub.s32 1, %v519_v15 }
 0x1e3   :  { %2946 = vmatprep.subr.bf16.mxu0 %v4888_v20  ;;  %3247 = vmatprep.subr.bf16.mxu1 %v4891_v21  ;;  %v532_v20 = vsub.s32 3, %v519_v15 }
 0x1e4   :  { %v521_v21 = vrot.slane %v516_v18, %v520_v16  ;;  %v529_v22 = vrot.slane %v516_v18, %v528_v17 }
 0x1e6   :  { %2947 = vmatpush1.bf16.msra.mxu0 %v4886_v23  ;;  %3248 = vmatpush1.bf16.msra.mxu1 %v4889_v24  ;;  %v525_v23 = vrot.slane %v516_v18, %v524_v19  ;;  %v533_v24 = vrot.slane %v516_v18, %v532_v20  ;;  %v3644_v20 = vand.u32 127, %v518_v14 }
 0x1e7   :  { %2948 = vmatprep.subr.bf16.mxu0 %v4894_v25  ;;  %3249 = vmatprep.subr.bf16.mxu1 %v4897_v26 }
 0x1e8   :  { %vm3645_vm0 = vcmp.ge.s32.totalorder %v3644_v20, 1  ;;  %vm3646_vm1 = vcmp.lt.s32.totalorder %v3644_v20, 7 }
 0x1e9   :  { %vm3647_vm4 = vmand %vm3645_vm0, %vm3646_vm1 }
 0x1ea   :  { %2949 = vmatpush1.bf16.msra.mxu0 %v4892_v27  ;;  %3250 = vmatpush1.bf16.msra.mxu1 %v4895_v28 }
 0x1eb   :  { %2950 = vmatprep.subr.bf16.mxu0 %v4900_v29  ;;  %3251 = vmatprep.subr.bf16.mxu1 %v4903_v30 }
 0x1ee   :  { %2951 = vmatpush1.bf16.msra.mxu0 %v4898_v31  ;;  %3252 = vmatpush1.bf16.msra.mxu1 %v4901_v32 }
 0x1ef   :  { %2952 = vmatprep.subr.bf16.mxu0 %v4906_v33  ;;  %3253 = vmatprep.subr.bf16.mxu1 %v4909_v34 }
 0x1f2   :  { %2953 = vmatpush1.bf16.msra.mxu0 %v4904_v35  ;;  %3254 = vmatpush1.bf16.msra.mxu1 %v4907_v36 }
 0x1f3   :  { %2954 = vmatprep.subr.bf16.mxu0 %v4912_v37  ;;  %3255 = vmatprep.subr.bf16.mxu1 %v4915_v38 }
 0x1f6   :  { %2955 = vmatpush1.bf16.msra.mxu0 %v4910_v39  ;;  %3256 = vmatpush1.bf16.msra.mxu1 %v4913_v40 }
 0x1f7   :  { %2956 = vmatprep.subr.bf16.mxu0 %v4918_v41  ;;  %3257 = vmatprep.subr.bf16.mxu1 %v4921_v42 }
 0x1fa   :  { %2957 = vmatpush1.bf16.msra.mxu0 %v4916_v43  ;;  %3258 = vmatpush1.bf16.msra.mxu1 %v4919_v44 }
 0x1fb   :  { %4165 = vmatprep.subr.bf16.mxu0 %v4923_v45  ;;  %4187 = vmatprep.subr.bf16.mxu1 %v4924_v46 }
 0x1fd   :  { %2975 = vmatmul.mubr.bf16.vlgmr.msra.gmra.mrb[0].mxu0 %v4922_v47  ;;  %3276 = vmatmul.mubr.bf16.vlgmr.msra.gmra.mrb[0].mxu1 %v4922_v47 }
 0x1fe   :  { %4166 = vmatpush3.bf16.msra.mxu0 %v4925_v48  ;;  %4188 = vmatpush3.bf16.msra.mxu1 %v4926_v49 }
 0x1ff   :  { %4167 = vmatprep.subr.bf16.mxu0 %v4927_v50  ;;  %4189 = vmatprep.subr.bf16.mxu1 %v4928_v51 }
 0x202   :  { %4168 = vmatpush3.bf16.msra.mxu0 %v4929_v52  ;;  %4190 = vmatpush3.bf16.msra.mxu1 %v4930_v53 }
 0x203   :  { %4169 = vmatprep.subr.bf16.mxu0 %v4931_v54  ;;  %4191 = vmatprep.subr.bf16.mxu1 %v4932_v55  ;;  %v4132_v55 = vld [vmem:[#allocation10] ss:$0 sm:$0xff] }
 0x206   :  { %4170 = vmatpush3.bf16.msra.mxu0 %v4933_v56  ;;  %4192 = vmatpush3.bf16.msra.mxu1 %v4934_v57 }
 0x207   :  { %4171 = vmatprep.subr.bf16.mxu0 %v4935_v58  ;;  %4193 = vmatprep.subr.bf16.mxu1 %v4936_v59 }
 0x20a   :  { %4172 = vmatpush3.bf16.msra.mxu0 %v4937_v60  ;;  %4194 = vmatpush3.bf16.msra.mxu1 %v4938_v61 }
 0x20b   :  { %4173 = vmatprep.subr.bf16.mxu0 %v4939_v62  ;;  %4195 = vmatprep.subr.bf16.mxu1 %v4940_v63 }
 0x20e   :  { %4174 = vmatpush3.bf16.msra.mxu0 %v4941_v0  ;;  %4196 = vmatpush3.bf16.msra.mxu1 %v4942_v1 }
 0x20f   :  { %4175 = vmatprep.subr.bf16.mxu0 %v4943_v2  ;;  %4197 = vmatprep.subr.bf16.mxu1 %v4944_v3 }
 0x212   :  { %4176 = vmatpush3.bf16.msra.mxu0 %v4945_v4  ;;  %4198 = vmatpush3.bf16.msra.mxu1 %v4946_v5 }
 0x213   :  { %4177 = vmatprep.subr.bf16.mxu0 %v4947_v6  ;;  %4199 = vmatprep.subr.bf16.mxu1 %v4948_v7 }
 0x216   :  { %4178 = vmatpush3.bf16.msra.mxu0 %v4949_v8  ;;  %4200 = vmatpush3.bf16.msra.mxu1 %v4950_v9 }
 0x217   :  { %4179 = vmatprep.subr.bf16.mxu0 %v4951_v10  ;;  %4201 = vmatprep.subr.bf16.mxu1 %v4952_v11 }
 0x21a   :  { %4180 = vmatpush3.bf16.msra.mxu0 %v4953_v12  ;;  %4202 = vmatpush3.bf16.msra.mxu1 %v4954_v13 }
 0x2d0   :  { %v2976_v25 = vpop.f32.mrb[0].mxu0  ;;  %v3277_v26 = vpop.f32.mrb[0].mxu1 }
 0x2d1   :  { %v4209_v27 = vadd.f32 %v2976_v25, %v521_v21  ;;  %v4213_v28 = vadd.f32 %v3277_v26, %v529_v22  ;;  %v2978_v29 = vpop.f32.mrb[1].mxu0  ;;  %v3279_v30 = vpop.f32.mrb[1].mxu1 }
 0x2d2   :  { %v4210_v31 = vadd.f32 %v2978_v29, %v525_v23  ;;  %v4214_v32 = vadd.f32 %v3279_v30, %v533_v24  ;;  %v2980_v33 = vpop.f32.mrb[2].mxu0  ;;  %v3281_v34 = vpop.f32.mrb[2].mxu1 }
 0x2d3   :  { %v4211_v35 = vadd.f32 %v2980_v33, %v521_v21  ;;  %v4215_v36 = vadd.f32 %v3281_v34, %v529_v22  ;;  %v2982_v37 = vpop.f32.mrb[3].mxu0  ;;  %v3283_v38 = vpop.f32.mrb[3].mxu1  ;;  %v3286_v41 = vmax.f32 %v4209_v27, 0.0  ;;  %v3288_v42 = vmax.f32 %v4213_v28, 0.0 }
 0x2d4   :  { %v4212_v39 = vadd.f32 %v2982_v37, %v525_v23  ;;  %v4216_v40 = vadd.f32 %v3283_v38, %v533_v24  ;;  %v3287_v45 = vmax.f32 %v4210_v31, 0.0  ;;  %v3289_v46 = vmax.f32 %v4214_v32, 0.0 }
 0x2d5   :  { %v3290_v43 = vmax.f32 %v4211_v35, 0.0  ;;  %v3292_v44 = vmax.f32 %v4215_v36, 0.0 }
 0x2d6   :  { %v3291_v47 = vmax.f32 %v4212_v39, 0.0  ;;  %v3293_v48 = vmax.f32 %v4216_v40, 0.0 }
 0x2d7   :  { %v3294_v49 = vpack.c.bf16 %v3290_v43, %v3286_v41  ;;  %v3296_v50 = vpack.c.bf16 %v3292_v44, %v3288_v42 }
 0x2d8   :  { %v3295_v51 = vpack.c.bf16 %v3291_v47, %v3287_v45  ;;  %v3297_v52 = vpack.c.bf16 %v3293_v48, %v3289_v46 }
 0x2da   :  { %3593 = vmatprep.mubr.bf16.mxu0 %v3295_v51  ;;  %3634 = vmatprep.mubr.bf16.mxu1 %v3297_v52 }
 0x2db   :  { %3594 = vmatmul.mubr.bf16.vlgmr.msra.gmra.mrb[4].mxu0 %v3294_v49  ;;  %3635 = vmatmul.mubr.bf16.vlgmr.msra.gmra.mrb[4].mxu1 %v3296_v50 }
 0x3ae   :  { %v4181_v53 = vpop.f32.mrb[4].mxu0  ;;  %v4203_v54 = vpop.f32.mrb[4].mxu1 }
 0x3af   :  { %v4182_v56 = vpop.f32.mrb[5].mxu0  ;;  %v4204_v57 = vpop.f32.mrb[5].mxu1 }
 0x3b0   :  { %v4183_v58 = vadd.f32 %v4182_v56, %v4181_v53  ;;  %v4205_v59 = vadd.f32 %v4204_v57, %v4203_v54  ;;  %v4184_v60 = vpop.f32.mrb[6].mxu0  ;;  %v4206_v61 = vpop.f32.mrb[6].mxu1 }
 0x3b1   :  { %v4185_v62 = vpop.f32.mrb[7].mxu0  ;;  %v4207_v63 = vpop.f32.mrb[7].mxu1 }
 0x3b2   :  { %v3596_v0 = vadd.f32 %v4183_v58, %v4132_v55  ;;  %v4186_v1 = vadd.f32 %v4185_v62, %v4184_v60  ;;  %v4208_v2 = vadd.f32 %v4207_v63, %v4206_v61 }
 0x3b4   :  { %v3637_v3 = vadd.f32 %v4205_v59, %v3596_v0  ;;  %v3599_v4 = vadd.f32 %v4186_v1, %v4132_v55 }
 0x3b6   :  { %v3650_v5 = vand.u32 2147483647, %v3637_v3  ;;  %v3640_v6 = vadd.f32 %v4208_v2, %v3599_v4  ;;  %v3648_v28 = vmax.f32 %v3637_v3, 0.0 }
 0x3b8   :  { %v3652_v7 = vsub.f32 0.0, %v3650_v5  ;;  %v3651_v8 = vand.u32 2147483647, %v3640_v6  ;;  %v3649_v33 = vmax.f32 %v3640_v6, 0.0 }
 0x3ba   :  { %v3654_v9 = vmul.f32 1.442695, %v3652_v7  ;;  %v3653_v10 = vsub.f32 0.0, %v3651_v8 }
 0x3bc   :  { %4955 = vpow2.f32 %v3654_v9  ;;  %v3656_v11 = vmul.f32 1.442695, %v3653_v10 }
 0x3be   :  { %4957 = vpow2.f32 %v3656_v11 }
 0x3c6   :  { %v4956_v12 = vpop.eup %4955 }
 0x3c7   :  { %v3658_v13 = vadd.f32 1.0, %v4956_v12  ;;  %v3661_v17 = vmul.f32 -0.5, %v4956_v12  ;;  %v3664_v21 = vand.u32 2147483647, %v4956_v12 }
 0x3c8   :  { %v4958_v15 = vpop.eup %4957 }
 0x3c9   :  { %4959 = vlog2.f32 %v3658_v13  ;;  %v3667_v16 = vadd.f32 1.0, %v4958_v15  ;;  %v3670_v18 = vmul.f32 -0.5, %v4958_v15  ;;  %v3662_v19 = vadd.f32 1.0, %v3661_v17 }
 0x3ca   :  { %v3673_v24 = vand.u32 2147483647, %v4958_v15  ;;  %vm3665_vm2 = vcmp.lt.f32.partialorder %v3664_v21, 0.0004427343 }
 0x3cb   :  { %4961 = vlog2.f32 %v3667_v16  ;;  %v3671_v22 = vadd.f32 1.0, %v3670_v18  ;;  %v3663_v26 = vmul.f32 %v4956_v12, %v3662_v19 }
 0x3cc   :  { %vm3674_vm3 = vcmp.lt.f32.partialorder %v3673_v24, 0.0004427343 }
 0x3cd   :  { %v3672_v31 = vmul.f32 %v4958_v15, %v3671_v22 }
 0x3d3   :  { %v4960_v23 = vpop.eup %4959 }
 0x3d4   :  { %v3660_v25 = vmul.f32 0.6931472, %v4960_v23 }
 0x3d5   :  { %v4962_v27 = vpop.eup %4961 }
 0x3d6   :  { %v3666_v29 = vsel %vm3665_vm2, %v3663_v26, %v3660_v25  ;;  %v3669_v30 = vmul.f32 0.6931472, %v4962_v27 }
 0x3d7   :  { %v3676_v32 = vadd.f32 %v3666_v29, %v3648_v28 }
 0x3d8   :  { %v3675_v34 = vsel %vm3674_vm3, %v3672_v31, %v3669_v30 }
 0x3d9   :  { %v3678_v14 = vadd.f32 1.0, %v3676_v32  ;;  %v3677_v35 = vadd.f32 %v3675_v34, %v3649_v33 }
 0x3db   :  { %v3680_v36 = vsel %vm3647_vm4, %v3678_v14, %v3637_v3  ;;  %v3679_v37 = vadd.f32 1.0, %v3677_v35 }
 0x3dc   :  { %3682 = vst [vmem:[#allocation11] sm:$0xff] %v3680_v36 }
 0x3dd   :  { %v3681_v38 = vsel %vm3647_vm4, %v3679_v37, %v3640_v6 }
 0x3de   :  { %3683 = vst [vmem:[#allocation11 + $0x8] sm:$0xff] %v3681_v38 }
 0x3df   :  { %5084 = shalt.err (!%p5081_p2)
}
 0x3e0   :  { %s5085_s8 = scalar_lea.hbm %s5227_s5, 256 }
 0x3e1   :  { %p5086_p3 = scmp.ne.s32.totalorder %s5227_s5, %s5085_s8  ;;  %p5089_p4 = scmp.lt.u32.totalorder %s5085_s8, %s5227_s5 }
 0x3e3   :  { %p5091_p5 = pnand %p5089_p4, %p5086_p3 }
 0x3e5   :  { %5094 = shalt.err (!%p5091_p5)
}
 0x3e6   :  { %s5116_s13 = smov 128   ;;  %s5117_s14 = smov 8  }
 0x3e7   :  { %3695 = dma.vmem_to_hbm [thread:$0]  %s3690_s3, 256, %s5227_s5, [#allocation4], %s5116_s13, %s5116_s13, %s5117_s14  }
 0x3e8   :  { %5101 = dma.done.wait [#allocation4], 256  }
 0x3e9   :  { %5102 = vsyncadd [#allocation4], 4294967040 }
 0x3ea   :  { %3699 = vsyncpa [#allocation3], 1 }
 0x3eb   :  { %3700 = vsyncpa [#allocation6], 1 }
 0x3ec   :  { %3701 = vsyncpa [#allocation9], 1 }
 0x3ed   :  { %3702 = vsyncpa [#allocation4], 1 }

// kernel: tpu_custom_call.1
= control target key start
LH: loop header
LB: loop body
LE: loop exit
PB: predicated region body
PF: predicated region fallthrough
CT: control target
= control target key end

     0   :  { %10 = vsyncpa [#allocation3], 0  ;;  %s5222_s0 = inlined_call_operand.hbm [shape: bf16[16,1664], index: 0, kind: input, shape index: {}]   ;;  %s5223_s1 = inlined_call_operand.hbm [shape: bf16[1664,512], index: 1, kind: input, shape index: {}]   ;;  %s5224_s2 = inlined_call_operand.hbm [shape: f32[1,512], index: 2, kind: input, shape index: {}]   ;;  %s5225_s3 = inlined_call_operand.hbm [shape: bf16[512,128], index: 3, kind: input, shape index: {}]   ;;  %s5226_s4 = inlined_call_operand.hbm [shape: f32[1,128], index: 4, kind: input, shape index: {}]   ;;  %s5227_s5 = inlined_call_operand.hbm [shape: f32[16,128], index: 5, kind: output, shape index: {}]  }
   0x1   :  { %11 = vsyncpa [#allocation6], 0 }
   0x2   :  { %12 = vsyncpa [#allocation9], 0 }
   0x3   :  { %13 = vsyncpa [#allocation4], 0  ;;  %s5103_s18 = smov [#allocation5]   ;;  %s4963_s22 = scalar_lea.hbm %s5223_s1, 53248 }
   0x4   :  { %s31_s19 = sshll.u32 %s5103_s18, 4  ;;  %p4964_p0 = scmp.ne.s32.totalorder %s5223_s1, %s4963_s22  ;;  %s32_s19 = int_to_ptr.vmem [resolvable:$true] %s31_s19 }
   0x5   :  { %p4967_p1 = scmp.lt.u32.totalorder %s4963_s22, %s5223_s1 }
   0x7   :  { %p4969_p2 = pnand %p4967_p1, %p4964_p0 }
   0x9   :  { %4972 = shalt.err (!%p4969_p2)
}
   0xa   :  { %s4973_s27 = scalar_lea.vmem %s32_s19, 53248  ;;  %p4978_p4 = scmp.lt.s32.totalorder %s32_s19, %s32_s19 }
   0xb   :  { %p4974_p3 = scmp.ne.s32.totalorder %s32_s19, %s4973_s27  ;;  %p4979_p5 = scmp.lt.s32.totalorder %s4973_s27, %s4973_s27 }
   0xd   :  { %p4980_p6 = por %p4979_p5, %p4978_p4 }
   0xf   :  { %p4981_p7 = pnand %p4980_p6, %p4974_p3 }
  0x11   :  { %4984 = shalt.err (!%p4981_p7)
}
  0x12   :  { %s5104_s28 = smov 256   ;;  %s5105_s29 = smov 16  }
  0x13   :  { %37 = dma.hbm_to_vmem [thread:$0]  %s5223_s1, 53248, %s32_s19, [#allocation6], %s5104_s28, %s5104_s28, %s5105_s29  }
  0x14   :  { %s5106_s7 = smov [#allocation8]   ;;  %s4985_s11 = scalar_lea.hbm %s5225_s3, 4096 }
  0x15   :  { %s53_s8 = sshll.u32 %s5106_s7, 4  ;;  %p4986_p8 = scmp.ne.s32.totalorder %s5225_s3, %s4985_s11  ;;  %s54_s8 = int_to_ptr.vmem [resolvable:$true] %s53_s8 }
  0x16   :  { %p4989_p9 = scmp.lt.u32.totalorder %s4985_s11, %s5225_s3 }
  0x18   :  { %p4991_p10 = pnand %p4989_p9, %p4986_p8 }
  0x1a   :  { %4994 = shalt.err (!%p4991_p10)
}
  0x1b   :  { %s4995_s16 = scalar_lea.vmem %s54_s8, 4096  ;;  %p5000_p12 = scmp.lt.s32.totalorder %s54_s8, %s54_s8 }
  0x1c   :  { %p4996_p11 = scmp.ne.s32.totalorder %s54_s8, %s4995_s16  ;;  %p5001_p13 = scmp.lt.s32.totalorder %s4995_s16, %s4995_s16 }
  0x1e   :  { %p5002_p0 = por %p5001_p13, %p5000_p12 }
  0x20   :  { %p5003_p1 = pnand %p5002_p0, %p4996_p11 }
  0x22   :  { %5006 = shalt.err (!%p5003_p1)
}
  0x23   :  { %s5107_s1 = smov 64   ;;  %s5108_s17 = smov 4  }
  0x24   :  { %59 = dma.hbm_to_vmem [thread:$0]  %s5225_s3, 4096, %s54_s8, [#allocation9], %s5107_s1, %s5107_s1, %s5108_s17  }
  0x25   :  { %s5109_s20 = smov [#allocation2]   ;;  %s5007_s24 = scalar_lea.hbm %s5222_s0, 1664 }
  0x26   :  { %s19_s21 = sshll.u32 %s5109_s20, 4  ;;  %p5008_p2 = scmp.ne.s32.totalorder %s5222_s0, %s5007_s24  ;;  %s20_s21 = int_to_ptr.vmem [resolvable:$true] %s19_s21 }
  0x27   :  { %p5011_p3 = scmp.lt.u32.totalorder %s5007_s24, %s5222_s0 }
  0x29   :  { %p5013_p4 = pnand %p5011_p3, %p5008_p2 }
  0x2b   :  { %5016 = shalt.err (!%p5013_p4)
}
  0x2c   :  { %s5017_s29 = scalar_lea.vmem %s20_s21, 1664  ;;  %p5022_p6 = scmp.lt.s32.totalorder %s20_s21, %s20_s21 }
  0x2d   :  { %p5018_p5 = scmp.ne.s32.totalorder %s20_s21, %s5017_s29  ;;  %p5023_p7 = scmp.lt.s32.totalorder %s5017_s29, %s5017_s29 }
  0x2f   :  { %p5024_p8 = por %p5023_p7, %p5022_p6 }
  0x31   :  { %p5025_p9 = pnand %p5024_p8, %p5018_p5 }
  0x33   :  { %5028 = shalt.err (!%p5025_p9)
}
  0x34   :  { %s5110_s3 = smov 832   ;;  %s5111_s30 = smov 52  }
  0x35   :  { %25 = dma.hbm_to_vmem [thread:$0]  %s5222_s0, 1664, %s20_s21, [#allocation3], %s5110_s3, %s5110_s3, %s5111_s30  }
  0x36   :  { %s5112_s8 = smov [#allocation7]   ;;  %s5113_s10 = smov [#allocation10]  }
  0x37   :  { %s44_s9 = sshll.u32 %s5112_s8, 4  ;;  %s66_s11 = sshll.u32 %s5113_s10, 4  ;;  %s45_s9 = int_to_ptr.vmem [resolvable:$true] %s44_s9  ;;  %s67_s11 = int_to_ptr.vmem [resolvable:$true] %s66_s11 }
  0x38   :  { %s5029_s14 = scalar_lea.hbm %s5224_s2, 64 }
  0x39   :  { %p5030_p10 = scmp.ne.s32.totalorder %s5224_s2, %s5029_s14  ;;  %p5033_p11 = scmp.lt.u32.totalorder %s5029_s14, %s5224_s2 }
  0x3b   :  { %p5035_p12 = pnand %p5033_p11, %p5030_p10 }
  0x3d   :  { %5038 = shalt.err (!%p5035_p12)
}
  0x3e   :  { %s5039_s0 = scalar_lea.vmem %s45_s9, 64  ;;  %p5044_p0 = scmp.lt.s32.totalorder %s45_s9, %s45_s9 }
  0x3f   :  { %p5040_p13 = scmp.ne.s32.totalorder %s45_s9, %s5039_s0  ;;  %p5045_p1 = scmp.lt.s32.totalorder %s5039_s0, %s5039_s0 }
  0x41   :  { %p5046_p2 = por %p5045_p1, %p5044_p0 }
  0x43   :  { %p5047_p3 = pnand %p5046_p2, %p5040_p13 }
  0x45   :  { %5050 = shalt.err (!%p5047_p3)
}
  0x46   :  { %47 = dma.hbm_to_vmem [thread:$0]  %s5224_s2, 64, %s45_s9, [#allocation6]  }
  0x47   :  { %s5051_s22 = scalar_lea.hbm %s5226_s4, 16 }
  0x48   :  { %p5052_p4 = scmp.ne.s32.totalorder %s5226_s4, %s5051_s22  ;;  %p5055_p5 = scmp.lt.u32.totalorder %s5051_s22, %s5226_s4 }
  0x4a   :  { %p5057_p6 = pnand %p5055_p5, %p5052_p4 }
  0x4c   :  { %5060 = shalt.err (!%p5057_p6)
}
  0x4d   :  { %s5061_s27 = scalar_lea.vmem %s67_s11, 16  ;;  %s5065_s28 = scalar_lea.vmem %s67_s11, 32 }
  0x4e   :  { %p5062_p7 = scmp.ne.s32.totalorder %s67_s11, %s5061_s27  ;;  %p5066_p8 = scmp.lt.s32.totalorder %s67_s11, %s67_s11 }
  0x4f   :  { %p5067_p9 = scmp.lt.s32.totalorder %s5065_s28, %s5061_s27 }
  0x51   :  { %p5068_p10 = por %p5067_p9, %p5066_p8 }
  0x53   :  { %p5069_p11 = pnand %p5068_p10, %p5062_p7 }
  0x55   :  { %5072 = shalt.err (!%p5069_p11)
}
  0x56   :  { %69 = dma.hbm_to_vmem [thread:$0]  %s5226_s4, 16, %s67_s11, [#allocation9]  }
  0x57   :  { %5095 = dma.done.wait [#allocation3], 1664  }
  0x58   :  { %5096 = vsyncadd [#allocation3], 4294965632 }
  0x59   :  { %5097 = dma.done.wait [#allocation6], 53312  }
  0x5a   :  { %5098 = vsyncadd [#allocation6], 4294913984 }
  0x5b   :  { %5099 = dma.done.wait [#allocation9], 4112  }
  0x5c   :  { %5100 = vsyncadd [#allocation9], 4294963184  ;;  %v4280_v0 = vld [vmem:[#allocation5 + $0x4] ss:$16 sps:$4 sm:$0xff]   ;;  %v4282_v1 = vld [vmem:[#allocation5 + $0xc] ss:$16 sps:$4 sm:$0xff]  }
  0x5d   :  { %2684 = vmatprep.subr.bf16.mxu0 %v4280_v0  ;;  %v4284_v2 = vld [vmem:[#allocation5] ss:$16 sps:$4 sm:$0xff]   ;;  %v4285_v3 = vld [vmem:[#allocation5 + $0x8] ss:$16 sps:$4 sm:$0xff]   ;;  %2985 = vmatprep.subr.bf16.mxu1 %v4282_v1  ;;  %v4286_v4 = vld [vmem:[#allocation5 + $0x24] ss:$16 sps:$4 sm:$0xff]  }
  0x5e   :  { %2685 = vmatpush1.bf16.msra.mxu0 %v4284_v2  ;;  %2986 = vmatpush1.bf16.msra.mxu1 %v4285_v3  ;;  %v4288_v5 = vld [vmem:[#allocation5 + $0x2c] ss:$16 sps:$4 sm:$0xff]   ;;  %v4290_v6 = vld [vmem:[#allocation5 + $0x20] ss:$16 sps:$4 sm:$0xff]   ;;  %v4291_v7 = vld [vmem:[#allocation5 + $0x28] ss:$16 sps:$4 sm:$0xff]  }
  0x5f   :  { %2686 = vmatprep.subr.bf16.mxu0 %v4286_v4  ;;  %2987 = vmatprep.subr.bf16.mxu1 %v4288_v5  ;;  %v4292_v8 = vld [vmem:[#allocation5 + $0x44] ss:$16 sps:$4 sm:$0xff]   ;;  %v4294_v9 = vld [vmem:[#allocation5 + $0x4c] ss:$16 sps:$4 sm:$0xff]   ;;  %v4296_v10 = vld [vmem:[#allocation5 + $0x40] ss:$16 sps:$4 sm:$0xff]  }
  0x60   :  { %v4297_v11 = vld [vmem:[#allocation5 + $0x48] ss:$16 sps:$4 sm:$0xff]   ;;  %v4298_v12 = vld [vmem:[#allocation5 + $0x64] ss:$16 sps:$4 sm:$0xff]   ;;  %v4300_v13 = vld [vmem:[#allocation5 + $0x6c] ss:$16 sps:$4 sm:$0xff]  }
  0x61   :  { %v4302_v14 = vld [vmem:[#allocation5 + $0x60] ss:$16 sps:$4 sm:$0xff]   ;;  %v4303_v15 = vld [vmem:[#allocation5 + $0x68] ss:$16 sps:$4 sm:$0xff]   ;;  %v4304_v16 = vld [vmem:[#allocation5 + $0x84] ss:$16 sps:$4 sm:$0xff]  }
  0x62   :  { %2687 = vmatpush1.bf16.msra.mxu0 %v4290_v6  ;;  %2988 = vmatpush1.bf16.msra.mxu1 %v4291_v7  ;;  %v4306_v17 = vld [vmem:[#allocation5 + $0x8c] ss:$16 sps:$4 sm:$0xff]   ;;  %v4308_v18 = vld [vmem:[#allocation5 + $0x80] ss:$16 sps:$4 sm:$0xff]   ;;  %v4309_v19 = vld [vmem:[#allocation5 + $0x88] ss:$16 sps:$4 sm:$0xff]  }
  0x63   :  { %2688 = vmatprep.subr.bf16.mxu0 %v4292_v8  ;;  %2989 = vmatprep.subr.bf16.mxu1 %v4294_v9  ;;  %v4310_v20 = vld [vmem:[#allocation5 + $0xa4] ss:$16 sps:$4 sm:$0xff]   ;;  %v4312_v21 = vld [vmem:[#allocation5 + $0xac] ss:$16 sps:$4 sm:$0xff]   ;;  %v4314_v22 = vld [vmem:[#allocation5 + $0xa0] ss:$16 sps:$4 sm:$0xff]  }
  0x64   :  { %v4315_v23 = vld [vmem:[#allocation5 + $0xa8] ss:$16 sps:$4 sm:$0xff]   ;;  %v4316_v24 = vld [vmem:[#allocation5 + $0xc4] ss:$16 sps:$4 sm:$0xff]   ;;  %v4318_v25 = vld [vmem:[#allocation5 + $0xcc] ss:$16 sps:$4 sm:$0xff]  }
  0x65   :  { %v4320_v26 = vld [vmem:[#allocation5 + $0xc0] ss:$16 sps:$4 sm:$0xff]   ;;  %v4321_v27 = vld [vmem:[#allocation5 + $0xc8] ss:$16 sps:$4 sm:$0xff]   ;;  %v4322_v28 = vld [vmem:[#allocation5 + $0xe4] ss:$16 sps:$4 sm:$0xff]  }
  0x66   :  { %2689 = vmatpush1.bf16.msra.mxu0 %v4296_v10  ;;  %2990 = vmatpush1.bf16.msra.mxu1 %v4297_v11  ;;  %v4324_v29 = vld [vmem:[#allocation5 + $0xec] ss:$16 sps:$4 sm:$0xff]   ;;  %v4326_v30 = vld [vmem:[#allocation5 + $0xe0] ss:$16 sps:$4 sm:$0xff]   ;;  %v4327_v31 = vld [vmem:[#allocation5 + $0xe8] ss:$16 sps:$4 sm:$0xff]  }
  0x67   :  { %2690 = vmatprep.subr.bf16.mxu0 %v4298_v12  ;;  %2991 = vmatprep.subr.bf16.mxu1 %v4300_v13  ;;  %v4328_v32 = vld [vmem:[#allocation5 + $0x104] ss:$16 sps:$4 sm:$0xff]   ;;  %v4330_v33 = vld [vmem:[#allocation5 + $0x10c] ss:$16 sps:$4 sm:$0xff]   ;;  %v4332_v34 = vld [vmem:[#allocation5 + $0x100] ss:$16 sps:$4 sm:$0xff]  }
  0x68   :  { %v4333_v35 = vld [vmem:[#allocation5 + $0x108] ss:$16 sps:$4 sm:$0xff]   ;;  %v4334_v36 = vld [vmem:[#allocation5 + $0x124] ss:$16 sps:$4 sm:$0xff]   ;;  %v4336_v37 = vld [vmem:[#allocation5 + $0x12c] ss:$16 sps:$4 sm:$0xff]  }
  0x69   :  { %v4338_v38 = vld [vmem:[#allocation5 + $0x120] ss:$16 sps:$4 sm:$0xff]   ;;  %v4339_v39 = vld [vmem:[#allocation5 + $0x128] ss:$16 sps:$4 sm:$0xff]   ;;  %v4340_v40 = vld [vmem:[#allocation5 + $0x144] ss:$16 sps:$4 sm:$0xff]  }
  0x6a   :  { %2691 = vmatpush1.bf16.msra.mxu0 %v4302_v14  ;;  %2992 = vmatpush1.bf16.msra.mxu1 %v4303_v15  ;;  %v4342_v41 = vld [vmem:[#allocation5 + $0x14c] ss:$16 sps:$4 sm:$0xff]   ;;  %v4344_v42 = vld [vmem:[#allocation5 + $0x140] ss:$16 sps:$4 sm:$0xff]   ;;  %v4345_v43 = vld [vmem:[#allocation5 + $0x148] ss:$16 sps:$4 sm:$0xff]  }
  0x6b   :  { %2692 = vmatprep.subr.bf16.mxu0 %v4304_v16  ;;  %2993 = vmatprep.subr.bf16.mxu1 %v4306_v17  ;;  %v4346_v44 = vld [vmem:[#allocation5 + $0x164] ss:$16 sps:$4 sm:$0xff]   ;;  %v4348_v45 = vld [vmem:[#allocation5 + $0x16c] ss:$16 sps:$4 sm:$0xff]   ;;  %v4350_v46 = vld [vmem:[#allocation5 + $0x160] ss:$16 sps:$4 sm:$0xff]  }
  0x6c   :  { %v4351_v47 = vld [vmem:[#allocation5 + $0x168] ss:$16 sps:$4 sm:$0xff]   ;;  %v4378_v48 = vld [vmem:[#allocation2 + $0x4] ss:$52 sps:$4 sm:$0xff]   ;;  %v4352_v49 = vld [vmem:[#allocation5 + $0x184] ss:$16 sps:$4 sm:$0xff]  }
  0x6d   :  { %v4354_v50 = vld [vmem:[#allocation5 + $0x18c] ss:$16 sps:$4 sm:$0xff]   ;;  %2716 = vmatprep.mubr.bf16.mxu0 %v4378_v48  ;;  %3017 = vmatprep.mubr.bf16.mxu1 %v4378_v48  ;;  %v4356_v51 = vld [vmem:[#allocation5 + $0x180] ss:$16 sps:$4 sm:$0xff]   ;;  %v4357_v52 = vld [vmem:[#allocation5 + $0x188] ss:$16 sps:$4 sm:$0xff]  }
  0x6e   :  { %2693 = vmatpush1.bf16.msra.mxu0 %v4308_v18  ;;  %2994 = vmatpush1.bf16.msra.mxu1 %v4309_v19  ;;  %v4358_v53 = vld [vmem:[#allocation5 + $0x1a4] ss:$16 sps:$4 sm:$0xff]   ;;  %v4360_v54 = vld [vmem:[#allocation5 + $0x1ac] ss:$16 sps:$4 sm:$0xff]   ;;  %v4362_v55 = vld [vmem:[#allocation5 + $0x1a0] ss:$16 sps:$4 sm:$0xff]  }
  0x6f   :  { %2694 = vmatprep.subr.bf16.mxu0 %v4310_v20  ;;  %2995 = vmatprep.subr.bf16.mxu1 %v4312_v21  ;;  %v4363_v56 = vld [vmem:[#allocation5 + $0x1a8] ss:$16 sps:$4 sm:$0xff]   ;;  %v4364_v57 = vld [vmem:[#allocation5 + $0x1c4] ss:$16 sps:$4 sm:$0xff]   ;;  %v4366_v58 = vld [vmem:[#allocation5 + $0x1cc] ss:$16 sps:$4 sm:$0xff]  }
  0x70   :  { %v4368_v59 = vld [vmem:[#allocation5 + $0x1c0] ss:$16 sps:$4 sm:$0xff]   ;;  %v4369_v60 = vld [vmem:[#allocation5 + $0x1c8] ss:$16 sps:$4 sm:$0xff]   ;;  %v4370_v61 = vld [vmem:[#allocation5 + $0x1e4] ss:$16 sps:$4 sm:$0xff]  }
  0x71   :  { %v4372_v62 = vld [vmem:[#allocation5 + $0x1ec] ss:$16 sps:$4 sm:$0xff]   ;;  %v4374_v63 = vld [vmem:[#allocation5 + $0x1e0] ss:$16 sps:$4 sm:$0xff]   ;;  %v4375_v0 = vld [vmem:[#allocation5 + $0x1e8] ss:$16 sps:$4 sm:$0xff]  }
  0x72   :  { %2695 = vmatpush1.bf16.msra.mxu0 %v4314_v22  ;;  %2996 = vmatpush1.bf16.msra.mxu1 %v4315_v23  ;;  %v4381_v1 = vld [vmem:[#allocation5 + $0x204] ss:$16 sps:$4 sm:$0xff]   ;;  %v4384_v2 = vld [vmem:[#allocation5 + $0x20c] ss:$16 sps:$4 sm:$0xff]   ;;  %v4379_v4 = vld [vmem:[#allocation5 + $0x200] ss:$16 sps:$4 sm:$0xff]  }
  0x73   :  { %2696 = vmatprep.subr.bf16.mxu0 %v4316_v24  ;;  %2997 = vmatprep.subr.bf16.mxu1 %v4318_v25  ;;  %v4376_v3 = vld [vmem:[#allocation2] ss:$52 sps:$4 sm:$0xff]   ;;  %v4387_v6 = vld [vmem:[#allocation5 + $0x224] ss:$16 sps:$4 sm:$0xff]   ;;  %v4385_v8 = vld [vmem:[#allocation5 + $0x220] ss:$16 sps:$4 sm:$0xff]  }
  0x74   :  { %v4382_v5 = vld [vmem:[#allocation5 + $0x208] ss:$16 sps:$4 sm:$0xff]   ;;  %v4390_v7 = vld [vmem:[#allocation5 + $0x22c] ss:$16 sps:$4 sm:$0xff]   ;;  %v4393_v10 = vld [vmem:[#allocation5 + $0x244] ss:$16 sps:$4 sm:$0xff]  }
  0x75   :  { %v4388_v9 = vld [vmem:[#allocation5 + $0x228] ss:$16 sps:$4 sm:$0xff]   ;;  %v4396_v11 = vld [vmem:[#allocation5 + $0x24c] ss:$16 sps:$4 sm:$0xff]   ;;  %v4391_v12 = vld [vmem:[#allocation5 + $0x240] ss:$16 sps:$4 sm:$0xff]  }
  0x76   :  { %2697 = vmatpush1.bf16.msra.mxu0 %v4320_v26  ;;  %2998 = vmatpush1.bf16.msra.mxu1 %v4321_v27  ;;  %v4394_v13 = vld [vmem:[#allocation5 + $0x248] ss:$16 sps:$4 sm:$0xff]   ;;  %v4399_v14 = vld [vmem:[#allocation5 + $0x264] ss:$16 sps:$4 sm:$0xff]   ;;  %v4402_v15 = vld [vmem:[#allocation5 + $0x26c] ss:$16 sps:$4 sm:$0xff]  }
  0x77   :  { %2698 = vmatprep.subr.bf16.mxu0 %v4322_v28  ;;  %2999 = vmatprep.subr.bf16.mxu1 %v4324_v29  ;;  %v4397_v16 = vld [vmem:[#allocation5 + $0x260] ss:$16 sps:$4 sm:$0xff]   ;;  %v4400_v17 = vld [vmem:[#allocation5 + $0x268] ss:$16 sps:$4 sm:$0xff]   ;;  %v4405_v18 = vld [vmem:[#allocation5 + $0x284] ss:$16 sps:$4 sm:$0xff]  }
  0x78   :  { %v4408_v19 = vld [vmem:[#allocation5 + $0x28c] ss:$16 sps:$4 sm:$0xff]   ;;  %v4403_v20 = vld [vmem:[#allocation5 + $0x280] ss:$16 sps:$4 sm:$0xff]   ;;  %v4406_v21 = vld [vmem:[#allocation5 + $0x288] ss:$16 sps:$4 sm:$0xff]  }
  0x79   :  { %v4411_v22 = vld [vmem:[#allocation5 + $0x2a4] ss:$16 sps:$4 sm:$0xff]   ;;  %v4414_v23 = vld [vmem:[#allocation5 + $0x2ac] ss:$16 sps:$4 sm:$0xff]   ;;  %v4409_v24 = vld [vmem:[#allocation5 + $0x2a0] ss:$16 sps:$4 sm:$0xff]  }
  0x7a   :  { %2699 = vmatpush1.bf16.msra.mxu0 %v4326_v30  ;;  %3000 = vmatpush1.bf16.msra.mxu1 %v4327_v31  ;;  %v4412_v25 = vld [vmem:[#allocation5 + $0x2a8] ss:$16 sps:$4 sm:$0xff]   ;;  %v4417_v26 = vld [vmem:[#allocation5 + $0x2c4] ss:$16 sps:$4 sm:$0xff]   ;;  %v4420_v27 = vld [vmem:[#allocation5 + $0x2cc] ss:$16 sps:$4 sm:$0xff]  }
  0x7b   :  { %2700 = vmatprep.subr.bf16.mxu0 %v4328_v32  ;;  %3001 = vmatprep.subr.bf16.mxu1 %v4330_v33  ;;  %v4415_v28 = vld [vmem:[#allocation5 + $0x2c0] ss:$16 sps:$4 sm:$0xff]   ;;  %v4418_v29 = vld [vmem:[#allocation5 + $0x2c8] ss:$16 sps:$4 sm:$0xff]   ;;  %v4423_v31 = vld [vmem:[#allocation5 + $0x2e4] ss:$16 sps:$4 sm:$0xff]  }
  0x7c   :  { %v4477_v30 = vld [vmem:[#allocation2 + $0xc] ss:$52 sps:$4 sm:$0xff]   ;;  %v4426_v32 = vld [vmem:[#allocation5 + $0x2ec] ss:$16 sps:$4 sm:$0xff]   ;;  %v4421_v33 = vld [vmem:[#allocation5 + $0x2e0] ss:$16 sps:$4 sm:$0xff]  }
  0x7d   :  { %v4450_v48 = vld [vmem:[#allocation5 + $0x36c] ss:$16 sps:$4 sm:$0xff]   ;;  %s5115_s4 = smov [#allocation11]  }
  0x7e   :  { %2701 = vmatpush1.bf16.msra.mxu0 %v4332_v34  ;;  %3002 = vmatpush1.bf16.msra.mxu1 %v4333_v35  ;;  %v4424_v34 = vld [vmem:[#allocation5 + $0x2e8] ss:$16 sps:$4 sm:$0xff]   ;;  %v4429_v35 = vld [vmem:[#allocation5 + $0x304] ss:$16 sps:$4 sm:$0xff]   ;;  %s3689_s3 = sshll.u32 %s5115_s4, 4  ;;  %s3690_s3 = int_to_ptr.vmem [resolvable:$true] %s3689_s3 }
  0x7f   :  { %2702 = vmatprep.subr.bf16.mxu0 %v4334_v36  ;;  %3003 = vmatprep.subr.bf16.mxu1 %v4336_v37  ;;  %v4432_v36 = vld [vmem:[#allocation5 + $0x30c] ss:$16 sps:$4 sm:$0xff]   ;;  %v4427_v37 = vld [vmem:[#allocation5 + $0x300] ss:$16 sps:$4 sm:$0xff]   ;;  %s5073_s30 = scalar_lea.vmem %s3690_s3, 256  ;;  %p5078_p13 = scmp.lt.s32.totalorder %s3690_s3, %s3690_s3 }
  0x80   :  { %p5074_p12 = scmp.ne.s32.totalorder %s3690_s3, %s5073_s30  ;;  %p5079_p0 = scmp.lt.s32.totalorder %s5073_s30, %s5073_s30 }
  0x82   :  { %2703 = vmatpush1.bf16.msra.mxu0 %v4338_v38  ;;  %3004 = vmatpush1.bf16.msra.mxu1 %v4339_v39  ;;  %v4430_v38 = vld [vmem:[#allocation5 + $0x308] ss:$16 sps:$4 sm:$0xff]   ;;  %v4435_v39 = vld [vmem:[#allocation5 + $0x324] ss:$16 sps:$4 sm:$0xff]   ;;  %p5080_p1 = por %p5079_p0, %p5078_p13 }
  0x83   :  { %2704 = vmatprep.subr.bf16.mxu0 %v4340_v40  ;;  %3005 = vmatprep.subr.bf16.mxu1 %v4342_v41  ;;  %v4438_v40 = vld [vmem:[#allocation5 + $0x32c] ss:$16 sps:$4 sm:$0xff]   ;;  %v4433_v41 = vld [vmem:[#allocation5 + $0x320] ss:$16 sps:$4 sm:$0xff]  }
  0x84   :  { %p5081_p2 = pnand %p5080_p1, %p5074_p12 }
  0x86   :  { %2705 = vmatpush1.bf16.msra.mxu0 %v4344_v42  ;;  %3006 = vmatpush1.bf16.msra.mxu1 %v4345_v43  ;;  %v4436_v42 = vld [vmem:[#allocation5 + $0x328] ss:$16 sps:$4 sm:$0xff]   ;;  %v4441_v43 = vld [vmem:[#allocation5 + $0x344] ss:$16 sps:$4 sm:$0xff]  }
  0x87   :  { %2706 = vmatprep.subr.bf16.mxu0 %v4346_v44  ;;  %3007 = vmatprep.subr.bf16.mxu1 %v4348_v45  ;;  %v4444_v44 = vld [vmem:[#allocation5 + $0x34c] ss:$16 sps:$4 sm:$0xff]   ;;  %v4439_v45 = vld [vmem:[#allocation5 + $0x340] ss:$16 sps:$4 sm:$0xff]  }
  0x8a   :  { %2707 = vmatpush1.bf16.msra.mxu0 %v4350_v46  ;;  %3008 = vmatpush1.bf16.msra.mxu1 %v4351_v47  ;;  %v4442_v46 = vld [vmem:[#allocation5 + $0x348] ss:$16 sps:$4 sm:$0xff]   ;;  %v4447_v47 = vld [vmem:[#allocation5 + $0x364] ss:$16 sps:$4 sm:$0xff]  }
  0x8b   :  { %2708 = vmatprep.subr.bf16.mxu0 %v4352_v49  ;;  %3009 = vmatprep.subr.bf16.mxu1 %v4354_v50  ;;  %v4445_v49 = vld [vmem:[#allocation5 + $0x360] ss:$16 sps:$4 sm:$0xff]   ;;  %v4448_v50 = vld [vmem:[#allocation5 + $0x368] ss:$16 sps:$4 sm:$0xff]  }
  0x8e   :  { %2709 = vmatpush1.bf16.msra.mxu0 %v4356_v51  ;;  %3010 = vmatpush1.bf16.msra.mxu1 %v4357_v52  ;;  %v4453_v51 = vld [vmem:[#allocation5 + $0x384] ss:$16 sps:$4 sm:$0xff]   ;;  %v4456_v52 = vld [vmem:[#allocation5 + $0x38c] ss:$16 sps:$4 sm:$0xff]  }
  0x8f   :  { %2710 = vmatprep.subr.bf16.mxu0 %v4358_v53  ;;  %3011 = vmatprep.subr.bf16.mxu1 %v4360_v54  ;;  %v4451_v53 = vld [vmem:[#allocation5 + $0x380] ss:$16 sps:$4 sm:$0xff]   ;;  %v4454_v54 = vld [vmem:[#allocation5 + $0x388] ss:$16 sps:$4 sm:$0xff]  }
  0x92   :  { %2711 = vmatpush1.bf16.msra.mxu0 %v4362_v55  ;;  %3012 = vmatpush1.bf16.msra.mxu1 %v4363_v56  ;;  %v4459_v55 = vld [vmem:[#allocation5 + $0x3a4] ss:$16 sps:$4 sm:$0xff]   ;;  %v4462_v56 = vld [vmem:[#allocation5 + $0x3ac] ss:$16 sps:$4 sm:$0xff]  }
  0x93   :  { %2712 = vmatprep.subr.bf16.mxu0 %v4364_v57  ;;  %3013 = vmatprep.subr.bf16.mxu1 %v4366_v58  ;;  %v4457_v57 = vld [vmem:[#allocation5 + $0x3a0] ss:$16 sps:$4 sm:$0xff]   ;;  %v4460_v58 = vld [vmem:[#allocation5 + $0x3a8] ss:$16 sps:$4 sm:$0xff]  }
  0x96   :  { %2713 = vmatpush1.bf16.msra.mxu0 %v4368_v59  ;;  %3014 = vmatpush1.bf16.msra.mxu1 %v4369_v60  ;;  %v4465_v59 = vld [vmem:[#allocation5 + $0x3c4] ss:$16 sps:$4 sm:$0xff]   ;;  %v4468_v60 = vld [vmem:[#allocation5 + $0x3cc] ss:$16 sps:$4 sm:$0xff]  }
  0x97   :  { %2714 = vmatprep.subr.bf16.mxu0 %v4370_v61  ;;  %3015 = vmatprep.subr.bf16.mxu1 %v4372_v62  ;;  %v4463_v61 = vld [vmem:[#allocation5 + $0x3c0] ss:$16 sps:$4 sm:$0xff]   ;;  %v4466_v62 = vld [vmem:[#allocation5 + $0x3c8] ss:$16 sps:$4 sm:$0xff]  }
  0x9a   :  { %2715 = vmatpush1.bf16.msra.mxu0 %v4374_v63  ;;  %3016 = vmatpush1.bf16.msra.mxu1 %v4375_v0  ;;  %v4471_v63 = vld [vmem:[#allocation5 + $0x3e4] ss:$16 sps:$4 sm:$0xff]   ;;  %v4474_v0 = vld [vmem:[#allocation5 + $0x3ec] ss:$16 sps:$4 sm:$0xff]  }
  0x9b   :  { %2727 = vmatprep.subr.bf16.mxu0 %v4381_v1  ;;  %3028 = vmatprep.subr.bf16.mxu1 %v4384_v2  ;;  %v4469_v1 = vld [vmem:[#allocation5 + $0x3e0] ss:$16 sps:$4 sm:$0xff]   ;;  %v4472_v2 = vld [vmem:[#allocation5 + $0x3e8] ss:$16 sps:$4 sm:$0xff]  }
  0x9d   :  { %2717 = vmatmul.mubr.bf16.vlgmr.msra.gmra.mrb[0].mxu0 %v4376_v3  ;;  %3018 = vmatmul.mubr.bf16.vlgmr.msra.gmra.mrb[0].mxu1 %v4376_v3  ;;  %v4480_v3 = vld [vmem:[#allocation5 + $0x404] ss:$16 sps:$4 sm:$0xff]  }
  0x9e   :  { %2728 = vmatpush1.bf16.msra.mxu0 %v4379_v4  ;;  %3029 = vmatpush1.bf16.msra.mxu1 %v4382_v5  ;;  %v4483_v4 = vld [vmem:[#allocation5 + $0x40c] ss:$16 sps:$4 sm:$0xff]   ;;  %v4475_v5 = vld [vmem:[#allocation2 + $0x8] ss:$52 sps:$4 sm:$0xff]  }
  0x9f   :  { %2729 = vmatprep.subr.bf16.mxu0 %v4387_v6  ;;  %3030 = vmatprep.subr.bf16.mxu1 %v4390_v7  ;;  %v4478_v6 = vld [vmem:[#allocation5 + $0x400] ss:$16 sps:$4 sm:$0xff]   ;;  %v4481_v7 = vld [vmem:[#allocation5 + $0x408] ss:$16 sps:$4 sm:$0xff]  }
  0xa0   :  { %2759 = vmatprep.mubr.bf16.mxu0 %v4477_v30  ;;  %3060 = vmatprep.mubr.bf16.mxu1 %v4477_v30  ;;  %v4519_v30 = vld [vmem:[#allocation5 + $0x4cc] ss:$16 sps:$4 sm:$0xff]  }
  0xa2   :  { %2730 = vmatpush1.bf16.msra.mxu0 %v4385_v8  ;;  %3031 = vmatpush1.bf16.msra.mxu1 %v4388_v9  ;;  %v4486_v8 = vld [vmem:[#allocation5 + $0x424] ss:$16 sps:$4 sm:$0xff]   ;;  %v4489_v9 = vld [vmem:[#allocation5 + $0x42c] ss:$16 sps:$4 sm:$0xff]  }
  0xa3   :  { %2731 = vmatprep.subr.bf16.mxu0 %v4393_v10  ;;  %3032 = vmatprep.subr.bf16.mxu1 %v4396_v11  ;;  %v4484_v10 = vld [vmem:[#allocation5 + $0x420] ss:$16 sps:$4 sm:$0xff]   ;;  %v4487_v11 = vld [vmem:[#allocation5 + $0x428] ss:$16 sps:$4 sm:$0xff]  }
  0xa6   :  { %2732 = vmatpush1.bf16.msra.mxu0 %v4391_v12  ;;  %3033 = vmatpush1.bf16.msra.mxu1 %v4394_v13  ;;  %v4576_v12 = vld [vmem:[#allocation2 + $0x14] ss:$52 sps:$4 sm:$0xff]   ;;  %v4492_v13 = vld [vmem:[#allocation5 + $0x444] ss:$16 sps:$4 sm:$0xff]  }
  0xa7   :  { %2733 = vmatprep.subr.bf16.mxu0 %v4399_v14  ;;  %3034 = vmatprep.subr.bf16.mxu1 %v4402_v15  ;;  %v4495_v14 = vld [vmem:[#allocation5 + $0x44c] ss:$16 sps:$4 sm:$0xff]   ;;  %v4490_v15 = vld [vmem:[#allocation5 + $0x440] ss:$16 sps:$4 sm:$0xff]  }
  0xaa   :  { %2734 = vmatpush1.bf16.msra.mxu0 %v4397_v16  ;;  %3035 = vmatpush1.bf16.msra.mxu1 %v4400_v17  ;;  %v4493_v16 = vld [vmem:[#allocation5 + $0x448] ss:$16 sps:$4 sm:$0xff]   ;;  %v4498_v17 = vld [vmem:[#allocation5 + $0x464] ss:$16 sps:$4 sm:$0xff]  }
  0xab   :  { %2735 = vmatprep.subr.bf16.mxu0 %v4405_v18  ;;  %3036 = vmatprep.subr.bf16.mxu1 %v4408_v19  ;;  %v4501_v18 = vld [vmem:[#allocation5 + $0x46c] ss:$16 sps:$4 sm:$0xff]   ;;  %v4496_v19 = vld [vmem:[#allocation5 + $0x460] ss:$16 sps:$4 sm:$0xff]  }
  0xae   :  { %2736 = vmatpush1.bf16.msra.mxu0 %v4403_v20  ;;  %3037 = vmatpush1.bf16.msra.mxu1 %v4406_v21  ;;  %v4499_v20 = vld [vmem:[#allocation5 + $0x468] ss:$16 sps:$4 sm:$0xff]   ;;  %v4504_v21 = vld [vmem:[#allocation5 + $0x484] ss:$16 sps:$4 sm:$0xff]  }
  0xaf   :  { %2737 = vmatprep.subr.bf16.mxu0 %v4411_v22  ;;  %3038 = vmatprep.subr.bf16.mxu1 %v4414_v23  ;;  %v4507_v22 = vld [vmem:[#allocation5 + $0x48c] ss:$16 sps:$4 sm:$0xff]   ;;  %v4502_v23 = vld [vmem:[#allocation5 + $0x480] ss:$16 sps:$4 sm:$0xff]  }
  0xb2   :  { %2738 = vmatpush1.bf16.msra.mxu0 %v4409_v24  ;;  %3039 = vmatpush1.bf16.msra.mxu1 %v4412_v25  ;;  %v4505_v24 = vld [vmem:[#allocation5 + $0x488] ss:$16 sps:$4 sm:$0xff]   ;;  %v4510_v25 = vld [vmem:[#allocation5 + $0x4a4] ss:$16 sps:$4 sm:$0xff]  }
  0xb3   :  { %2739 = vmatprep.subr.bf16.mxu0 %v4417_v26  ;;  %3040 = vmatprep.subr.bf16.mxu1 %v4420_v27  ;;  %v4513_v26 = vld [vmem:[#allocation5 + $0x4ac] ss:$16 sps:$4 sm:$0xff]   ;;  %v4508_v27 = vld [vmem:[#allocation5 + $0x4a0] ss:$16 sps:$4 sm:$0xff]  }
  0xb6   :  { %2740 = vmatpush1.bf16.msra.mxu0 %v4415_v28  ;;  %3041 = vmatpush1.bf16.msra.mxu1 %v4418_v29  ;;  %v4511_v28 = vld [vmem:[#allocation5 + $0x4a8] ss:$16 sps:$4 sm:$0xff]   ;;  %v4516_v29 = vld [vmem:[#allocation5 + $0x4c4] ss:$16 sps:$4 sm:$0xff]  }
  0xb7   :  { %2741 = vmatprep.subr.bf16.mxu0 %v4423_v31  ;;  %3042 = vmatprep.subr.bf16.mxu1 %v4426_v32  ;;  %v4514_v31 = vld [vmem:[#allocation5 + $0x4c0] ss:$16 sps:$4 sm:$0xff]   ;;  %v4517_v32 = vld [vmem:[#allocation5 + $0x4c8] ss:$16 sps:$4 sm:$0xff]  }
  0xba   :  { %2742 = vmatpush1.bf16.msra.mxu0 %v4421_v33  ;;  %3043 = vmatpush1.bf16.msra.mxu1 %v4424_v34  ;;  %v4522_v33 = vld [vmem:[#allocation5 + $0x4e4] ss:$16 sps:$4 sm:$0xff]   ;;  %v4525_v34 = vld [vmem:[#allocation5 + $0x4ec] ss:$16 sps:$4 sm:$0xff]  }
  0xbb   :  { %2743 = vmatprep.subr.bf16.mxu0 %v4429_v35  ;;  %3044 = vmatprep.subr.bf16.mxu1 %v4432_v36  ;;  %v4520_v35 = vld [vmem:[#allocation5 + $0x4e0] ss:$16 sps:$4 sm:$0xff]   ;;  %v4523_v36 = vld [vmem:[#allocation5 + $0x4e8] ss:$16 sps:$4 sm:$0xff]  }
  0xbe   :  { %2744 = vmatpush1.bf16.msra.mxu0 %v4427_v37  ;;  %3045 = vmatpush1.bf16.msra.mxu1 %v4430_v38  ;;  %v4528_v37 = vld [vmem:[#allocation5 + $0x504] ss:$16 sps:$4 sm:$0xff]   ;;  %v4531_v38 = vld [vmem:[#allocation5 + $0x50c] ss:$16 sps:$4 sm:$0xff]  }
  0xbf   :  { %2745 = vmatprep.subr.bf16.mxu0 %v4435_v39  ;;  %3046 = vmatprep.subr.bf16.mxu1 %v4438_v40  ;;  %v4526_v39 = vld [vmem:[#allocation5 + $0x500] ss:$16 sps:$4 sm:$0xff]   ;;  %v4529_v40 = vld [vmem:[#allocation5 + $0x508] ss:$16 sps:$4 sm:$0xff]  }
  0xc2   :  { %2746 = vmatpush1.bf16.msra.mxu0 %v4433_v41  ;;  %3047 = vmatpush1.bf16.msra.mxu1 %v4436_v42  ;;  %v4534_v41 = vld [vmem:[#allocation5 + $0x524] ss:$16 sps:$4 sm:$0xff]   ;;  %v4537_v42 = vld [vmem:[#allocation5 + $0x52c] ss:$16 sps:$4 sm:$0xff]  }
  0xc3   :  { %2747 = vmatprep.subr.bf16.mxu0 %v4441_v43  ;;  %3048 = vmatprep.subr.bf16.mxu1 %v4444_v44  ;;  %v4532_v43 = vld [vmem:[#allocation5 + $0x520] ss:$16 sps:$4 sm:$0xff]   ;;  %v4535_v44 = vld [vmem:[#allocation5 + $0x528] ss:$16 sps:$4 sm:$0xff]  }
  0xc6   :  { %2748 = vmatpush1.bf16.msra.mxu0 %v4439_v45  ;;  %3049 = vmatpush1.bf16.msra.mxu1 %v4442_v46  ;;  %v4540_v45 = vld [vmem:[#allocation5 + $0x544] ss:$16 sps:$4 sm:$0xff]   ;;  %v4543_v46 = vld [vmem:[#allocation5 + $0x54c] ss:$16 sps:$4 sm:$0xff]  }
  0xc7   :  { %2749 = vmatprep.subr.bf16.mxu0 %v4447_v47  ;;  %3050 = vmatprep.subr.bf16.mxu1 %v4450_v48  ;;  %v4538_v47 = vld [vmem:[#allocation5 + $0x540] ss:$16 sps:$4 sm:$0xff]   ;;  %v4541_v48 = vld [vmem:[#allocation5 + $0x548] ss:$16 sps:$4 sm:$0xff]  }
  0xca   :  { %2750 = vmatpush1.bf16.msra.mxu0 %v4445_v49  ;;  %3051 = vmatpush1.bf16.msra.mxu1 %v4448_v50  ;;  %v4546_v49 = vld [vmem:[#allocation5 + $0x564] ss:$16 sps:$4 sm:$0xff]   ;;  %v4549_v50 = vld [vmem:[#allocation5 + $0x56c] ss:$16 sps:$4 sm:$0xff]  }
  0xcb   :  { %2751 = vmatprep.subr.bf16.mxu0 %v4453_v51  ;;  %3052 = vmatprep.subr.bf16.mxu1 %v4456_v52  ;;  %v4544_v51 = vld [vmem:[#allocation5 + $0x560] ss:$16 sps:$4 sm:$0xff]   ;;  %v4547_v52 = vld [vmem:[#allocation5 + $0x568] ss:$16 sps:$4 sm:$0xff]  }
  0xce   :  { %2752 = vmatpush1.bf16.msra.mxu0 %v4451_v53  ;;  %3053 = vmatpush1.bf16.msra.mxu1 %v4454_v54  ;;  %v4552_v53 = vld [vmem:[#allocation5 + $0x584] ss:$16 sps:$4 sm:$0xff]   ;;  %v4555_v54 = vld [vmem:[#allocation5 + $0x58c] ss:$16 sps:$4 sm:$0xff]  }
  0xcf   :  { %2753 = vmatprep.subr.bf16.mxu0 %v4459_v55  ;;  %3054 = vmatprep.subr.bf16.mxu1 %v4462_v56  ;;  %v4550_v55 = vld [vmem:[#allocation5 + $0x580] ss:$16 sps:$4 sm:$0xff]   ;;  %v4553_v56 = vld [vmem:[#allocation5 + $0x588] ss:$16 sps:$4 sm:$0xff]  }
  0xd2   :  { %2754 = vmatpush1.bf16.msra.mxu0 %v4457_v57  ;;  %3055 = vmatpush1.bf16.msra.mxu1 %v4460_v58  ;;  %v4558_v57 = vld [vmem:[#allocation5 + $0x5a4] ss:$16 sps:$4 sm:$0xff]   ;;  %v4561_v58 = vld [vmem:[#allocation5 + $0x5ac] ss:$16 sps:$4 sm:$0xff]  }
  0xd3   :  { %2755 = vmatprep.subr.bf16.mxu0 %v4465_v59  ;;  %3056 = vmatprep.subr.bf16.mxu1 %v4468_v60  ;;  %v4556_v59 = vld [vmem:[#allocation5 + $0x5a0] ss:$16 sps:$4 sm:$0xff]   ;;  %v4559_v60 = vld [vmem:[#allocation5 + $0x5a8] ss:$16 sps:$4 sm:$0xff]  }
  0xd6   :  { %2756 = vmatpush1.bf16.msra.mxu0 %v4463_v61  ;;  %3057 = vmatpush1.bf16.msra.mxu1 %v4466_v62  ;;  %v4564_v61 = vld [vmem:[#allocation5 + $0x5c4] ss:$16 sps:$4 sm:$0xff]   ;;  %v4567_v62 = vld [vmem:[#allocation5 + $0x5cc] ss:$16 sps:$4 sm:$0xff]  }
  0xd7   :  { %2757 = vmatprep.subr.bf16.mxu0 %v4471_v63  ;;  %3058 = vmatprep.subr.bf16.mxu1 %v4474_v0  ;;  %v4562_v63 = vld [vmem:[#allocation5 + $0x5c0] ss:$16 sps:$4 sm:$0xff]   ;;  %v4565_v0 = vld [vmem:[#allocation5 + $0x5c8] ss:$16 sps:$4 sm:$0xff]  }
  0xda   :  { %2758 = vmatpush1.bf16.msra.mxu0 %v4469_v1  ;;  %3059 = vmatpush1.bf16.msra.mxu1 %v4472_v2  ;;  %v4570_v1 = vld [vmem:[#allocation5 + $0x5e4] ss:$16 sps:$4 sm:$0xff]   ;;  %v4573_v2 = vld [vmem:[#allocation5 + $0x5ec] ss:$16 sps:$4 sm:$0xff]  }
  0xdb   :  { %2770 = vmatprep.subr.bf16.mxu0 %v4480_v3  ;;  %3071 = vmatprep.subr.bf16.mxu1 %v4483_v4  ;;  %v4568_v3 = vld [vmem:[#allocation5 + $0x5e0] ss:$16 sps:$4 sm:$0xff]   ;;  %v4571_v4 = vld [vmem:[#allocation5 + $0x5e8] ss:$16 sps:$4 sm:$0xff]  }
  0xdd   :  { %2760 = vmatmul.mubr.bf16.vlgmr.msra.gmra.mrb[0].mxu0 %v4475_v5  ;;  %3061 = vmatmul.mubr.bf16.vlgmr.msra.gmra.mrb[0].mxu1 %v4475_v5  ;;  %v4579_v5 = vld [vmem:[#allocation5 + $0x604] ss:$16 sps:$4 sm:$0xff]  }
  0xde   :  { %2771 = vmatpush1.bf16.msra.mxu0 %v4478_v6  ;;  %3072 = vmatpush1.bf16.msra.mxu1 %v4481_v7  ;;  %v4582_v6 = vld [vmem:[#allocation5 + $0x60c] ss:$16 sps:$4 sm:$0xff]  }
  0xdf   :  { %2772 = vmatprep.subr.bf16.mxu0 %v4486_v8  ;;  %3073 = vmatprep.subr.bf16.mxu1 %v4489_v9  ;;  %v4574_v7 = vld [vmem:[#allocation2 + $0x10] ss:$52 sps:$4 sm:$0xff]   ;;  %v4577_v8 = vld [vmem:[#allocation5 + $0x600] ss:$16 sps:$4 sm:$0xff]  }
  0xe0   :  { %2802 = vmatprep.mubr.bf16.mxu0 %v4576_v12  ;;  %3103 = vmatprep.mubr.bf16.mxu1 %v4576_v12  ;;  %v4580_v9 = vld [vmem:[#allocation5 + $0x608] ss:$16 sps:$4 sm:$0xff]  }
  0xe1   :  { %v4675_v12 = vld [vmem:[#allocation2 + $0x1c] ss:$52 sps:$4 sm:$0xff]  }
  0xe2   :  { %2773 = vmatpush1.bf16.msra.mxu0 %v4484_v10  ;;  %3074 = vmatpush1.bf16.msra.mxu1 %v4487_v11  ;;  %v4585_v10 = vld [vmem:[#allocation5 + $0x624] ss:$16 sps:$4 sm:$0xff]   ;;  %v4588_v11 = vld [vmem:[#allocation5 + $0x62c] ss:$16 sps:$4 sm:$0xff]  }
  0xe3   :  { %2774 = vmatprep.subr.bf16.mxu0 %v4492_v13  ;;  %3075 = vmatprep.subr.bf16.mxu1 %v4495_v14  ;;  %v4583_v13 = vld [vmem:[#allocation5 + $0x620] ss:$16 sps:$4 sm:$0xff]   ;;  %v4586_v14 = vld [vmem:[#allocation5 + $0x628] ss:$16 sps:$4 sm:$0xff]  }
  0xe6   :  { %2775 = vmatpush1.bf16.msra.mxu0 %v4490_v15  ;;  %3076 = vmatpush1.bf16.msra.mxu1 %v4493_v16  ;;  %v4591_v15 = vld [vmem:[#allocation5 + $0x644] ss:$16 sps:$4 sm:$0xff]   ;;  %v4594_v16 = vld [vmem:[#allocation5 + $0x64c] ss:$16 sps:$4 sm:$0xff]  }
  0xe7   :  { %2776 = vmatprep.subr.bf16.mxu0 %v4498_v17  ;;  %3077 = vmatprep.subr.bf16.mxu1 %v4501_v18  ;;  %v4589_v17 = vld [vmem:[#allocation5 + $0x640] ss:$16 sps:$4 sm:$0xff]   ;;  %v4592_v18 = vld [vmem:[#allocation5 + $0x648] ss:$16 sps:$4 sm:$0xff]  }
  0xea   :  { %2777 = vmatpush1.bf16.msra.mxu0 %v4496_v19  ;;  %3078 = vmatpush1.bf16.msra.mxu1 %v4499_v20  ;;  %v4597_v19 = vld [vmem:[#allocation5 + $0x664] ss:$16 sps:$4 sm:$0xff]   ;;  %v4600_v20 = vld [vmem:[#allocation5 + $0x66c] ss:$16 sps:$4 sm:$0xff]  }
  0xeb   :  { %2778 = vmatprep.subr.bf16.mxu0 %v4504_v21  ;;  %3079 = vmatprep.subr.bf16.mxu1 %v4507_v22  ;;  %v4595_v21 = vld [vmem:[#allocation5 + $0x660] ss:$16 sps:$4 sm:$0xff]   ;;  %v4598_v22 = vld [vmem:[#allocation5 + $0x668] ss:$16 sps:$4 sm:$0xff]  }
  0xee   :  { %2779 = vmatpush1.bf16.msra.mxu0 %v4502_v23  ;;  %3080 = vmatpush1.bf16.msra.mxu1 %v4505_v24  ;;  %v4603_v23 = vld [vmem:[#allocation5 + $0x684] ss:$16 sps:$4 sm:$0xff]   ;;  %v4606_v24 = vld [vmem:[#allocation5 + $0x68c] ss:$16 sps:$4 sm:$0xff]  }
  0xef   :  { %2780 = vmatprep.subr.bf16.mxu0 %v4510_v25  ;;  %3081 = vmatprep.subr.bf16.mxu1 %v4513_v26  ;;  %v4601_v25 = vld [vmem:[#allocation5 + $0x680] ss:$16 sps:$4 sm:$0xff]   ;;  %v4604_v26 = vld [vmem:[#allocation5 + $0x688] ss:$16 sps:$4 sm:$0xff]  }
  0xf2   :  { %2781 = vmatpush1.bf16.msra.mxu0 %v4508_v27  ;;  %3082 = vmatpush1.bf16.msra.mxu1 %v4511_v28  ;;  %v4609_v27 = vld [vmem:[#allocation5 + $0x6a4] ss:$16 sps:$4 sm:$0xff]   ;;  %v4612_v28 = vld [vmem:[#allocation5 + $0x6ac] ss:$16 sps:$4 sm:$0xff]  }
  0xf3   :  { %2782 = vmatprep.subr.bf16.mxu0 %v4516_v29  ;;  %3083 = vmatprep.subr.bf16.mxu1 %v4519_v30  ;;  %v4607_v29 = vld [vmem:[#allocation5 + $0x6a0] ss:$16 sps:$4 sm:$0xff]   ;;  %v4610_v30 = vld [vmem:[#allocation5 + $0x6a8] ss:$16 sps:$4 sm:$0xff]  }
  0xf6   :  { %2783 = vmatpush1.bf16.msra.mxu0 %v4514_v31  ;;  %3084 = vmatpush1.bf16.msra.mxu1 %v4517_v32  ;;  %v4615_v31 = vld [vmem:[#allocation5 + $0x6c4] ss:$16 sps:$4 sm:$0xff]   ;;  %v4618_v32 = vld [vmem:[#allocation5 + $0x6cc] ss:$16 sps:$4 sm:$0xff]  }
  0xf7   :  { %2784 = vmatprep.subr.bf16.mxu0 %v4522_v33  ;;  %3085 = vmatprep.subr.bf16.mxu1 %v4525_v34  ;;  %v4613_v33 = vld [vmem:[#allocation5 + $0x6c0] ss:$16 sps:$4 sm:$0xff]   ;;  %v4616_v34 = vld [vmem:[#allocation5 + $0x6c8] ss:$16 sps:$4 sm:$0xff]  }
  0xfa   :  { %2785 = vmatpush1.bf16.msra.mxu0 %v4520_v35  ;;  %3086 = vmatpush1.bf16.msra.mxu1 %v4523_v36  ;;  %v4621_v35 = vld [vmem:[#allocation5 + $0x6e4] ss:$16 sps:$4 sm:$0xff]   ;;  %v4624_v36 = vld [vmem:[#allocation5 + $0x6ec] ss:$16 sps:$4 sm:$0xff]  }
  0xfb   :  { %2786 = vmatprep.subr.bf16.mxu0 %v4528_v37  ;;  %3087 = vmatprep.subr.bf16.mxu1 %v4531_v38  ;;  %v4619_v37 = vld [vmem:[#allocation5 + $0x6e0] ss:$16 sps:$4 sm:$0xff]   ;;  %v4622_v38 = vld [vmem:[#allocation5 + $0x6e8] ss:$16 sps:$4 sm:$0xff]  }
  0xfe   :  { %2787 = vmatpush1.bf16.msra.mxu0 %v4526_v39  ;;  %3088 = vmatpush1.bf16.msra.mxu1 %v4529_v40  ;;  %v4627_v39 = vld [vmem:[#allocation5 + $0x704] ss:$16 sps:$4 sm:$0xff]   ;;  %v4630_v40 = vld [vmem:[#allocation5 + $0x70c] ss:$16 sps:$4 sm:$0xff]  }
  0xff   :  { %2788 = vmatprep.subr.bf16.mxu0 %v4534_v41  ;;  %3089 = vmatprep.subr.bf16.mxu1 %v4537_v42  ;;  %v4625_v41 = vld [vmem:[#allocation5 + $0x700] ss:$16 sps:$4 sm:$0xff]   ;;  %v4628_v42 = vld [vmem:[#allocation5 + $0x708] ss:$16 sps:$4 sm:$0xff]  }
 0x102   :  { %2789 = vmatpush1.bf16.msra.mxu0 %v4532_v43  ;;  %3090 = vmatpush1.bf16.msra.mxu1 %v4535_v44  ;;  %v4633_v43 = vld [vmem:[#allocation5 + $0x724] ss:$16 sps:$4 sm:$0xff]   ;;  %v4636_v44 = vld [vmem:[#allocation5 + $0x72c] ss:$16 sps:$4 sm:$0xff]  }
 0x103   :  { %2790 = vmatprep.subr.bf16.mxu0 %v4540_v45  ;;  %3091 = vmatprep.subr.bf16.mxu1 %v4543_v46  ;;  %v4631_v45 = vld [vmem:[#allocation5 + $0x720] ss:$16 sps:$4 sm:$0xff]   ;;  %v4634_v46 = vld [vmem:[#allocation5 + $0x728] ss:$16 sps:$4 sm:$0xff]  }
 0x106   :  { %2791 = vmatpush1.bf16.msra.mxu0 %v4538_v47  ;;  %3092 = vmatpush1.bf16.msra.mxu1 %v4541_v48  ;;  %v4639_v47 = vld [vmem:[#allocation5 + $0x744] ss:$16 sps:$4 sm:$0xff]   ;;  %v4642_v48 = vld [vmem:[#allocation5 + $0x74c] ss:$16 sps:$4 sm:$0xff]  }
 0x107   :  { %2792 = vmatprep.subr.bf16.mxu0 %v4546_v49  ;;  %3093 = vmatprep.subr.bf16.mxu1 %v4549_v50  ;;  %v4637_v49 = vld [vmem:[#allocation5 + $0x740] ss:$16 sps:$4 sm:$0xff]   ;;  %v4640_v50 = vld [vmem:[#allocation5 + $0x748] ss:$16 sps:$4 sm:$0xff]  }
 0x10a   :  { %2793 = vmatpush1.bf16.msra.mxu0 %v4544_v51  ;;  %3094 = vmatpush1.bf16.msra.mxu1 %v4547_v52  ;;  %v4645_v51 = vld [vmem:[#allocation5 + $0x764] ss:$16 sps:$4 sm:$0xff]   ;;  %v4648_v52 = vld [vmem:[#allocation5 + $0x76c] ss:$16 sps:$4 sm:$0xff]  }
 0x10b   :  { %2794 = vmatprep.subr.bf16.mxu0 %v4552_v53  ;;  %3095 = vmatprep.subr.bf16.mxu1 %v4555_v54  ;;  %v4643_v53 = vld [vmem:[#allocation5 + $0x760] ss:$16 sps:$4 sm:$0xff]   ;;  %v4646_v54 = vld [vmem:[#allocation5 + $0x768] ss:$16 sps:$4 sm:$0xff]  }
 0x10e   :  { %2795 = vmatpush1.bf16.msra.mxu0 %v4550_v55  ;;  %3096 = vmatpush1.bf16.msra.mxu1 %v4553_v56  ;;  %v4651_v55 = vld [vmem:[#allocation5 + $0x784] ss:$16 sps:$4 sm:$0xff]   ;;  %v4654_v56 = vld [vmem:[#allocation5 + $0x78c] ss:$16 sps:$4 sm:$0xff]  }
 0x10f   :  { %2796 = vmatprep.subr.bf16.mxu0 %v4558_v57  ;;  %3097 = vmatprep.subr.bf16.mxu1 %v4561_v58  ;;  %v4649_v57 = vld [vmem:[#allocation5 + $0x780] ss:$16 sps:$4 sm:$0xff]   ;;  %v4652_v58 = vld [vmem:[#allocation5 + $0x788] ss:$16 sps:$4 sm:$0xff]  }
 0x112   :  { %2797 = vmatpush1.bf16.msra.mxu0 %v4556_v59  ;;  %3098 = vmatpush1.bf16.msra.mxu1 %v4559_v60  ;;  %v4657_v59 = vld [vmem:[#allocation5 + $0x7a4] ss:$16 sps:$4 sm:$0xff]   ;;  %v4660_v60 = vld [vmem:[#allocation5 + $0x7ac] ss:$16 sps:$4 sm:$0xff]  }
 0x113   :  { %2798 = vmatprep.subr.bf16.mxu0 %v4564_v61  ;;  %3099 = vmatprep.subr.bf16.mxu1 %v4567_v62  ;;  %v4655_v61 = vld [vmem:[#allocation5 + $0x7a0] ss:$16 sps:$4 sm:$0xff]   ;;  %v4658_v62 = vld [vmem:[#allocation5 + $0x7a8] ss:$16 sps:$4 sm:$0xff]  }
 0x116   :  { %2799 = vmatpush1.bf16.msra.mxu0 %v4562_v63  ;;  %3100 = vmatpush1.bf16.msra.mxu1 %v4565_v0  ;;  %v4663_v63 = vld [vmem:[#allocation5 + $0x7c4] ss:$16 sps:$4 sm:$0xff]   ;;  %v4666_v0 = vld [vmem:[#allocation5 + $0x7cc] ss:$16 sps:$4 sm:$0xff]  }
 0x117   :  { %2800 = vmatprep.subr.bf16.mxu0 %v4570_v1  ;;  %3101 = vmatprep.subr.bf16.mxu1 %v4573_v2  ;;  %v4661_v1 = vld [vmem:[#allocation5 + $0x7c0] ss:$16 sps:$4 sm:$0xff]   ;;  %v4664_v2 = vld [vmem:[#allocation5 + $0x7c8] ss:$16 sps:$4 sm:$0xff]  }
 0x11a   :  { %2801 = vmatpush1.bf16.msra.mxu0 %v4568_v3  ;;  %3102 = vmatpush1.bf16.msra.mxu1 %v4571_v4  ;;  %v4669_v3 = vld [vmem:[#allocation5 + $0x7e4] ss:$16 sps:$4 sm:$0xff]   ;;  %v4672_v4 = vld [vmem:[#allocation5 + $0x7ec] ss:$16 sps:$4 sm:$0xff]  }
 0x11b   :  { %2813 = vmatprep.subr.bf16.mxu0 %v4579_v5  ;;  %3114 = vmatprep.subr.bf16.mxu1 %v4582_v6  ;;  %v4667_v5 = vld [vmem:[#allocation5 + $0x7e0] ss:$16 sps:$4 sm:$0xff]   ;;  %v4670_v6 = vld [vmem:[#allocation5 + $0x7e8] ss:$16 sps:$4 sm:$0xff]  }
 0x11d   :  { %2803 = vmatmul.mubr.bf16.vlgmr.msra.gmra.mrb[0].mxu0 %v4574_v7  ;;  %3104 = vmatmul.mubr.bf16.vlgmr.msra.gmra.mrb[0].mxu1 %v4574_v7  ;;  %v4678_v7 = vld [vmem:[#allocation5 + $0x804] ss:$16 sps:$4 sm:$0xff]  }
 0x11e   :  { %2814 = vmatpush1.bf16.msra.mxu0 %v4577_v8  ;;  %3115 = vmatpush1.bf16.msra.mxu1 %v4580_v9  ;;  %v4681_v8 = vld [vmem:[#allocation5 + $0x80c] ss:$16 sps:$4 sm:$0xff]   ;;  %v4673_v9 = vld [vmem:[#allocation2 + $0x18] ss:$52 sps:$4 sm:$0xff]  }
 0x11f   :  { %2815 = vmatprep.subr.bf16.mxu0 %v4585_v10  ;;  %3116 = vmatprep.subr.bf16.mxu1 %v4588_v11  ;;  %v4676_v10 = vld [vmem:[#allocation5 + $0x800] ss:$16 sps:$4 sm:$0xff]   ;;  %v4679_v11 = vld [vmem:[#allocation5 + $0x808] ss:$16 sps:$4 sm:$0xff]  }
 0x120   :  { %2845 = vmatprep.mubr.bf16.mxu0 %v4675_v12  ;;  %3146 = vmatprep.mubr.bf16.mxu1 %v4675_v12  ;;  %v4684_v12 = vld [vmem:[#allocation5 + $0x824] ss:$16 sps:$4 sm:$0xff]  }
 0x122   :  { %2816 = vmatpush1.bf16.msra.mxu0 %v4583_v13  ;;  %3117 = vmatpush1.bf16.msra.mxu1 %v4586_v14  ;;  %v4687_v13 = vld [vmem:[#allocation5 + $0x82c] ss:$16 sps:$4 sm:$0xff]  }
 0x123   :  { %2817 = vmatprep.subr.bf16.mxu0 %v4591_v15  ;;  %3118 = vmatprep.subr.bf16.mxu1 %v4594_v16  ;;  %v4774_v14 = vld [vmem:[#allocation2 + $0x24] ss:$52 sps:$4 sm:$0xff]   ;;  %v4685_v16 = vld [vmem:[#allocation5 + $0x828] ss:$16 sps:$4 sm:$0xff]  }
 0x124   :  { %v4682_v15 = vld [vmem:[#allocation5 + $0x820] ss:$16 sps:$4 sm:$0xff]  }
 0x126   :  { %2818 = vmatpush1.bf16.msra.mxu0 %v4589_v17  ;;  %3119 = vmatpush1.bf16.msra.mxu1 %v4592_v18  ;;  %v4690_v17 = vld [vmem:[#allocation5 + $0x844] ss:$16 sps:$4 sm:$0xff]   ;;  %v4693_v18 = vld [vmem:[#allocation5 + $0x84c] ss:$16 sps:$4 sm:$0xff]  }
 0x127   :  { %2819 = vmatprep.subr.bf16.mxu0 %v4597_v19  ;;  %3120 = vmatprep.subr.bf16.mxu1 %v4600_v20  ;;  %v4688_v19 = vld [vmem:[#allocation5 + $0x840] ss:$16 sps:$4 sm:$0xff]   ;;  %v4691_v20 = vld [vmem:[#allocation5 + $0x848] ss:$16 sps:$4 sm:$0xff]  }
 0x12a   :  { %2820 = vmatpush1.bf16.msra.mxu0 %v4595_v21  ;;  %3121 = vmatpush1.bf16.msra.mxu1 %v4598_v22  ;;  %v4696_v21 = vld [vmem:[#allocation5 + $0x864] ss:$16 sps:$4 sm:$0xff]   ;;  %v4699_v22 = vld [vmem:[#allocation5 + $0x86c] ss:$16 sps:$4 sm:$0xff]  }
 0x12b   :  { %2821 = vmatprep.subr.bf16.mxu0 %v4603_v23  ;;  %3122 = vmatprep.subr.bf16.mxu1 %v4606_v24  ;;  %v4694_v23 = vld [vmem:[#allocation5 + $0x860] ss:$16 sps:$4 sm:$0xff]   ;;  %v4697_v24 = vld [vmem:[#allocation5 + $0x868] ss:$16 sps:$4 sm:$0xff]  }
 0x12e   :  { %2822 = vmatpush1.bf16.msra.mxu0 %v4601_v25  ;;  %3123 = vmatpush1.bf16.msra.mxu1 %v4604_v26  ;;  %v4702_v25 = vld [vmem:[#allocation5 + $0x884] ss:$16 sps:$4 sm:$0xff]   ;;  %v4705_v26 = vld [vmem:[#allocation5 + $0x88c] ss:$16 sps:$4 sm:$0xff]  }
 0x12f   :  { %2823 = vmatprep.subr.bf16.mxu0 %v4609_v27  ;;  %3124 = vmatprep.subr.bf16.mxu1 %v4612_v28  ;;  %v4700_v27 = vld [vmem:[#allocation5 + $0x880] ss:$16 sps:$4 sm:$0xff]   ;;  %v4703_v28 = vld [vmem:[#allocation5 + $0x888] ss:$16 sps:$4 sm:$0xff]  }
 0x132   :  { %2824 = vmatpush1.bf16.msra.mxu0 %v4607_v29  ;;  %3125 = vmatpush1.bf16.msra.mxu1 %v4610_v30  ;;  %v4708_v29 = vld [vmem:[#allocation5 + $0x8a4] ss:$16 sps:$4 sm:$0xff]   ;;  %v4711_v30 = vld [vmem:[#allocation5 + $0x8ac] ss:$16 sps:$4 sm:$0xff]  }
 0x133   :  { %2825 = vmatprep.subr.bf16.mxu0 %v4615_v31  ;;  %3126 = vmatprep.subr.bf16.mxu1 %v4618_v32  ;;  %v4706_v31 = vld [vmem:[#allocation5 + $0x8a0] ss:$16 sps:$4 sm:$0xff]   ;;  %v4709_v32 = vld [vmem:[#allocation5 + $0x8a8] ss:$16 sps:$4 sm:$0xff]  }
 0x136   :  { %2826 = vmatpush1.bf16.msra.mxu0 %v4613_v33  ;;  %3127 = vmatpush1.bf16.msra.mxu1 %v4616_v34  ;;  %v4714_v33 = vld [vmem:[#allocation5 + $0x8c4] ss:$16 sps:$4 sm:$0xff]   ;;  %v4717_v34 = vld [vmem:[#allocation5 + $0x8cc] ss:$16 sps:$4 sm:$0xff]  }
 0x137   :  { %2827 = vmatprep.subr.bf16.mxu0 %v4621_v35  ;;  %3128 = vmatprep.subr.bf16.mxu1 %v4624_v36  ;;  %v4712_v35 = vld [vmem:[#allocation5 + $0x8c0] ss:$16 sps:$4 sm:$0xff]   ;;  %v4715_v36 = vld [vmem:[#allocation5 + $0x8c8] ss:$16 sps:$4 sm:$0xff]  }
 0x13a   :  { %2828 = vmatpush1.bf16.msra.mxu0 %v4619_v37  ;;  %3129 = vmatpush1.bf16.msra.mxu1 %v4622_v38  ;;  %v4720_v37 = vld [vmem:[#allocation5 + $0x8e4] ss:$16 sps:$4 sm:$0xff]   ;;  %v4723_v38 = vld [vmem:[#allocation5 + $0x8ec] ss:$16 sps:$4 sm:$0xff]  }
 0x13b   :  { %2829 = vmatprep.subr.bf16.mxu0 %v4627_v39  ;;  %3130 = vmatprep.subr.bf16.mxu1 %v4630_v40  ;;  %v4718_v39 = vld [vmem:[#allocation5 + $0x8e0] ss:$16 sps:$4 sm:$0xff]   ;;  %v4721_v40 = vld [vmem:[#allocation5 + $0x8e8] ss:$16 sps:$4 sm:$0xff]  }
 0x13e   :  { %2830 = vmatpush1.bf16.msra.mxu0 %v4625_v41  ;;  %3131 = vmatpush1.bf16.msra.mxu1 %v4628_v42  ;;  %v4726_v41 = vld [vmem:[#allocation5 + $0x904] ss:$16 sps:$4 sm:$0xff]   ;;  %v4729_v42 = vld [vmem:[#allocation5 + $0x90c] ss:$16 sps:$4 sm:$0xff]  }
 0x13f   :  { %2831 = vmatprep.subr.bf16.mxu0 %v4633_v43  ;;  %3132 = vmatprep.subr.bf16.mxu1 %v4636_v44  ;;  %v4724_v43 = vld [vmem:[#allocation5 + $0x900] ss:$16 sps:$4 sm:$0xff]   ;;  %v4727_v44 = vld [vmem:[#allocation5 + $0x908] ss:$16 sps:$4 sm:$0xff]  }
 0x142   :  { %2832 = vmatpush1.bf16.msra.mxu0 %v4631_v45  ;;  %3133 = vmatpush1.bf16.msra.mxu1 %v4634_v46  ;;  %v4732_v45 = vld [vmem:[#allocation5 + $0x924] ss:$16 sps:$4 sm:$0xff]   ;;  %v4735_v46 = vld [vmem:[#allocation5 + $0x92c] ss:$16 sps:$4 sm:$0xff]  }
 0x143   :  { %2833 = vmatprep.subr.bf16.mxu0 %v4639_v47  ;;  %3134 = vmatprep.subr.bf16.mxu1 %v4642_v48  ;;  %v4730_v47 = vld [vmem:[#allocation5 + $0x920] ss:$16 sps:$4 sm:$0xff]   ;;  %v4733_v48 = vld [vmem:[#allocation5 + $0x928] ss:$16 sps:$4 sm:$0xff]  }
 0x146   :  { %2834 = vmatpush1.bf16.msra.mxu0 %v4637_v49  ;;  %3135 = vmatpush1.bf16.msra.mxu1 %v4640_v50  ;;  %v4738_v49 = vld [vmem:[#allocation5 + $0x944] ss:$16 sps:$4 sm:$0xff]   ;;  %v4741_v50 = vld [vmem:[#allocation5 + $0x94c] ss:$16 sps:$4 sm:$0xff]  }
 0x147   :  { %2835 = vmatprep.subr.bf16.mxu0 %v4645_v51  ;;  %3136 = vmatprep.subr.bf16.mxu1 %v4648_v52  ;;  %v4736_v51 = vld [vmem:[#allocation5 + $0x940] ss:$16 sps:$4 sm:$0xff]   ;;  %v4739_v52 = vld [vmem:[#allocation5 + $0x948] ss:$16 sps:$4 sm:$0xff]  }
 0x14a   :  { %2836 = vmatpush1.bf16.msra.mxu0 %v4643_v53  ;;  %3137 = vmatpush1.bf16.msra.mxu1 %v4646_v54  ;;  %v4744_v53 = vld [vmem:[#allocation5 + $0x964] ss:$16 sps:$4 sm:$0xff]   ;;  %v4747_v54 = vld [vmem:[#allocation5 + $0x96c] ss:$16 sps:$4 sm:$0xff]  }
 0x14b   :  { %2837 = vmatprep.subr.bf16.mxu0 %v4651_v55  ;;  %3138 = vmatprep.subr.bf16.mxu1 %v4654_v56  ;;  %v4742_v55 = vld [vmem:[#allocation5 + $0x960] ss:$16 sps:$4 sm:$0xff]   ;;  %v4745_v56 = vld [vmem:[#allocation5 + $0x968] ss:$16 sps:$4 sm:$0xff]  }
 0x14e   :  { %2838 = vmatpush1.bf16.msra.mxu0 %v4649_v57  ;;  %3139 = vmatpush1.bf16.msra.mxu1 %v4652_v58  ;;  %v4750_v57 = vld [vmem:[#allocation5 + $0x984] ss:$16 sps:$4 sm:$0xff]   ;;  %v4753_v58 = vld [vmem:[#allocation5 + $0x98c] ss:$16 sps:$4 sm:$0xff]  }
 0x14f   :  { %2839 = vmatprep.subr.bf16.mxu0 %v4657_v59  ;;  %3140 = vmatprep.subr.bf16.mxu1 %v4660_v60  ;;  %v4748_v59 = vld [vmem:[#allocation5 + $0x980] ss:$16 sps:$4 sm:$0xff]   ;;  %v4751_v60 = vld [vmem:[#allocation5 + $0x988] ss:$16 sps:$4 sm:$0xff]  }
 0x152   :  { %2840 = vmatpush1.bf16.msra.mxu0 %v4655_v61  ;;  %3141 = vmatpush1.bf16.msra.mxu1 %v4658_v62  ;;  %v4756_v61 = vld [vmem:[#allocation5 + $0x9a4] ss:$16 sps:$4 sm:$0xff]   ;;  %v4759_v62 = vld [vmem:[#allocation5 + $0x9ac] ss:$16 sps:$4 sm:$0xff]  }
 0x153   :  { %2841 = vmatprep.subr.bf16.mxu0 %v4663_v63  ;;  %3142 = vmatprep.subr.bf16.mxu1 %v4666_v0  ;;  %v4754_v63 = vld [vmem:[#allocation5 + $0x9a0] ss:$16 sps:$4 sm:$0xff]   ;;  %v4757_v0 = vld [vmem:[#allocation5 + $0x9a8] ss:$16 sps:$4 sm:$0xff]  }
 0x156   :  { %2842 = vmatpush1.bf16.msra.mxu0 %v4661_v1  ;;  %3143 = vmatpush1.bf16.msra.mxu1 %v4664_v2  ;;  %v4762_v1 = vld [vmem:[#allocation5 + $0x9c4] ss:$16 sps:$4 sm:$0xff]   ;;  %v4765_v2 = vld [vmem:[#allocation5 + $0x9cc] ss:$16 sps:$4 sm:$0xff]  }
 0x157   :  { %2843 = vmatprep.subr.bf16.mxu0 %v4669_v3  ;;  %3144 = vmatprep.subr.bf16.mxu1 %v4672_v4  ;;  %v4760_v3 = vld [vmem:[#allocation5 + $0x9c0] ss:$16 sps:$4 sm:$0xff]   ;;  %v4763_v4 = vld [vmem:[#allocation5 + $0x9c8] ss:$16 sps:$4 sm:$0xff]  }
 0x15a   :  { %2844 = vmatpush1.bf16.msra.mxu0 %v4667_v5  ;;  %3145 = vmatpush1.bf16.msra.mxu1 %v4670_v6  ;;  %v4768_v5 = vld [vmem:[#allocation5 + $0x9e4] ss:$16 sps:$4 sm:$0xff]   ;;  %v4771_v6 = vld [vmem:[#allocation5 + $0x9ec] ss:$16 sps:$4 sm:$0xff]  }
 0x15b   :  { %2856 = vmatprep.subr.bf16.mxu0 %v4678_v7  ;;  %3157 = vmatprep.subr.bf16.mxu1 %v4681_v8  ;;  %v4766_v7 = vld [vmem:[#allocation5 + $0x9e0] ss:$16 sps:$4 sm:$0xff]   ;;  %v4769_v8 = vld [vmem:[#allocation5 + $0x9e8] ss:$16 sps:$4 sm:$0xff]  }
 0x15d   :  { %2846 = vmatmul.mubr.bf16.vlgmr.msra.gmra.mrb[0].mxu0 %v4673_v9  ;;  %3147 = vmatmul.mubr.bf16.vlgmr.msra.gmra.mrb[0].mxu1 %v4673_v9  ;;  %v4777_v9 = vld [vmem:[#allocation5 + $0xa04] ss:$16 sps:$4 sm:$0xff]  }
 0x15e   :  { %2857 = vmatpush1.bf16.msra.mxu0 %v4676_v10  ;;  %3158 = vmatpush1.bf16.msra.mxu1 %v4679_v11  ;;  %v4780_v10 = vld [vmem:[#allocation5 + $0xa0c] ss:$16 sps:$4 sm:$0xff]  }
 0x15f   :  { %2858 = vmatprep.subr.bf16.mxu0 %v4684_v12  ;;  %3159 = vmatprep.subr.bf16.mxu1 %v4687_v13  ;;  %v4772_v11 = vld [vmem:[#allocation2 + $0x20] ss:$52 sps:$4 sm:$0xff]   ;;  %v4775_v12 = vld [vmem:[#allocation5 + $0xa00] ss:$16 sps:$4 sm:$0xff]  }
 0x160   :  { %2888 = vmatprep.mubr.bf16.mxu0 %v4774_v14  ;;  %3189 = vmatprep.mubr.bf16.mxu1 %v4774_v14  ;;  %v4778_v13 = vld [vmem:[#allocation5 + $0xa08] ss:$16 sps:$4 sm:$0xff]   ;;  %v4783_v14 = vld [vmem:[#allocation5 + $0xa24] ss:$16 sps:$4 sm:$0xff]  }
 0x162   :  { %2859 = vmatpush1.bf16.msra.mxu0 %v4682_v15  ;;  %3160 = vmatpush1.bf16.msra.mxu1 %v4685_v16  ;;  %v4786_v15 = vld [vmem:[#allocation5 + $0xa2c] ss:$16 sps:$4 sm:$0xff]   ;;  %v4873_v16 = vld [vmem:[#allocation2 + $0x2c] ss:$52 sps:$4 sm:$0xff]  }
 0x163   :  { %2860 = vmatprep.subr.bf16.mxu0 %v4690_v17  ;;  %3161 = vmatprep.subr.bf16.mxu1 %v4693_v18  ;;  %v4781_v17 = vld [vmem:[#allocation5 + $0xa20] ss:$16 sps:$4 sm:$0xff]   ;;  %v4784_v18 = vld [vmem:[#allocation5 + $0xa28] ss:$16 sps:$4 sm:$0xff]  }
 0x166   :  { %2861 = vmatpush1.bf16.msra.mxu0 %v4688_v19  ;;  %3162 = vmatpush1.bf16.msra.mxu1 %v4691_v20  ;;  %v4789_v19 = vld [vmem:[#allocation5 + $0xa44] ss:$16 sps:$4 sm:$0xff]   ;;  %v4792_v20 = vld [vmem:[#allocation5 + $0xa4c] ss:$16 sps:$4 sm:$0xff]  }
 0x167   :  { %2862 = vmatprep.subr.bf16.mxu0 %v4696_v21  ;;  %3163 = vmatprep.subr.bf16.mxu1 %v4699_v22  ;;  %v4787_v21 = vld [vmem:[#allocation5 + $0xa40] ss:$16 sps:$4 sm:$0xff]   ;;  %v4790_v22 = vld [vmem:[#allocation5 + $0xa48] ss:$16 sps:$4 sm:$0xff]  }
 0x16a   :  { %2863 = vmatpush1.bf16.msra.mxu0 %v4694_v23  ;;  %3164 = vmatpush1.bf16.msra.mxu1 %v4697_v24  ;;  %v4795_v23 = vld [vmem:[#allocation5 + $0xa64] ss:$16 sps:$4 sm:$0xff]   ;;  %v4798_v24 = vld [vmem:[#allocation5 + $0xa6c] ss:$16 sps:$4 sm:$0xff]  }
 0x16b   :  { %2864 = vmatprep.subr.bf16.mxu0 %v4702_v25  ;;  %3165 = vmatprep.subr.bf16.mxu1 %v4705_v26  ;;  %v4793_v25 = vld [vmem:[#allocation5 + $0xa60] ss:$16 sps:$4 sm:$0xff]   ;;  %v4796_v26 = vld [vmem:[#allocation5 + $0xa68] ss:$16 sps:$4 sm:$0xff]  }
 0x16e   :  { %2865 = vmatpush1.bf16.msra.mxu0 %v4700_v27  ;;  %3166 = vmatpush1.bf16.msra.mxu1 %v4703_v28  ;;  %v4801_v27 = vld [vmem:[#allocation5 + $0xa84] ss:$16 sps:$4 sm:$0xff]   ;;  %v4804_v28 = vld [vmem:[#allocation5 + $0xa8c] ss:$16 sps:$4 sm:$0xff]  }
 0x16f   :  { %2866 = vmatprep.subr.bf16.mxu0 %v4708_v29  ;;  %3167 = vmatprep.subr.bf16.mxu1 %v4711_v30  ;;  %v4799_v29 = vld [vmem:[#allocation5 + $0xa80] ss:$16 sps:$4 sm:$0xff]   ;;  %v4802_v30 = vld [vmem:[#allocation5 + $0xa88] ss:$16 sps:$4 sm:$0xff]  }
 0x172   :  { %2867 = vmatpush1.bf16.msra.mxu0 %v4706_v31  ;;  %3168 = vmatpush1.bf16.msra.mxu1 %v4709_v32  ;;  %v4807_v31 = vld [vmem:[#allocation5 + $0xaa4] ss:$16 sps:$4 sm:$0xff]   ;;  %v4810_v32 = vld [vmem:[#allocation5 + $0xaac] ss:$16 sps:$4 sm:$0xff]  }
 0x173   :  { %2868 = vmatprep.subr.bf16.mxu0 %v4714_v33  ;;  %3169 = vmatprep.subr.bf16.mxu1 %v4717_v34  ;;  %v4805_v33 = vld [vmem:[#allocation5 + $0xaa0] ss:$16 sps:$4 sm:$0xff]   ;;  %v4808_v34 = vld [vmem:[#allocation5 + $0xaa8] ss:$16 sps:$4 sm:$0xff]  }
 0x176   :  { %2869 = vmatpush1.bf16.msra.mxu0 %v4712_v35  ;;  %3170 = vmatpush1.bf16.msra.mxu1 %v4715_v36  ;;  %v4813_v35 = vld [vmem:[#allocation5 + $0xac4] ss:$16 sps:$4 sm:$0xff]   ;;  %v4816_v36 = vld [vmem:[#allocation5 + $0xacc] ss:$16 sps:$4 sm:$0xff]  }
 0x177   :  { %2870 = vmatprep.subr.bf16.mxu0 %v4720_v37  ;;  %3171 = vmatprep.subr.bf16.mxu1 %v4723_v38  ;;  %v4811_v37 = vld [vmem:[#allocation5 + $0xac0] ss:$16 sps:$4 sm:$0xff]   ;;  %v4814_v38 = vld [vmem:[#allocation5 + $0xac8] ss:$16 sps:$4 sm:$0xff]  }
 0x17a   :  { %2871 = vmatpush1.bf16.msra.mxu0 %v4718_v39  ;;  %3172 = vmatpush1.bf16.msra.mxu1 %v4721_v40  ;;  %v4819_v39 = vld [vmem:[#allocation5 + $0xae4] ss:$16 sps:$4 sm:$0xff]   ;;  %v4822_v40 = vld [vmem:[#allocation5 + $0xaec] ss:$16 sps:$4 sm:$0xff]  }
 0x17b   :  { %2872 = vmatprep.subr.bf16.mxu0 %v4726_v41  ;;  %3173 = vmatprep.subr.bf16.mxu1 %v4729_v42  ;;  %v4817_v41 = vld [vmem:[#allocation5 + $0xae0] ss:$16 sps:$4 sm:$0xff]   ;;  %v4820_v42 = vld [vmem:[#allocation5 + $0xae8] ss:$16 sps:$4 sm:$0xff]  }
 0x17e   :  { %2873 = vmatpush1.bf16.msra.mxu0 %v4724_v43  ;;  %3174 = vmatpush1.bf16.msra.mxu1 %v4727_v44  ;;  %v4825_v43 = vld [vmem:[#allocation5 + $0xb04] ss:$16 sps:$4 sm:$0xff]   ;;  %v4828_v44 = vld [vmem:[#allocation5 + $0xb0c] ss:$16 sps:$4 sm:$0xff]  }
 0x17f   :  { %2874 = vmatprep.subr.bf16.mxu0 %v4732_v45  ;;  %3175 = vmatprep.subr.bf16.mxu1 %v4735_v46  ;;  %v4823_v45 = vld [vmem:[#allocation5 + $0xb00] ss:$16 sps:$4 sm:$0xff]   ;;  %v4826_v46 = vld [vmem:[#allocation5 + $0xb08] ss:$16 sps:$4 sm:$0xff]  }
 0x182   :  { %2875 = vmatpush1.bf16.msra.mxu0 %v4730_v47  ;;  %3176 = vmatpush1.bf16.msra.mxu1 %v4733_v48  ;;  %v4831_v47 = vld [vmem:[#allocation5 + $0xb24] ss:$16 sps:$4 sm:$0xff]   ;;  %v4834_v48 = vld [vmem:[#allocation5 + $0xb2c] ss:$16 sps:$4 sm:$0xff]  }
 0x183   :  { %2876 = vmatprep.subr.bf16.mxu0 %v4738_v49  ;;  %3177 = vmatprep.subr.bf16.mxu1 %v4741_v50  ;;  %v4829_v49 = vld [vmem:[#allocation5 + $0xb20] ss:$16 sps:$4 sm:$0xff]   ;;  %v4832_v50 = vld [vmem:[#allocation5 + $0xb28] ss:$16 sps:$4 sm:$0xff]  }
 0x186   :  { %2877 = vmatpush1.bf16.msra.mxu0 %v4736_v51  ;;  %3178 = vmatpush1.bf16.msra.mxu1 %v4739_v52  ;;  %v4837_v51 = vld [vmem:[#allocation5 + $0xb44] ss:$16 sps:$4 sm:$0xff]   ;;  %v4840_v52 = vld [vmem:[#allocation5 + $0xb4c] ss:$16 sps:$4 sm:$0xff]  }
 0x187   :  { %2878 = vmatprep.subr.bf16.mxu0 %v4744_v53  ;;  %3179 = vmatprep.subr.bf16.mxu1 %v4747_v54  ;;  %v4835_v53 = vld [vmem:[#allocation5 + $0xb40] ss:$16 sps:$4 sm:$0xff]   ;;  %v4838_v54 = vld [vmem:[#allocation5 + $0xb48] ss:$16 sps:$4 sm:$0xff]  }
 0x18a   :  { %2879 = vmatpush1.bf16.msra.mxu0 %v4742_v55  ;;  %3180 = vmatpush1.bf16.msra.mxu1 %v4745_v56  ;;  %v4843_v55 = vld [vmem:[#allocation5 + $0xb64] ss:$16 sps:$4 sm:$0xff]   ;;  %v4846_v56 = vld [vmem:[#allocation5 + $0xb6c] ss:$16 sps:$4 sm:$0xff]  }
 0x18b   :  { %2880 = vmatprep.subr.bf16.mxu0 %v4750_v57  ;;  %3181 = vmatprep.subr.bf16.mxu1 %v4753_v58  ;;  %v4841_v57 = vld [vmem:[#allocation5 + $0xb60] ss:$16 sps:$4 sm:$0xff]   ;;  %v4844_v58 = vld [vmem:[#allocation5 + $0xb68] ss:$16 sps:$4 sm:$0xff]  }
 0x18e   :  { %2881 = vmatpush1.bf16.msra.mxu0 %v4748_v59  ;;  %3182 = vmatpush1.bf16.msra.mxu1 %v4751_v60  ;;  %v4849_v59 = vld [vmem:[#allocation5 + $0xb84] ss:$16 sps:$4 sm:$0xff]   ;;  %v4852_v60 = vld [vmem:[#allocation5 + $0xb8c] ss:$16 sps:$4 sm:$0xff]  }
 0x18f   :  { %2882 = vmatprep.subr.bf16.mxu0 %v4756_v61  ;;  %3183 = vmatprep.subr.bf16.mxu1 %v4759_v62  ;;  %v4847_v61 = vld [vmem:[#allocation5 + $0xb80] ss:$16 sps:$4 sm:$0xff]   ;;  %v4850_v62 = vld [vmem:[#allocation5 + $0xb88] ss:$16 sps:$4 sm:$0xff]  }
 0x192   :  { %2883 = vmatpush1.bf16.msra.mxu0 %v4754_v63  ;;  %3184 = vmatpush1.bf16.msra.mxu1 %v4757_v0  ;;  %v4855_v63 = vld [vmem:[#allocation5 + $0xba4] ss:$16 sps:$4 sm:$0xff]   ;;  %v4858_v0 = vld [vmem:[#allocation5 + $0xbac] ss:$16 sps:$4 sm:$0xff]  }
 0x193   :  { %2884 = vmatprep.subr.bf16.mxu0 %v4762_v1  ;;  %3185 = vmatprep.subr.bf16.mxu1 %v4765_v2  ;;  %v4853_v1 = vld [vmem:[#allocation5 + $0xba0] ss:$16 sps:$4 sm:$0xff]   ;;  %v4856_v2 = vld [vmem:[#allocation5 + $0xba8] ss:$16 sps:$4 sm:$0xff]  }
 0x196   :  { %2885 = vmatpush1.bf16.msra.mxu0 %v4760_v3  ;;  %3186 = vmatpush1.bf16.msra.mxu1 %v4763_v4  ;;  %v4861_v3 = vld [vmem:[#allocation5 + $0xbc4] ss:$16 sps:$4 sm:$0xff]   ;;  %v4864_v4 = vld [vmem:[#allocation5 + $0xbcc] ss:$16 sps:$4 sm:$0xff]  }
 0x197   :  { %2886 = vmatprep.subr.bf16.mxu0 %v4768_v5  ;;  %3187 = vmatprep.subr.bf16.mxu1 %v4771_v6  ;;  %v4859_v5 = vld [vmem:[#allocation5 + $0xbc0] ss:$16 sps:$4 sm:$0xff]   ;;  %v4862_v6 = vld [vmem:[#allocation5 + $0xbc8] ss:$16 sps:$4 sm:$0xff]  }
 0x19a   :  { %2887 = vmatpush1.bf16.msra.mxu0 %v4766_v7  ;;  %3188 = vmatpush1.bf16.msra.mxu1 %v4769_v8  ;;  %v4867_v7 = vld [vmem:[#allocation5 + $0xbe4] ss:$16 sps:$4 sm:$0xff]   ;;  %v4870_v8 = vld [vmem:[#allocation5 + $0xbec] ss:$16 sps:$4 sm:$0xff]  }
 0x19b   :  { %2899 = vmatprep.subr.bf16.mxu0 %v4777_v9  ;;  %3200 = vmatprep.subr.bf16.mxu1 %v4780_v10  ;;  %v4865_v9 = vld [vmem:[#allocation5 + $0xbe0] ss:$16 sps:$4 sm:$0xff]   ;;  %v4868_v10 = vld [vmem:[#allocation5 + $0xbe8] ss:$16 sps:$4 sm:$0xff]  }
 0x19d   :  { %2889 = vmatmul.mubr.bf16.vlgmr.msra.gmra.mrb[0].mxu0 %v4772_v11  ;;  %3190 = vmatmul.mubr.bf16.vlgmr.msra.gmra.mrb[0].mxu1 %v4772_v11  ;;  %v4876_v11 = vld [vmem:[#allocation5 + $0xc04] ss:$16 sps:$4 sm:$0xff]  }
 0x19e   :  { %2900 = vmatpush1.bf16.msra.mxu0 %v4775_v12  ;;  %3201 = vmatpush1.bf16.msra.mxu1 %v4778_v13  ;;  %v4879_v12 = vld [vmem:[#allocation5 + $0xc0c] ss:$16 sps:$4 sm:$0xff]   ;;  %v4871_v13 = vld [vmem:[#allocation2 + $0x28] ss:$52 sps:$4 sm:$0xff]  }
 0x19f   :  { %2901 = vmatprep.subr.bf16.mxu0 %v4783_v14  ;;  %3202 = vmatprep.subr.bf16.mxu1 %v4786_v15  ;;  %v4874_v14 = vld [vmem:[#allocation5 + $0xc00] ss:$16 sps:$4 sm:$0xff]   ;;  %v4877_v15 = vld [vmem:[#allocation5 + $0xc08] ss:$16 sps:$4 sm:$0xff]  }
 0x1a0   :  { %2931 = vmatprep.mubr.bf16.mxu0 %v4873_v16  ;;  %3232 = vmatprep.mubr.bf16.mxu1 %v4873_v16  ;;  %v4882_v16 = vld [vmem:[#allocation5 + $0xc24] ss:$16 sps:$4 sm:$0xff]  }
 0x1a2   :  { %2902 = vmatpush1.bf16.msra.mxu0 %v4781_v17  ;;  %3203 = vmatpush1.bf16.msra.mxu1 %v4784_v18  ;;  %v4885_v17 = vld [vmem:[#allocation5 + $0xc2c] ss:$16 sps:$4 sm:$0xff]   ;;  %v4880_v18 = vld [vmem:[#allocation5 + $0xc20] ss:$16 sps:$4 sm:$0xff]  }
 0x1a3   :  { %2903 = vmatprep.subr.bf16.mxu0 %v4789_v19  ;;  %3204 = vmatprep.subr.bf16.mxu1 %v4792_v20  ;;  %v4883_v19 = vld [vmem:[#allocation5 + $0xc28] ss:$16 sps:$4 sm:$0xff]   ;;  %v4888_v20 = vld [vmem:[#allocation5 + $0xc44] ss:$16 sps:$4 sm:$0xff]  }
 0x1a6   :  { %2904 = vmatpush1.bf16.msra.mxu0 %v4787_v21  ;;  %3205 = vmatpush1.bf16.msra.mxu1 %v4790_v22  ;;  %v4891_v21 = vld [vmem:[#allocation5 + $0xc4c] ss:$16 sps:$4 sm:$0xff]   ;;  %v5114_v22 = vmov 0  }
 0x1a7   :  { %2905 = vmatprep.subr.bf16.mxu0 %v4795_v23  ;;  %3206 = vmatprep.subr.bf16.mxu1 %v4798_v24  ;;  %v4886_v23 = vld [vmem:[#allocation5 + $0xc40] ss:$16 sps:$4 sm:$0xff]   ;;  %v4889_v24 = vld [vmem:[#allocation5 + $0xc48] ss:$16 sps:$4 sm:$0xff]  }
 0x1aa   :  { %2906 = vmatpush1.bf16.msra.mxu0 %v4793_v25  ;;  %3207 = vmatpush1.bf16.msra.mxu1 %v4796_v26  ;;  %v4894_v25 = vld [vmem:[#allocation5 + $0xc64] ss:$16 sps:$4 sm:$0xff]   ;;  %v4897_v26 = vld [vmem:[#allocation5 + $0xc6c] ss:$16 sps:$4 sm:$0xff]  }
 0x1ab   :  { %2907 = vmatprep.subr.bf16.mxu0 %v4801_v27  ;;  %3208 = vmatprep.subr.bf16.mxu1 %v4804_v28  ;;  %v4892_v27 = vld [vmem:[#allocation5 + $0xc60] ss:$16 sps:$4 sm:$0xff]   ;;  %v4895_v28 = vld [vmem:[#allocation5 + $0xc68] ss:$16 sps:$4 sm:$0xff]  }
 0x1ae   :  { %2908 = vmatpush1.bf16.msra.mxu0 %v4799_v29  ;;  %3209 = vmatpush1.bf16.msra.mxu1 %v4802_v30  ;;  %v4900_v29 = vld [vmem:[#allocation5 + $0xc84] ss:$16 sps:$4 sm:$0xff]   ;;  %v4903_v30 = vld [vmem:[#allocation5 + $0xc8c] ss:$16 sps:$4 sm:$0xff]  }
 0x1af   :  { %2909 = vmatprep.subr.bf16.mxu0 %v4807_v31  ;;  %3210 = vmatprep.subr.bf16.mxu1 %v4810_v32  ;;  %v4898_v31 = vld [vmem:[#allocation5 + $0xc80] ss:$16 sps:$4 sm:$0xff]   ;;  %v4901_v32 = vld [vmem:[#allocation5 + $0xc88] ss:$16 sps:$4 sm:$0xff]  }
 0x1b2   :  { %2910 = vmatpush1.bf16.msra.mxu0 %v4805_v33  ;;  %3211 = vmatpush1.bf16.msra.mxu1 %v4808_v34  ;;  %v4906_v33 = vld [vmem:[#allocation5 + $0xca4] ss:$16 sps:$4 sm:$0xff]   ;;  %v4909_v34 = vld [vmem:[#allocation5 + $0xcac] ss:$16 sps:$4 sm:$0xff]  }
 0x1b3   :  { %2911 = vmatprep.subr.bf16.mxu0 %v4813_v35  ;;  %3212 = vmatprep.subr.bf16.mxu1 %v4816_v36  ;;  %v4904_v35 = vld [vmem:[#allocation5 + $0xca0] ss:$16 sps:$4 sm:$0xff]   ;;  %v4907_v36 = vld [vmem:[#allocation5 + $0xca8] ss:$16 sps:$4 sm:$0xff]  }
 0x1b6   :  { %2912 = vmatpush1.bf16.msra.mxu0 %v4811_v37  ;;  %3213 = vmatpush1.bf16.msra.mxu1 %v4814_v38  ;;  %v4912_v37 = vld [vmem:[#allocation5 + $0xcc4] ss:$16 sps:$4 sm:$0xff]   ;;  %v4915_v38 = vld [vmem:[#allocation5 + $0xccc] ss:$16 sps:$4 sm:$0xff]  }
 0x1b7   :  { %2913 = vmatprep.subr.bf16.mxu0 %v4819_v39  ;;  %3214 = vmatprep.subr.bf16.mxu1 %v4822_v40  ;;  %v4910_v39 = vld [vmem:[#allocation5 + $0xcc0] ss:$16 sps:$4 sm:$0xff]   ;;  %v4913_v40 = vld [vmem:[#allocation5 + $0xcc8] ss:$16 sps:$4 sm:$0xff]  }
 0x1ba   :  { %2914 = vmatpush1.bf16.msra.mxu0 %v4817_v41  ;;  %3215 = vmatpush1.bf16.msra.mxu1 %v4820_v42  ;;  %v4918_v41 = vld [vmem:[#allocation5 + $0xce4] ss:$16 sps:$4 sm:$0xff]   ;;  %v4921_v42 = vld [vmem:[#allocation5 + $0xcec] ss:$16 sps:$4 sm:$0xff]  }
 0x1bb   :  { %2915 = vmatprep.subr.bf16.mxu0 %v4825_v43  ;;  %3216 = vmatprep.subr.bf16.mxu1 %v4828_v44  ;;  %v4916_v43 = vld [vmem:[#allocation5 + $0xce0] ss:$16 sps:$4 sm:$0xff]   ;;  %v4919_v44 = vld [vmem:[#allocation5 + $0xce8] ss:$16 sps:$4 sm:$0xff]  }
 0x1be   :  { %2916 = vmatpush1.bf16.msra.mxu0 %v4823_v45  ;;  %3217 = vmatpush1.bf16.msra.mxu1 %v4826_v46  ;;  %v4923_v45 = vld [vmem:[#allocation8 + $0x40] sm:$0xff]  }
 0x1bf   :  { %2917 = vmatprep.subr.bf16.mxu0 %v4831_v47  ;;  %3218 = vmatprep.subr.bf16.mxu1 %v4834_v48  ;;  %v4924_v46 = vld [vmem:[#allocation8 + $0xc0] sm:$0xff]  }
 0x1c0   :  { %v4922_v47 = vld [vmem:[#allocation2 + $0x30] ss:$52 sps:$4 sm:$0xff]  }
 0x1c1   :  { %v4925_v48 = vld [vmem:[#allocation8] sm:$0xff]  }
 0x1c2   :  { %2918 = vmatpush1.bf16.msra.mxu0 %v4829_v49  ;;  %3219 = vmatpush1.bf16.msra.mxu1 %v4832_v50  ;;  %v4926_v49 = vld [vmem:[#allocation8 + $0x80] sm:$0xff]   ;;  %v4927_v50 = vld [vmem:[#allocation8 + $0x48] sm:$0xff]  }
 0x1c3   :  { %2919 = vmatprep.subr.bf16.mxu0 %v4837_v51  ;;  %3220 = vmatprep.subr.bf16.mxu1 %v4840_v52  ;;  %v4928_v51 = vld [vmem:[#allocation8 + $0xc8] sm:$0xff]  }
 0x1c4   :  { %v4929_v52 = vld [vmem:[#allocation8 + $0x8] sm:$0xff]  }
 0x1c6   :  { %2920 = vmatpush1.bf16.msra.mxu0 %v4835_v53  ;;  %3221 = vmatpush1.bf16.msra.mxu1 %v4838_v54  ;;  %v4930_v53 = vld [vmem:[#allocation8 + $0x88] sm:$0xff]   ;;  %v4931_v54 = vld [vmem:[#allocation8 + $0x50] sm:$0xff]  }
 0x1c7   :  { %2921 = vmatprep.subr.bf16.mxu0 %v4843_v55  ;;  %3222 = vmatprep.subr.bf16.mxu1 %v4846_v56  ;;  %v4932_v55 = vld [vmem:[#allocation8 + $0xd0] sm:$0xff]  }
 0x1c8   :  { %v4933_v56 = vld [vmem:[#allocation8 + $0x10] sm:$0xff]  }
 0x1ca   :  { %2922 = vmatpush1.bf16.msra.mxu0 %v4841_v57  ;;  %3223 = vmatpush1.bf16.msra.mxu1 %v4844_v58  ;;  %v4934_v57 = vld [vmem:[#allocation8 + $0x90] sm:$0xff]   ;;  %v4935_v58 = vld [vmem:[#allocation8 + $0x58] sm:$0xff]  }
 0x1cb   :  { %2923 = vmatprep.subr.bf16.mxu0 %v4849_v59  ;;  %3224 = vmatprep.subr.bf16.mxu1 %v4852_v60  ;;  %v4936_v59 = vld [vmem:[#allocation8 + $0xd8] sm:$0xff]  }
 0x1cc   :  { %v4937_v60 = vld [vmem:[#allocation8 + $0x18] sm:$0xff]  }
 0x1ce   :  { %2924 = vmatpush1.bf16.msra.mxu0 %v4847_v61  ;;  %3225 = vmatpush1.bf16.msra.mxu1 %v4850_v62  ;;  %v4938_v61 = vld [vmem:[#allocation8 + $0x98] sm:$0xff]   ;;  %v4939_v62 = vld [vmem:[#allocation8 + $0x60] sm:$0xff]  }
 0x1cf   :  { %2925 = vmatprep.subr.bf16.mxu0 %v4855_v63  ;;  %3226 = vmatprep.subr.bf16.mxu1 %v4858_v0  ;;  %v4940_v63 = vld [vmem:[#allocation8 + $0xe0] sm:$0xff]  }
 0x1d0   :  { %v4941_v0 = vld [vmem:[#allocation8 + $0x20] sm:$0xff]  }
 0x1d2   :  { %2926 = vmatpush1.bf16.msra.mxu0 %v4853_v1  ;;  %3227 = vmatpush1.bf16.msra.mxu1 %v4856_v2  ;;  %v4942_v1 = vld [vmem:[#allocation8 + $0xa0] sm:$0xff]   ;;  %v4943_v2 = vld [vmem:[#allocation8 + $0x68] sm:$0xff]  }
 0x1d3   :  { %2927 = vmatprep.subr.bf16.mxu0 %v4861_v3  ;;  %3228 = vmatprep.subr.bf16.mxu1 %v4864_v4  ;;  %v4944_v3 = vld [vmem:[#allocation8 + $0xe8] sm:$0xff]  }
 0x1d4   :  { %v4945_v4 = vld [vmem:[#allocation8 + $0x28] sm:$0xff]  }
 0x1d6   :  { %2928 = vmatpush1.bf16.msra.mxu0 %v4859_v5  ;;  %3229 = vmatpush1.bf16.msra.mxu1 %v4862_v6  ;;  %v4946_v5 = vld [vmem:[#allocation8 + $0xa8] sm:$0xff]   ;;  %v4947_v6 = vld [vmem:[#allocation8 + $0x70] sm:$0xff]  }
 0x1d7   :  { %2929 = vmatprep.subr.bf16.mxu0 %v4867_v7  ;;  %3230 = vmatprep.subr.bf16.mxu1 %v4870_v8  ;;  %v4948_v7 = vld [vmem:[#allocation8 + $0xf0] sm:$0xff]  }
 0x1d8   :  { %v4949_v8 = vld [vmem:[#allocation8 + $0x30] sm:$0xff]  }
 0x1da   :  { %2930 = vmatpush1.bf16.msra.mxu0 %v4865_v9  ;;  %3231 = vmatpush1.bf16.msra.mxu1 %v4868_v10  ;;  %v4950_v9 = vld [vmem:[#allocation8 + $0xb0] sm:$0xff]   ;;  %v4951_v10 = vld [vmem:[#allocation8 + $0x78] sm:$0xff]  }
 0x1db   :  { %2942 = vmatprep.subr.bf16.mxu0 %v4876_v11  ;;  %3243 = vmatprep.subr.bf16.mxu1 %v4879_v12  ;;  %v4952_v11 = vld [vmem:[#allocation8 + $0xf8] sm:$0xff]  }
 0x1dc   :  { %v4953_v12 = vld [vmem:[#allocation8 + $0x38] sm:$0xff]  }
 0x1dd   :  { %2932 = vmatmul.mubr.bf16.vlgmr.msra.gmra.mrb[0].mxu0 %v4871_v13  ;;  %3233 = vmatmul.mubr.bf16.vlgmr.msra.gmra.mrb[0].mxu1 %v4871_v13  ;;  %v4954_v13 = vld [vmem:[#allocation8 + $0xb8] sm:$0xff]  }
 0x1de   :  { %2943 = vmatpush1.bf16.msra.mxu0 %v4874_v14  ;;  %3244 = vmatpush1.bf16.msra.mxu1 %v4877_v15  ;;  %v518_v14 = vlaneseq }
 0x1df   :  { %2944 = vmatprep.subr.bf16.mxu0 %v4882_v16  ;;  %3245 = vmatprep.subr.bf16.mxu1 %v4885_v17 }
 0x1e0   :  { %2974 = vmatprep.mubr.bf16.mxu0 %v5114_v22  ;;  %3275 = vmatprep.mubr.bf16.mxu1 %v5114_v22  ;;  %v519_v15 = vshrl.u32 %v518_v14, 7 }
 0x1e2   :  { %2945 = vmatpush1.bf16.msra.mxu0 %v4880_v18  ;;  %3246 = vmatpush1.bf16.msra.mxu1 %v4883_v19  ;;  %v520_v16 = vsub.s32 0, %v519_v15  ;;  %v528_v17 = vsub.s32 2, %v519_v15  ;;  %v516_v18 = vld [vmem:[#allocation7] sm:$0xf]  ;;  %v524_v19 = vsub.s32 1, %v519_v15 }
 0x1e3   :  { %2946 = vmatprep.subr.bf16.mxu0 %v4888_v20  ;;  %3247 = vmatprep.subr.bf16.mxu1 %v4891_v21  ;;  %v532_v20 = vsub.s32 3, %v519_v15 }
 0x1e4   :  { %v521_v21 = vrot.slane %v516_v18, %v520_v16  ;;  %v529_v22 = vrot.slane %v516_v18, %v528_v17 }
 0x1e6   :  { %2947 = vmatpush1.bf16.msra.mxu0 %v4886_v23  ;;  %3248 = vmatpush1.bf16.msra.mxu1 %v4889_v24  ;;  %v525_v23 = vrot.slane %v516_v18, %v524_v19  ;;  %v533_v24 = vrot.slane %v516_v18, %v532_v20  ;;  %v3644_v20 = vand.u32 127, %v518_v14 }
 0x1e7   :  { %2948 = vmatprep.subr.bf16.mxu0 %v4894_v25  ;;  %3249 = vmatprep.subr.bf16.mxu1 %v4897_v26 }
 0x1e8   :  { %vm3645_vm0 = vcmp.ge.s32.totalorder %v3644_v20, 1  ;;  %vm3646_vm1 = vcmp.lt.s32.totalorder %v3644_v20, 7 }
 0x1e9   :  { %vm3647_vm4 = vmand %vm3645_vm0, %vm3646_vm1 }
 0x1ea   :  { %2949 = vmatpush1.bf16.msra.mxu0 %v4892_v27  ;;  %3250 = vmatpush1.bf16.msra.mxu1 %v4895_v28 }
 0x1eb   :  { %2950 = vmatprep.subr.bf16.mxu0 %v4900_v29  ;;  %3251 = vmatprep.subr.bf16.mxu1 %v4903_v30 }
 0x1ee   :  { %2951 = vmatpush1.bf16.msra.mxu0 %v4898_v31  ;;  %3252 = vmatpush1.bf16.msra.mxu1 %v4901_v32 }
 0x1ef   :  { %2952 = vmatprep.subr.bf16.mxu0 %v4906_v33  ;;  %3253 = vmatprep.subr.bf16.mxu1 %v4909_v34 }
 0x1f2   :  { %2953 = vmatpush1.bf16.msra.mxu0 %v4904_v35  ;;  %3254 = vmatpush1.bf16.msra.mxu1 %v4907_v36 }
 0x1f3   :  { %2954 = vmatprep.subr.bf16.mxu0 %v4912_v37  ;;  %3255 = vmatprep.subr.bf16.mxu1 %v4915_v38 }
 0x1f6   :  { %2955 = vmatpush1.bf16.msra.mxu0 %v4910_v39  ;;  %3256 = vmatpush1.bf16.msra.mxu1 %v4913_v40 }
 0x1f7   :  { %2956 = vmatprep.subr.bf16.mxu0 %v4918_v41  ;;  %3257 = vmatprep.subr.bf16.mxu1 %v4921_v42 }
 0x1fa   :  { %2957 = vmatpush1.bf16.msra.mxu0 %v4916_v43  ;;  %3258 = vmatpush1.bf16.msra.mxu1 %v4919_v44 }
 0x1fb   :  { %4165 = vmatprep.subr.bf16.mxu0 %v4923_v45  ;;  %4187 = vmatprep.subr.bf16.mxu1 %v4924_v46 }
 0x1fd   :  { %2975 = vmatmul.mubr.bf16.vlgmr.msra.gmra.mrb[0].mxu0 %v4922_v47  ;;  %3276 = vmatmul.mubr.bf16.vlgmr.msra.gmra.mrb[0].mxu1 %v4922_v47 }
 0x1fe   :  { %4166 = vmatpush3.bf16.msra.mxu0 %v4925_v48  ;;  %4188 = vmatpush3.bf16.msra.mxu1 %v4926_v49 }
 0x1ff   :  { %4167 = vmatprep.subr.bf16.mxu0 %v4927_v50  ;;  %4189 = vmatprep.subr.bf16.mxu1 %v4928_v51 }
 0x202   :  { %4168 = vmatpush3.bf16.msra.mxu0 %v4929_v52  ;;  %4190 = vmatpush3.bf16.msra.mxu1 %v4930_v53 }
 0x203   :  { %4169 = vmatprep.subr.bf16.mxu0 %v4931_v54  ;;  %4191 = vmatprep.subr.bf16.mxu1 %v4932_v55  ;;  %v4132_v55 = vld [vmem:[#allocation10] ss:$0 sm:$0xff] }
 0x206   :  { %4170 = vmatpush3.bf16.msra.mxu0 %v4933_v56  ;;  %4192 = vmatpush3.bf16.msra.mxu1 %v4934_v57 }
 0x207   :  { %4171 = vmatprep.subr.bf16.mxu0 %v4935_v58  ;;  %4193 = vmatprep.subr.bf16.mxu1 %v4936_v59 }
 0x20a   :  { %4172 = vmatpush3.bf16.msra.mxu0 %v4937_v60  ;;  %4194 = vmatpush3.bf16.msra.mxu1 %v4938_v61 }
 0x20b   :  { %4173 = vmatprep.subr.bf16.mxu0 %v4939_v62  ;;  %4195 = vmatprep.subr.bf16.mxu1 %v4940_v63 }
 0x20e   :  { %4174 = vmatpush3.bf16.msra.mxu0 %v4941_v0  ;;  %4196 = vmatpush3.bf16.msra.mxu1 %v4942_v1 }
 0x20f   :  { %4175 = vmatprep.subr.bf16.mxu0 %v4943_v2  ;;  %4197 = vmatprep.subr.bf16.mxu1 %v4944_v3 }
 0x212   :  { %4176 = vmatpush3.bf16.msra.mxu0 %v4945_v4  ;;  %4198 = vmatpush3.bf16.msra.mxu1 %v4946_v5 }
 0x213   :  { %4177 = vmatprep.subr.bf16.mxu0 %v4947_v6  ;;  %4199 = vmatprep.subr.bf16.mxu1 %v4948_v7 }
 0x216   :  { %4178 = vmatpush3.bf16.msra.mxu0 %v4949_v8  ;;  %4200 = vmatpush3.bf16.msra.mxu1 %v4950_v9 }
 0x217   :  { %4179 = vmatprep.subr.bf16.mxu0 %v4951_v10  ;;  %4201 = vmatprep.subr.bf16.mxu1 %v4952_v11 }
 0x21a   :  { %4180 = vmatpush3.bf16.msra.mxu0 %v4953_v12  ;;  %4202 = vmatpush3.bf16.msra.mxu1 %v4954_v13 }
 0x2d0   :  { %v2976_v25 = vpop.f32.mrb[0].mxu0  ;;  %v3277_v26 = vpop.f32.mrb[0].mxu1 }
 0x2d1   :  { %v4209_v27 = vadd.f32 %v2976_v25, %v521_v21  ;;  %v4213_v28 = vadd.f32 %v3277_v26, %v529_v22  ;;  %v2978_v29 = vpop.f32.mrb[1].mxu0  ;;  %v3279_v30 = vpop.f32.mrb[1].mxu1 }
 0x2d2   :  { %v4210_v31 = vadd.f32 %v2978_v29, %v525_v23  ;;  %v4214_v32 = vadd.f32 %v3279_v30, %v533_v24  ;;  %v2980_v33 = vpop.f32.mrb[2].mxu0  ;;  %v3281_v34 = vpop.f32.mrb[2].mxu1 }
 0x2d3   :  { %v4211_v35 = vadd.f32 %v2980_v33, %v521_v21  ;;  %v4215_v36 = vadd.f32 %v3281_v34, %v529_v22  ;;  %v2982_v37 = vpop.f32.mrb[3].mxu0  ;;  %v3283_v38 = vpop.f32.mrb[3].mxu1  ;;  %v3286_v41 = vmax.f32 %v4209_v27, 0.0  ;;  %v3288_v42 = vmax.f32 %v4213_v28, 0.0 }
 0x2d4   :  { %v4212_v39 = vadd.f32 %v2982_v37, %v525_v23  ;;  %v4216_v40 = vadd.f32 %v3283_v38, %v533_v24  ;;  %v3287_v45 = vmax.f32 %v4210_v31, 0.0  ;;  %v3289_v46 = vmax.f32 %v4214_v32, 0.0 }
 0x2d5   :  { %v3290_v43 = vmax.f32 %v4211_v35, 0.0  ;;  %v3292_v44 = vmax.f32 %v4215_v36, 0.0 }
 0x2d6   :  { %v3291_v47 = vmax.f32 %v4212_v39, 0.0  ;;  %v3293_v48 = vmax.f32 %v4216_v40, 0.0 }
 0x2d7   :  { %v3294_v49 = vpack.c.bf16 %v3290_v43, %v3286_v41  ;;  %v3296_v50 = vpack.c.bf16 %v3292_v44, %v3288_v42 }
 0x2d8   :  { %v3295_v51 = vpack.c.bf16 %v3291_v47, %v3287_v45  ;;  %v3297_v52 = vpack.c.bf16 %v3293_v48, %v3289_v46 }
 0x2da   :  { %3593 = vmatprep.mubr.bf16.mxu0 %v3295_v51  ;;  %3634 = vmatprep.mubr.bf16.mxu1 %v3297_v52 }
 0x2db   :  { %3594 = vmatmul.mubr.bf16.vlgmr.msra.gmra.mrb[4].mxu0 %v3294_v49  ;;  %3635 = vmatmul.mubr.bf16.vlgmr.msra.gmra.mrb[4].mxu1 %v3296_v50 }
 0x3ae   :  { %v4181_v53 = vpop.f32.mrb[4].mxu0  ;;  %v4203_v54 = vpop.f32.mrb[4].mxu1 }
 0x3af   :  { %v4182_v56 = vpop.f32.mrb[5].mxu0  ;;  %v4204_v57 = vpop.f32.mrb[5].mxu1 }
 0x3b0   :  { %v4183_v58 = vadd.f32 %v4182_v56, %v4181_v53  ;;  %v4205_v59 = vadd.f32 %v4204_v57, %v4203_v54  ;;  %v4184_v60 = vpop.f32.mrb[6].mxu0  ;;  %v4206_v61 = vpop.f32.mrb[6].mxu1 }
 0x3b1   :  { %v4185_v62 = vpop.f32.mrb[7].mxu0  ;;  %v4207_v63 = vpop.f32.mrb[7].mxu1 }
 0x3b2   :  { %v3596_v0 = vadd.f32 %v4183_v58, %v4132_v55  ;;  %v4186_v1 = vadd.f32 %v4185_v62, %v4184_v60  ;;  %v4208_v2 = vadd.f32 %v4207_v63, %v4206_v61 }
 0x3b4   :  { %v3637_v3 = vadd.f32 %v4205_v59, %v3596_v0  ;;  %v3599_v4 = vadd.f32 %v4186_v1, %v4132_v55 }
 0x3b6   :  { %v3650_v5 = vand.u32 2147483647, %v3637_v3  ;;  %v3640_v6 = vadd.f32 %v4208_v2, %v3599_v4  ;;  %v3648_v28 = vmax.f32 %v3637_v3, 0.0 }
 0x3b8   :  { %v3652_v7 = vsub.f32 0.0, %v3650_v5  ;;  %v3651_v8 = vand.u32 2147483647, %v3640_v6  ;;  %v3649_v33 = vmax.f32 %v3640_v6, 0.0 }
 0x3ba   :  { %v3654_v9 = vmul.f32 1.442695, %v3652_v7  ;;  %v3653_v10 = vsub.f32 0.0, %v3651_v8 }
 0x3bc   :  { %4955 = vpow2.f32 %v3654_v9  ;;  %v3656_v11 = vmul.f32 1.442695, %v3653_v10 }
 0x3be   :  { %4957 = vpow2.f32 %v3656_v11 }
 0x3c6   :  { %v4956_v12 = vpop.eup %4955 }
 0x3c7   :  { %v3658_v13 = vadd.f32 1.0, %v4956_v12  ;;  %v3661_v17 = vmul.f32 -0.5, %v4956_v12  ;;  %v3664_v21 = vand.u32 2147483647, %v4956_v12 }
 0x3c8   :  { %v4958_v15 = vpop.eup %4957 }
 0x3c9   :  { %4959 = vlog2.f32 %v3658_v13  ;;  %v3667_v16 = vadd.f32 1.0, %v4958_v15  ;;  %v3670_v18 = vmul.f32 -0.5, %v4958_v15  ;;  %v3662_v19 = vadd.f32 1.0, %v3661_v17 }
 0x3ca   :  { %v3673_v24 = vand.u32 2147483647, %v4958_v15  ;;  %vm3665_vm2 = vcmp.lt.f32.partialorder %v3664_v21, 0.0004427343 }
 0x3cb   :  { %4961 = vlog2.f32 %v3667_v16  ;;  %v3671_v22 = vadd.f32 1.0, %v3670_v18  ;;  %v3663_v26 = vmul.f32 %v4956_v12, %v3662_v19 }
 0x3cc   :  { %vm3674_vm3 = vcmp.lt.f32.partialorder %v3673_v24, 0.0004427343 }
 0x3cd   :  { %v3672_v31 = vmul.f32 %v4958_v15, %v3671_v22 }
 0x3d3   :  { %v4960_v23 = vpop.eup %4959 }
 0x3d4   :  { %v3660_v25 = vmul.f32 0.6931472, %v4960_v23 }
 0x3d5   :  { %v4962_v27 = vpop.eup %4961 }
 0x3d6   :  { %v3666_v29 = vsel %vm3665_vm2, %v3663_v26, %v3660_v25  ;;  %v3669_v30 = vmul.f32 0.6931472, %v4962_v27 }
 0x3d7   :  { %v3676_v32 = vadd.f32 %v3666_v29, %v3648_v28 }
 0x3d8   :  { %v3675_v34 = vsel %vm3674_vm3, %v3672_v31, %v3669_v30 }
 0x3d9   :  { %v3678_v14 = vadd.f32 1.0, %v3676_v32  ;;  %v3677_v35 = vadd.f32 %v3675_v34, %v3649_v33 }
 0x3db   :  { %v3680_v36 = vsel %vm3647_vm4, %v3678_v14, %v3637_v3  ;;  %v3679_v37 = vadd.f32 1.0, %v3677_v35 }
 0x3dc   :  { %3682 = vst [vmem:[#allocation11] sm:$0xff] %v3680_v36 }
 0x3dd   :  { %v3681_v38 = vsel %vm3647_vm4, %v3679_v37, %v3640_v6 }
 0x3de   :  { %3683 = vst [vmem:[#allocation11 + $0x8] sm:$0xff] %v3681_v38 }
 0x3df   :  { %5084 = shalt.err (!%p5081_p2)
}
 0x3e0   :  { %s5085_s8 = scalar_lea.hbm %s5227_s5, 256 }
 0x3e1   :  { %p5086_p3 = scmp.ne.s32.totalorder %s5227_s5, %s5085_s8  ;;  %p5089_p4 = scmp.lt.u32.totalorder %s5085_s8, %s5227_s5 }
 0x3e3   :  { %p5091_p5 = pnand %p5089_p4, %p5086_p3 }
 0x3e5   :  { %5094 = shalt.err (!%p5091_p5)
}
 0x3e6   :  { %s5116_s13 = smov 128   ;;  %s5117_s14 = smov 8  }
 0x3e7   :  { %3695 = dma.vmem_to_hbm [thread:$0]  %s3690_s3, 256, %s5227_s5, [#allocation4], %s5116_s13, %s5116_s13, %s5117_s14  }
 0x3e8   :  { %5101 = dma.done.wait [#allocation4], 256  }
 0x3e9   :  { %5102 = vsyncadd [#allocation4], 4294967040 }
 0x3ea   :  { %3699 = vsyncpa [#allocation3], 1 }
 0x3eb   :  { %3700 = vsyncpa [#allocation6], 1 }
 0x3ec   :  { %3701 = vsyncpa [#allocation9], 1 }
 0x3ed   :  { %3702 = vsyncpa [#allocation4], 1 }

</bundles_post_ra>
